<compile_context>
chip_gen: v7x
topology: tpu7x:2x2x1
jax: 0.10.0
libtpu: 0.0.40
codegen_flags: <defaults>
</compile_context>

<pallas_src>
import functools

import jax
import jax.numpy as jnp
from jax.experimental import pallas as pl
from jax.experimental.pallas import tpu as pltpu

EPS = 1e-5
GROUPS = 32  # nn.GroupNorm(2**5, C)


def _gn_swish_bf16(hf, gamma, beta, m_cg, m_gc, inv_count):
    """GroupNorm + swish, returns bf16.  hf: (HW, C) f32; stats stay f32."""
    s = jnp.sum(hf, axis=0, keepdims=True)                          # (1, C)
    sq = jnp.sum(hf * hf, axis=0, keepdims=True)                    # (1, C)
    stats = jnp.concatenate([s, sq], axis=0)                        # (2, C)
    gstats = jnp.dot(stats, m_cg, preferred_element_type=jnp.float32)   # (2, G)
    mean_g = gstats[0:1, :] * inv_count
    # NOTE: E[x^2] - E[x]^2 in f32; fine at GN activation scales (see review).
    var_g = gstats[1:2, :] * inv_count - mean_g * mean_g
    rstd_g = jax.lax.rsqrt(var_g + EPS)
    mr = jnp.concatenate([mean_g, rstd_g], axis=0)                  # (2, G)
    mrc = jnp.dot(mr, m_gc, preferred_element_type=jnp.float32)     # (2, C)
    # Fold gamma/beta/mean/rstd into one per-channel scale + shift (one FMA).
    scale = mrc[1:2, :] * gamma
    shift = beta - mrc[0:1, :] * scale
    hn = hf * scale + shift
    sig = pl.reciprocal(1.0 + jnp.exp(-hn), approx=True)            # EUP exp+rcp
    return (hn * sig).astype(jnp.bfloat16)                          # (HW, C) bf16


def _conv3x3_to_acc(hb_flat, w_ref, bias, H, W, c_in, acc_ref):
    """3x3 SAME conv of hb (bf16) into the f32 VMEM scratch accumulator.

    hb_flat: (H*W, c_in) bf16;  w_ref: (3, 3*c_in, c_out) bf16 Ref;
    bias: (1, c_out) f32;  acc_ref: (H*W, c_out) f32 scratch.
    """
    hb = hb_flat.reshape(H, W, c_in)
    zcol = jnp.zeros((H, 1, c_in), jnp.bfloat16)
    hw = jnp.concatenate([zcol, hb, zcol], axis=1)                  # (H, W+2, Cin)
    xs = jnp.concatenate(
        [hw[:, 0:W, :], hw[:, 1:W + 1, :], hw[:, 2:W + 2, :]], axis=-1)
    xs_flat = xs.reshape(H * W, 3 * c_in)                           # (HW, 3Cin)

    # dy = 0 tap: full height; bias folded into the full overwrite (also
    # clears stale scratch contents from the previous grid step).
    acc_ref[...] = (
        jnp.dot(xs_flat, w_ref[1], preferred_element_type=jnp.float32) + bias)
    # dy = -1 tap: input rows 0..H-2 -> output rows 1..H-1 (row offset W).
    acc_ref[pl.ds(W, (H - 1) * W), :] += jnp.dot(
        xs_flat[:(H - 1) * W, :], w_ref[0], preferred_element_type=jnp.float32)
    # dy = +1 tap: input rows 1..H-1 -> output rows 0..H-2.
    acc_ref[pl.ds(0, (H - 1) * W), :] += jnp.dot(
        xs_flat[W:, :], w_ref[2], preferred_element_type=jnp.float32)


def resnet_block_kernel(H, W, c_in, c_out, is_middle, *refs):
    if is_middle:
        (x_ref, g1, be1, w1, bb1, g2, be2, w2, bb2,
         m1cg, m1gc, m2cg, m2gc, o_ref, acc_ref) = refs
        wn = bn = None
    else:
        (x_ref, g1, be1, w1, bb1, g2, be2, w2, bb2,
         m1cg, m1gc, m2cg, m2gc, wn, bn, o_ref, acc_ref) = refs

    x2 = x_ref[...].reshape(H * W, c_in)          # bf16 (HW, Cin)
    xf = x2.astype(jnp.float32)

    inv1 = 1.0 / float(H * W * (c_in // GROUPS))
    inv2 = 1.0 / float(H * W * (c_out // GROUPS))

    h = _gn_swish_bf16(xf, g1[...], be1[...], m1cg[...], m1gc[...], inv1)
    _conv3x3_to_acc(h, w1, bb1[...], H, W, c_in, acc_ref)
    h = _gn_swish_bf16(acc_ref[...], g2[...], be2[...], m2cg[...], m2gc[...], inv2)
    _conv3x3_to_acc(h, w2, bb2[...], H, W, c_out, acc_ref)

    if is_middle:
        shortcut = xf
    else:
        # 1x1 conv shortcut: bf16 operands on the MXU, f32 accumulation.
        shortcut = jnp.dot(x2, wn[...], preferred_element_type=jnp.float32) + bn[...]

    o_ref[...] = (shortcut + acc_ref[...]).reshape(H, W, c_out).astype(o_ref.dtype)


def group_matrices(c, g):
    gs = c // g
    m_cg = (jnp.arange(c)[:, None] // gs == jnp.arange(g)[None, :]).astype(jnp.float32)
    return m_cg, m_cg.T


def _vmem_limit_bytes():
    """Generation-aware VMEM limit with headroom (48 MiB v7x, 112 MiB v5e/v6e)."""
    mib = 1024 * 1024
    try:
        cap = int(pltpu.get_tpu_info().vmem_capacity_bytes)
    except Exception:
        cap = 128 * mib
    return int(max(32 * mib, min(cap - 16 * mib, 112 * mib)))


def resnet_block_pallas(x, p, is_middle):
    B, H, W, c_in = x.shape
    c_out = p["w2"].shape[-1]
    assert c_in % GROUPS == 0 and c_out % GROUPS == 0
    assert W % 8 == 0, "W must be a multiple of 8 for layout-preserving reshapes"
    m1cg, m1gc = group_matrices(c_in, GROUPS)
    m2cg, m2gc = group_matrices(c_out, GROUPS)

    # bf16 activation I/O in HBM; f32 stats / accumulation in-kernel.
    x = x.astype(jnp.bfloat16)
    # Conv weights: HWIO (3,3,Cin,Cout) -> (3, 3*Cin, Cout), bf16 for the MXU.
    w1 = p["w1"].reshape(3, 3 * c_in, c_out).astype(jnp.bfloat16)
    w2 = p["w2"].reshape(3, 3 * c_out, c_out).astype(jnp.bfloat16)

    args = [
        x,
        p["gamma1"].reshape(1, c_in).astype(jnp.float32),
        p["beta1"].reshape(1, c_in).astype(jnp.float32),
        w1, p["b1"].reshape(1, c_out).astype(jnp.float32),
        p["gamma2"].reshape(1, c_out).astype(jnp.float32),
        p["beta2"].reshape(1, c_out).astype(jnp.float32),
        w2, p["b2"].reshape(1, c_out).astype(jnp.float32),
        m1cg, m1gc, m2cg, m2gc,
    ]
    if not is_middle:
        args += [p["wn"].astype(jnp.bfloat16),
                 p["bn"].reshape(1, c_out).astype(jnp.float32)]

    def const_spec(a):
        zeros = (0,) * a.ndim
        # Grid-invariant operand: DMA'd once, single-buffered to save VMEM.
        return pl.BlockSpec(a.shape, lambda b, _z=zeros: _z,
                            pipeline_mode=pl.Buffered(1))

    in_specs = [pl.BlockSpec((None, H, W, c_in), lambda b: (b, 0, 0, 0))]
    in_specs += [const_spec(a) for a in args[1:]]
    out_spec = pl.BlockSpec((None, H, W, c_out), lambda b: (b, 0, 0, 0))

    kernel = functools.partial(resnet_block_kernel, H, W, c_in, c_out, is_middle)
    return pl.pallas_call(
        kernel,
        out_shape=jax.ShapeDtypeStruct((B, H, W, c_out), jnp.bfloat16),
        grid=(B,),
        in_specs=in_specs,
        out_specs=out_spec,
        scratch_shapes=[pltpu.VMEM((H * W, c_out), jnp.float32)],
        compiler_params=pltpu.CompilerParams(
            dimension_semantics=("parallel",),
            vmem_limit_bytes=_vmem_limit_bytes(),
        ),
    )(*args)


def resnet_block_ref(x, p, is_middle):
    """Pure-JAX f32 reference (same NHWC layout), mirrors the PyTorch forward."""
    def gn_swish(h, gamma, beta):
        B, H, W, C = h.shape
        hg = h.reshape(B, H * W, GROUPS, C // GROUPS)
        mean = jnp.mean(hg, axis=(1, 3), keepdims=True)
        var = jnp.mean((hg - mean) ** 2, axis=(1, 3), keepdims=True)
        hn = ((hg - mean) / jnp.sqrt(var + EPS)).reshape(B, H, W, C)
        hn = hn * gamma.reshape(1, 1, 1, C) + beta.reshape(1, 1, 1, C)
        return hn * jax.nn.sigmoid(hn)

    def conv(h, w, b):
        out = jax.lax.conv_general_dilated(
            h, w, (1, 1), "SAME", dimension_numbers=("NHWC", "HWIO", "NHWC"))
        return out + b.reshape(1, 1, 1, -1)

    h = gn_swish(x, p["gamma1"], p["beta1"])
    h = conv(h, p["w1"], p["b1"])
    h = gn_swish(h, p["gamma2"], p["beta2"])
    h = conv(h, p["w2"], p["b2"])
    if is_middle:
        sc = x
    else:
        sc = jnp.einsum("bhwc,cd->bhwd", x, p["wn"]) + p["bn"].reshape(1, 1, 1, -1)
    return sc + h


def make_params(key, c_in, c_out, is_middle):
    ks = jax.random.split(key, 12)
    std = 0.05
    p = {
        "gamma1": 1.0 + 0.1 * jax.random.normal(ks[0], (c_in,), jnp.float32),
        "beta1": 0.1 * jax.random.normal(ks[1], (c_in,), jnp.float32),
        "w1": std * jax.random.normal(ks[2], (3, 3, c_in, c_out), jnp.float32),
        "b1": 0.1 * jax.random.normal(ks[3], (c_out,), jnp.float32),
        "gamma2": 1.0 + 0.1 * jax.random.normal(ks[4], (c_out,), jnp.float32),
        "beta2": 0.1 * jax.random.normal(ks[5], (c_out,), jnp.float32),
        "w2": std * jax.random.normal(ks[6], (3, 3, c_out, c_out), jnp.float32),
        "b2": 0.1 * jax.random.normal(ks[7], (c_out,), jnp.float32),
    }
    if not is_middle:
        p["wn"] = std * jax.random.normal(ks[8], (c_in, c_out), jnp.float32)
        p["bn"] = 0.1 * jax.random.normal(ks[9], (c_out,), jnp.float32)
    return p


if __name__ == "__main__":
    key = jax.random.PRNGKey(0)
    B, H, W = 2, 16, 16
    # bf16 activation I/O + bf16 MXU operands (f32 accumulation) vs f32 ref.
    ATOL = RTOL = 5e-2

    # Case 1: log2_count_in=6, log2_count_out=7 -> m=64, n=128 (nin_shortcut),
    # lane-dense output channels as in the real detokenizer stages.
    c_in, c_out = 64, 128
    kx, kp = jax.random.split(key)
    x = jax.random.normal(kx, (B, H, W, c_in), jnp.float32)
    params = make_params(kp, c_in, c_out, is_middle=False)
    out = jax.block_until_ready(resnet_block_pallas(x, params, is_middle=False))
    ref = resnet_block_ref(x, params, is_middle=False)
    assert out.shape == (B, H, W, c_out)
    err = float(jnp.max(jnp.abs(out.astype(jnp.float32) - ref)))
    assert jnp.allclose(out.astype(jnp.float32), ref, atol=ATOL, rtol=RTOL), err

    # Case 2: is_middle (m == n == 128, identity shortcut).
    c_mid = 128
    kx2, kp2 = jax.random.split(kp)
    x2 = jax.random.normal(kx2, (B, H, W, c_mid), jnp.float32)
    params2 = make_params(kp2, c_mid, c_mid, is_middle=True)
    out2 = jax.block_until_ready(resnet_block_pallas(x2, params2, is_middle=True))
    ref2 = resnet_block_ref(x2, params2, is_middle=True)
    err2 = float(jnp.max(jnp.abs(out2.astype(jnp.float32) - ref2)))
    assert jnp.allclose(out2.astype(jnp.float32), ref2, atol=ATOL, rtol=RTOL), err2

    print("KERNEL_OK")
</pallas_src>

<mosaic_0001>
module attributes {stable_mosaic.version = 11 : i64} {
  func.func @resnet_block_kernel(%arg0: i32, %arg1: memref<1x16x16x64xbf16, #tpu.memory_space<vmem>>, %arg2: memref<1x64xf32, #tpu.memory_space<vmem>>, %arg3: memref<1x64xf32, #tpu.memory_space<vmem>>, %arg4: memref<3x192x128xbf16, #tpu.memory_space<vmem>>, %arg5: memref<1x128xf32, #tpu.memory_space<vmem>>, %arg6: memref<1x128xf32, #tpu.memory_space<vmem>>, %arg7: memref<1x128xf32, #tpu.memory_space<vmem>>, %arg8: memref<3x384x128xbf16, #tpu.memory_space<vmem>>, %arg9: memref<1x128xf32, #tpu.memory_space<vmem>>, %arg10: memref<64x32xf32, #tpu.memory_space<vmem>>, %arg11: memref<32x64xf32, #tpu.memory_space<vmem>>, %arg12: memref<128x32xf32, #tpu.memory_space<vmem>>, %arg13: memref<32x128xf32, #tpu.memory_space<vmem>>, %arg14: memref<64x128xbf16, #tpu.memory_space<vmem>>, %arg15: memref<1x128xf32, #tpu.memory_space<vmem>>, %arg16: memref<1x16x16x128xbf16, #tpu.memory_space<vmem>>, %arg17: memref<256x128xf32, #tpu.memory_space<vmem>>) attributes {dimension_semantics = [#tpu.dimension_semantics<parallel>], iteration_bounds = array<i64: 2>, scalar_prefetch = 0 : i64, scratch_operands = 1 : i64, tpu.core_type = #tpu.core_type<tc>, window_params = [{transform_indices = @transform_0, window_bounds = array<i64: 1, 16, 16, 64>}, {pipeline_mode = #tpu.pipeline_mode<synchronous>, transform_indices = @transform_1, window_bounds = array<i64: 1, 64>}, {pipeline_mode = #tpu.pipeline_mode<synchronous>, transform_indices = @transform_2, window_bounds = array<i64: 1, 64>}, {pipeline_mode = #tpu.pipeline_mode<synchronous>, transform_indices = @transform_3, window_bounds = array<i64: 3, 192, 128>}, {pipeline_mode = #tpu.pipeline_mode<synchronous>, transform_indices = @transform_4, window_bounds = array<i64: 1, 128>}, {pipeline_mode = #tpu.pipeline_mode<synchronous>, transform_indices = @transform_5, window_bounds = array<i64: 1, 128>}, {pipeline_mode = #tpu.pipeline_mode<synchronous>, transform_indices = @transform_6, window_bounds = array<i64: 1, 128>}, {pipeline_mode = #tpu.pipeline_mode<synchronous>, transform_indices = @transform_7, window_bounds = array<i64: 3, 384, 128>}, {pipeline_mode = #tpu.pipeline_mode<synchronous>, transform_indices = @transform_8, window_bounds = array<i64: 1, 128>}, {pipeline_mode = #tpu.pipeline_mode<synchronous>, transform_indices = @transform_9, window_bounds = array<i64: 64, 32>}, {pipeline_mode = #tpu.pipeline_mode<synchronous>, transform_indices = @transform_10, window_bounds = array<i64: 32, 64>}, {pipeline_mode = #tpu.pipeline_mode<synchronous>, transform_indices = @transform_11, window_bounds = array<i64: 128, 32>}, {pipeline_mode = #tpu.pipeline_mode<synchronous>, transform_indices = @transform_12, window_bounds = array<i64: 32, 128>}, {pipeline_mode = #tpu.pipeline_mode<synchronous>, transform_indices = @transform_13, window_bounds = array<i64: 64, 128>}, {pipeline_mode = #tpu.pipeline_mode<synchronous>, transform_indices = @transform_14, window_bounds = array<i64: 1, 128>}, {transform_indices = @transform_15, window_bounds = array<i64: 1, 16, 16, 128>}]} {
    %c0 = arith.constant 0 : index
    %c0_0 = arith.constant 0 : index
    %c0_1 = arith.constant 0 : index
    %c0_2 = arith.constant 0 : index
    %0 = vector.load %arg1[%c0, %c0_0, %c0_1, %c0_2] : memref<1x16x16x64xbf16, #tpu.memory_space<vmem>>, vector<1x16x16x64xbf16>
    %1 = vector.shape_cast %0 : vector<1x16x16x64xbf16> to vector<16x16x64xbf16>
    %2 = vector.shape_cast %1 : vector<16x16x64xbf16> to vector<256x64xbf16>
    %3 = arith.extf %2 : vector<256x64xbf16> to vector<256x64xf32>
    %c0_3 = arith.constant 0 : index
    %c0_4 = arith.constant 0 : index
    %4 = vector.load %arg2[%c0_3, %c0_4] : memref<1x64xf32, #tpu.memory_space<vmem>>, vector<1x64xf32>
    %c0_5 = arith.constant 0 : index
    %c0_6 = arith.constant 0 : index
    %5 = vector.load %arg3[%c0_5, %c0_6] : memref<1x64xf32, #tpu.memory_space<vmem>>, vector<1x64xf32>
    %c0_7 = arith.constant 0 : index
    %c0_8 = arith.constant 0 : index
    %6 = vector.load %arg10[%c0_7, %c0_8] : memref<64x32xf32, #tpu.memory_space<vmem>>, vector<64x32xf32>
    %c0_9 = arith.constant 0 : index
    %c0_10 = arith.constant 0 : index
    %7 = vector.load %arg11[%c0_9, %c0_10] : memref<32x64xf32, #tpu.memory_space<vmem>>, vector<32x64xf32>
    %cst = arith.constant dense<0.000000e+00> : vector<64xf32>
    %8 = vector.multi_reduction <add>, %3, %cst [0] : vector<256x64xf32> to vector<64xf32>
    %9 = vector.shape_cast %8 : vector<64xf32> to vector<1x64xf32>
    %10 = arith.mulf %3, %3 : vector<256x64xf32>
    %cst_11 = arith.constant dense<0.000000e+00> : vector<64xf32>
    %11 = vector.multi_reduction <add>, %10, %cst_11 [0] : vector<256x64xf32> to vector<64xf32>
    %12 = vector.shape_cast %11 : vector<64xf32> to vector<1x64xf32>
    %13 = tpu.concatenate %9, %12 in 0 : vector<1x64xf32>, vector<1x64xf32> -> vector<2x64xf32>
    %cst_12 = arith.constant dense<0.000000e+00> : vector<2x32xf32>
    %14 = tpu.matmul %13, %6, %cst_12 {dimension_numbers = #tpu.dot_dimension_numbers<[1], [0], [0], [1], [0, 0, 1, 1], [], []>} : vector<2x64xf32>, vector<64x32xf32>, vector<2x32xf32> -> vector<2x32xf32>
    %15 = vector.extract_strided_slice %14 {offsets = [0, 0], sizes = [1, 32], strides = [1, 1]} : vector<2x32xf32> to vector<1x32xf32>
    %cst_13 = arith.constant 0.001953125 : f32
    %16 = vector.broadcast %cst_13 : f32 to vector<1x32xf32>
    %17 = arith.mulf %15, %16 : vector<1x32xf32>
    %18 = vector.extract_strided_slice %14 {offsets = [1, 0], sizes = [1, 32], strides = [1, 1]} : vector<2x32xf32> to vector<1x32xf32>
    %cst_14 = arith.constant 0.001953125 : f32
    %19 = vector.broadcast %cst_14 : f32 to vector<1x32xf32>
    %20 = arith.mulf %18, %19 : vector<1x32xf32>
    %21 = arith.mulf %17, %17 : vector<1x32xf32>
    %22 = arith.subf %20, %21 : vector<1x32xf32>
    %cst_15 = arith.constant 9.99999974E-6 : f32
    %23 = vector.broadcast %cst_15 : f32 to vector<1x32xf32>
    %24 = arith.addf %22, %23 : vector<1x32xf32>
    %25 = math.rsqrt %24 : vector<1x32xf32>
    %26 = tpu.concatenate %17, %25 in 0 : vector<1x32xf32>, vector<1x32xf32> -> vector<2x32xf32>
    %cst_16 = arith.constant dense<0.000000e+00> : vector<2x64xf32>
    %27 = tpu.matmul %26, %7, %cst_16 {dimension_numbers = #tpu.dot_dimension_numbers<[1], [0], [0], [1], [0, 0, 1, 1], [], []>} : vector<2x32xf32>, vector<32x64xf32>, vector<2x64xf32> -> vector<2x64xf32>
    %28 = vector.extract_strided_slice %27 {offsets = [1, 0], sizes = [1, 64], strides = [1, 1]} : vector<2x64xf32> to vector<1x64xf32>
    %29 = arith.mulf %28, %4 : vector<1x64xf32>
    %30 = vector.extract_strided_slice %27 {offsets = [0, 0], sizes = [1, 64], strides = [1, 1]} : vector<2x64xf32> to vector<1x64xf32>
    %31 = arith.mulf %30, %29 : vector<1x64xf32>
    %32 = arith.subf %5, %31 : vector<1x64xf32>
    %33 = vector.broadcast %29 : vector<1x64xf32> to vector<256x64xf32>
    %34 = arith.mulf %3, %33 : vector<256x64xf32>
    %35 = vector.broadcast %32 : vector<1x64xf32> to vector<256x64xf32>
    %36 = arith.addf %34, %35 : vector<256x64xf32>
    %cst_17 = arith.constant 0.000000e+00 : f32
    %37 = vector.broadcast %cst_17 : f32 to vector<256x64xf32>
    %38 = arith.subf %37, %36 : vector<256x64xf32>
    %39 = math.exp %38 : vector<256x64xf32>
    %cst_18 = arith.constant 1.000000e+00 : f32
    %40 = vector.broadcast %cst_18 : f32 to vector<256x64xf32>
    %41 = arith.addf %40, %39 : vector<256x64xf32>
    %42 = tpu.reciprocal %41 {approx = true} : vector<256x64xf32> -> vector<256x64xf32>
    %43 = arith.mulf %36, %42 : vector<256x64xf32>
    %44 = arith.truncf %43 : vector<256x64xf32> to vector<256x64xbf16>
    %c0_19 = arith.constant 0 : index
    %c0_20 = arith.constant 0 : index
    %45 = vector.load %arg5[%c0_19, %c0_20] : memref<1x128xf32, #tpu.memory_space<vmem>>, vector<1x128xf32>
    %46 = vector.shape_cast %44 : vector<256x64xbf16> to vector<16x16x64xbf16>
    %cst_21 = arith.constant 0.000000e+00 : bf16
    %47 = vector.broadcast %cst_21 : bf16 to vector<16x1x64xbf16>
    %48 = tpu.concatenate %47, %46, %47 in 1 : vector<16x1x64xbf16>, vector<16x16x64xbf16>, vector<16x1x64xbf16> -> vector<16x18x64xbf16>
    %49 = vector.extract_strided_slice %48 {offsets = [0, 0, 0], sizes = [16, 16, 64], strides = [1, 1, 1]} : vector<16x18x64xbf16> to vector<16x16x64xbf16>
    %50 = vector.extract_strided_slice %48 {offsets = [0, 1, 0], sizes = [16, 16, 64], strides = [1, 1, 1]} : vector<16x18x64xbf16> to vector<16x16x64xbf16>
    %51 = vector.extract_strided_slice %48 {offsets = [0, 2, 0], sizes = [16, 16, 64], strides = [1, 1, 1]} : vector<16x18x64xbf16> to vector<16x16x64xbf16>
    %52 = tpu.concatenate %49, %50, %51 in 2 : vector<16x16x64xbf16>, vector<16x16x64xbf16>, vector<16x16x64xbf16> -> vector<16x16x192xbf16>
    %53 = vector.shape_cast %52 : vector<16x16x192xbf16> to vector<256x192xbf16>
    %c1 = arith.constant 1 : index
    %c0_22 = arith.constant 0 : index
    %c0_23 = arith.constant 0 : index
    %54 = vector.load %arg4[%c1, %c0_22, %c0_23] : memref<3x192x128xbf16, #tpu.memory_space<vmem>>, vector<1x192x128xbf16>
    %55 = vector.shape_cast %54 : vector<1x192x128xbf16> to vector<192x128xbf16>
    %cst_24 = arith.constant dense<0.000000e+00> : vector<256x128xf32>
    %56 = tpu.matmul %53, %55, %cst_24 {dimension_numbers = #tpu.dot_dimension_numbers<[1], [0], [0], [1], [0, 0, 1, 1], [], []>} : vector<256x192xbf16>, vector<192x128xbf16>, vector<256x128xf32> -> vector<256x128xf32>
    %57 = vector.broadcast %45 : vector<1x128xf32> to vector<256x128xf32>
    %58 = arith.addf %56, %57 : vector<256x128xf32>
    %c0_25 = arith.constant 0 : index
    %c0_26 = arith.constant 0 : index
    %59 = vector.load %arg17[%c0_25, %c0_26] : memref<256x128xf32, #tpu.memory_space<vmem>>, vector<256x128xf32>
    tpu.vector_store %arg17[%c0_25, %c0_26], %58 {strides = array<i32>} : memref<256x128xf32, #tpu.memory_space<vmem>>, vector<256x128xf32>,
    %c16 = arith.constant 16 : index
    %c0_27 = arith.constant 0 : index
    %60 = vector.load %arg17[%c16, %c0_27] : memref<256x128xf32, #tpu.memory_space<vmem>>, vector<240x128xf32>
    %61 = vector.extract_strided_slice %53 {offsets = [0, 0], sizes = [240, 192], strides = [1, 1]} : vector<256x192xbf16> to vector<240x192xbf16>
    %c0_28 = arith.constant 0 : index
    %c0_29 = arith.constant 0 : index
    %c0_30 = arith.constant 0 : index
    %62 = vector.load %arg4[%c0_28, %c0_29, %c0_30] : memref<3x192x128xbf16, #tpu.memory_space<vmem>>, vector<1x192x128xbf16>
    %63 = vector.shape_cast %62 : vector<1x192x128xbf16> to vector<192x128xbf16>
    %cst_31 = arith.constant dense<0.000000e+00> : vector<240x128xf32>
    %64 = tpu.matmul %61, %63, %cst_31 {dimension_numbers = #tpu.dot_dimension_numbers<[1], [0], [0], [1], [0, 0, 1, 1], [], []>} : vector<240x192xbf16>, vector<192x128xbf16>, vector<240x128xf32> -> vector<240x128xf32>
    %65 = arith.addf %60, %64 : vector<240x128xf32>
    %c16_32 = arith.constant 16 : index
    %c0_33 = arith.constant 0 : index
    %66 = vector.load %arg17[%c16_32, %c0_33] : memref<256x128xf32, #tpu.memory_space<vmem>>, vector<240x128xf32>
    tpu.vector_store %arg17[%c16_32, %c0_33], %65 {strides = array<i32>} : memref<256x128xf32, #tpu.memory_space<vmem>>, vector<240x128xf32>,
    %c0_34 = arith.constant 0 : index
    %c0_35 = arith.constant 0 : index
    %67 = vector.load %arg17[%c0_34, %c0_35] : memref<256x128xf32, #tpu.memory_space<vmem>>, vector<240x128xf32>
    %68 = vector.extract_strided_slice %53 {offsets = [16, 0], sizes = [240, 192], strides = [1, 1]} : vector<256x192xbf16> to vector<240x192xbf16>
    %c2 = arith.constant 2 : index
    %c0_36 = arith.constant 0 : index
    %c0_37 = arith.constant 0 : index
    %69 = vector.load %arg4[%c2, %c0_36, %c0_37] : memref<3x192x128xbf16, #tpu.memory_space<vmem>>, vector<1x192x128xbf16>
    %70 = vector.shape_cast %69 : vector<1x192x128xbf16> to vector<192x128xbf16>
    %cst_38 = arith.constant dense<0.000000e+00> : vector<240x128xf32>
    %71 = tpu.matmul %68, %70, %cst_38 {dimension_numbers = #tpu.dot_dimension_numbers<[1], [0], [0], [1], [0, 0, 1, 1], [], []>} : vector<240x192xbf16>, vector<192x128xbf16>, vector<240x128xf32> -> vector<240x128xf32>
    %72 = arith.addf %67, %71 : vector<240x128xf32>
    %c0_39 = arith.constant 0 : index
    %c0_40 = arith.constant 0 : index
    %73 = vector.load %arg17[%c0_39, %c0_40] : memref<256x128xf32, #tpu.memory_space<vmem>>, vector<240x128xf32>
    tpu.vector_store %arg17[%c0_39, %c0_40], %72 {strides = array<i32>} : memref<256x128xf32, #tpu.memory_space<vmem>>, vector<240x128xf32>,
    %c0_41 = arith.constant 0 : index
    %c0_42 = arith.constant 0 : index
    %74 = vector.load %arg17[%c0_41, %c0_42] : memref<256x128xf32, #tpu.memory_space<vmem>>, vector<256x128xf32>
    %c0_43 = arith.constant 0 : index
    %c0_44 = arith.constant 0 : index
    %75 = vector.load %arg6[%c0_43, %c0_44] : memref<1x128xf32, #tpu.memory_space<vmem>>, vector<1x128xf32>
    %c0_45 = arith.constant 0 : index
    %c0_46 = arith.constant 0 : index
    %76 = vector.load %arg7[%c0_45, %c0_46] : memref<1x128xf32, #tpu.memory_space<vmem>>, vector<1x128xf32>
    %c0_47 = arith.constant 0 : index
    %c0_48 = arith.constant 0 : index
    %77 = vector.load %arg12[%c0_47, %c0_48] : memref<128x32xf32, #tpu.memory_space<vmem>>, vector<128x32xf32>
    %c0_49 = arith.constant 0 : index
    %c0_50 = arith.constant 0 : index
    %78 = vector.load %arg13[%c0_49, %c0_50] : memref<32x128xf32, #tpu.memory_space<vmem>>, vector<32x128xf32>
    %cst_51 = arith.constant dense<0.000000e+00> : vector<128xf32>
    %79 = vector.multi_reduction <add>, %74, %cst_51 [0] : vector<256x128xf32> to vector<128xf32>
    %80 = vector.shape_cast %79 : vector<128xf32> to vector<1x128xf32>
    %81 = arith.mulf %74, %74 : vector<256x128xf32>
    %cst_52 = arith.constant dense<0.000000e+00> : vector<128xf32>
    %82 = vector.multi_reduction <add>, %81, %cst_52 [0] : vector<256x128xf32> to vector<128xf32>
    %83 = vector.shape_cast %82 : vector<128xf32> to vector<1x128xf32>
    %84 = tpu.concatenate %80, %83 in 0 : vector<1x128xf32>, vector<1x128xf32> -> vector<2x128xf32>
    %cst_53 = arith.constant dense<0.000000e+00> : vector<2x32xf32>
    %85 = tpu.matmul %84, %77, %cst_53 {dimension_numbers = #tpu.dot_dimension_numbers<[1], [0], [0], [1], [0, 0, 1, 1], [], []>} : vector<2x128xf32>, vector<128x32xf32>, vector<2x32xf32> -> vector<2x32xf32>
    %86 = vector.extract_strided_slice %85 {offsets = [0, 0], sizes = [1, 32], strides = [1, 1]} : vector<2x32xf32> to vector<1x32xf32>
    %cst_54 = arith.constant 9.765625E-4 : f32
    %87 = vector.broadcast %cst_54 : f32 to vector<1x32xf32>
    %88 = arith.mulf %86, %87 : vector<1x32xf32>
    %89 = vector.extract_strided_slice %85 {offsets = [1, 0], sizes = [1, 32], strides = [1, 1]} : vector<2x32xf32> to vector<1x32xf32>
    %cst_55 = arith.constant 9.765625E-4 : f32
    %90 = vector.broadcast %cst_55 : f32 to vector<1x32xf32>
    %91 = arith.mulf %89, %90 : vector<1x32xf32>
    %92 = arith.mulf %88, %88 : vector<1x32xf32>
    %93 = arith.subf %91, %92 : vector<1x32xf32>
    %cst_56 = arith.constant 9.99999974E-6 : f32
    %94 = vector.broadcast %cst_56 : f32 to vector<1x32xf32>
    %95 = arith.addf %93, %94 : vector<1x32xf32>
    %96 = math.rsqrt %95 : vector<1x32xf32>
    %97 = tpu.concatenate %88, %96 in 0 : vector<1x32xf32>, vector<1x32xf32> -> vector<2x32xf32>
    %cst_57 = arith.constant dense<0.000000e+00> : vector<2x128xf32>
    %98 = tpu.matmul %97, %78, %cst_57 {dimension_numbers = #tpu.dot_dimension_numbers<[1], [0], [0], [1], [0, 0, 1, 1], [], []>} : vector<2x32xf32>, vector<32x128xf32>, vector<2x128xf32> -> vector<2x128xf32>
    %99 = vector.extract_strided_slice %98 {offsets = [1, 0], sizes = [1, 128], strides = [1, 1]} : vector<2x128xf32> to vector<1x128xf32>
    %100 = arith.mulf %99, %75 : vector<1x128xf32>
    %101 = vector.extract_strided_slice %98 {offsets = [0, 0], sizes = [1, 128], strides = [1, 1]} : vector<2x128xf32> to vector<1x128xf32>
    %102 = arith.mulf %101, %100 : vector<1x128xf32>
    %103 = arith.subf %76, %102 : vector<1x128xf32>
    %104 = vector.broadcast %100 : vector<1x128xf32> to vector<256x128xf32>
    %105 = arith.mulf %74, %104 : vector<256x128xf32>
    %106 = vector.broadcast %103 : vector<1x128xf32> to vector<256x128xf32>
    %107 = arith.addf %105, %106 : vector<256x128xf32>
    %cst_58 = arith.constant 0.000000e+00 : f32
    %108 = vector.broadcast %cst_58 : f32 to vector<256x128xf32>
    %109 = arith.subf %108, %107 : vector<256x128xf32>
    %110 = math.exp %109 : vector<256x128xf32>
    %cst_59 = arith.constant 1.000000e+00 : f32
    %111 = vector.broadcast %cst_59 : f32 to vector<256x128xf32>
    %112 = arith.addf %111, %110 : vector<256x128xf32>
    %113 = tpu.reciprocal %112 {approx = true} : vector<256x128xf32> -> vector<256x128xf32>
    %114 = arith.mulf %107, %113 : vector<256x128xf32>
    %115 = arith.truncf %114 : vector<256x128xf32> to vector<256x128xbf16>
    %c0_60 = arith.constant 0 : index
    %c0_61 = arith.constant 0 : index
    %116 = vector.load %arg9[%c0_60, %c0_61] : memref<1x128xf32, #tpu.memory_space<vmem>>, vector<1x128xf32>
    %117 = vector.shape_cast %115 : vector<256x128xbf16> to vector<16x16x128xbf16>
    %cst_62 = arith.constant 0.000000e+00 : bf16
    %118 = vector.broadcast %cst_62 : bf16 to vector<16x1x128xbf16>
    %119 = tpu.concatenate %118, %117, %118 in 1 : vector<16x1x128xbf16>, vector<16x16x128xbf16>, vector<16x1x128xbf16> -> vector<16x18x128xbf16>
    %120 = vector.extract_strided_slice %119 {offsets = [0, 0, 0], sizes = [16, 16, 128], strides = [1, 1, 1]} : vector<16x18x128xbf16> to vector<16x16x128xbf16>
    %121 = vector.extract_strided_slice %119 {offsets = [0, 1, 0], sizes = [16, 16, 128], strides = [1, 1, 1]} : vector<16x18x128xbf16> to vector<16x16x128xbf16>
    %122 = vector.extract_strided_slice %119 {offsets = [0, 2, 0], sizes = [16, 16, 128], strides = [1, 1, 1]} : vector<16x18x128xbf16> to vector<16x16x128xbf16>
    %123 = tpu.concatenate %120, %121, %122 in 2 : vector<16x16x128xbf16>, vector<16x16x128xbf16>, vector<16x16x128xbf16> -> vector<16x16x384xbf16>
    %124 = vector.shape_cast %123 : vector<16x16x384xbf16> to vector<256x384xbf16>
    %c1_63 = arith.constant 1 : index
    %c0_64 = arith.constant 0 : index
    %c0_65 = arith.constant 0 : index
    %125 = vector.load %arg8[%c1_63, %c0_64, %c0_65] : memref<3x384x128xbf16, #tpu.memory_space<vmem>>, vector<1x384x128xbf16>
    %126 = vector.shape_cast %125 : vector<1x384x128xbf16> to vector<384x128xbf16>
    %cst_66 = arith.constant dense<0.000000e+00> : vector<256x128xf32>
    %127 = tpu.matmul %124, %126, %cst_66 {dimension_numbers = #tpu.dot_dimension_numbers<[1], [0], [0], [1], [0, 0, 1, 1], [], []>} : vector<256x384xbf16>, vector<384x128xbf16>, vector<256x128xf32> -> vector<256x128xf32>
    %128 = vector.broadcast %116 : vector<1x128xf32> to vector<256x128xf32>
    %129 = arith.addf %127, %128 : vector<256x128xf32>
    %c0_67 = arith.constant 0 : index
    %c0_68 = arith.constant 0 : index
    %130 = vector.load %arg17[%c0_67, %c0_68] : memref<256x128xf32, #tpu.memory_space<vmem>>, vector<256x128xf32>
    tpu.vector_store %arg17[%c0_67, %c0_68], %129 {strides = array<i32>} : memref<256x128xf32, #tpu.memory_space<vmem>>, vector<256x128xf32>,
    %c16_69 = arith.constant 16 : index
    %c0_70 = arith.constant 0 : index
    %131 = vector.load %arg17[%c16_69, %c0_70] : memref<256x128xf32, #tpu.memory_space<vmem>>, vector<240x128xf32>
    %132 = vector.extract_strided_slice %124 {offsets = [0, 0], sizes = [240, 384], strides = [1, 1]} : vector<256x384xbf16> to vector<240x384xbf16>
    %c0_71 = arith.constant 0 : index
    %c0_72 = arith.constant 0 : index
    %c0_73 = arith.constant 0 : index
    %133 = vector.load %arg8[%c0_71, %c0_72, %c0_73] : memref<3x384x128xbf16, #tpu.memory_space<vmem>>, vector<1x384x128xbf16>
    %134 = vector.shape_cast %133 : vector<1x384x128xbf16> to vector<384x128xbf16>
    %cst_74 = arith.constant dense<0.000000e+00> : vector<240x128xf32>
    %135 = tpu.matmul %132, %134, %cst_74 {dimension_numbers = #tpu.dot_dimension_numbers<[1], [0], [0], [1], [0, 0, 1, 1], [], []>} : vector<240x384xbf16>, vector<384x128xbf16>, vector<240x128xf32> -> vector<240x128xf32>
    %136 = arith.addf %131, %135 : vector<240x128xf32>
    %c16_75 = arith.constant 16 : index
    %c0_76 = arith.constant 0 : index
    %137 = vector.load %arg17[%c16_75, %c0_76] : memref<256x128xf32, #tpu.memory_space<vmem>>, vector<240x128xf32>
    tpu.vector_store %arg17[%c16_75, %c0_76], %136 {strides = array<i32>} : memref<256x128xf32, #tpu.memory_space<vmem>>, vector<240x128xf32>,
    %c0_77 = arith.constant 0 : index
    %c0_78 = arith.constant 0 : index
    %138 = vector.load %arg17[%c0_77, %c0_78] : memref<256x128xf32, #tpu.memory_space<vmem>>, vector<240x128xf32>
    %139 = vector.extract_strided_slice %124 {offsets = [16, 0], sizes = [240, 384], strides = [1, 1]} : vector<256x384xbf16> to vector<240x384xbf16>
    %c2_79 = arith.constant 2 : index
    %c0_80 = arith.constant 0 : index
    %c0_81 = arith.constant 0 : index
    %140 = vector.load %arg8[%c2_79, %c0_80, %c0_81] : memref<3x384x128xbf16, #tpu.memory_space<vmem>>, vector<1x384x128xbf16>
    %141 = vector.shape_cast %140 : vector<1x384x128xbf16> to vector<384x128xbf16>
    %cst_82 = arith.constant dense<0.000000e+00> : vector<240x128xf32>
    %142 = tpu.matmul %139, %141, %cst_82 {dimension_numbers = #tpu.dot_dimension_numbers<[1], [0], [0], [1], [0, 0, 1, 1], [], []>} : vector<240x384xbf16>, vector<384x128xbf16>, vector<240x128xf32> -> vector<240x128xf32>
    %143 = arith.addf %138, %142 : vector<240x128xf32>
    %c0_83 = arith.constant 0 : index
    %c0_84 = arith.constant 0 : index
    %144 = vector.load %arg17[%c0_83, %c0_84] : memref<256x128xf32, #tpu.memory_space<vmem>>, vector<240x128xf32>
    tpu.vector_store %arg17[%c0_83, %c0_84], %143 {strides = array<i32>} : memref<256x128xf32, #tpu.memory_space<vmem>>, vector<240x128xf32>,
    %c0_85 = arith.constant 0 : index
    %c0_86 = arith.constant 0 : index
    %145 = vector.load %arg14[%c0_85, %c0_86] : memref<64x128xbf16, #tpu.memory_space<vmem>>, vector<64x128xbf16>
    %cst_87 = arith.constant dense<0.000000e+00> : vector<256x128xf32>
    %146 = tpu.matmul %2, %145, %cst_87 {dimension_numbers = #tpu.dot_dimension_numbers<[1], [0], [0], [1], [0, 0, 1, 1], [], []>} : vector<256x64xbf16>, vector<64x128xbf16>, vector<256x128xf32> -> vector<256x128xf32>
    %c0_88 = arith.constant 0 : index
    %c0_89 = arith.constant 0 : index
    %147 = vector.load %arg15[%c0_88, %c0_89] : memref<1x128xf32, #tpu.memory_space<vmem>>, vector<1x128xf32>
    %148 = vector.broadcast %147 : vector<1x128xf32> to vector<256x128xf32>
    %149 = arith.addf %146, %148 : vector<256x128xf32>
    %c0_90 = arith.constant 0 : index
    %c0_91 = arith.constant 0 : index
    %150 = vector.load %arg17[%c0_90, %c0_91] : memref<256x128xf32, #tpu.memory_space<vmem>>, vector<256x128xf32>
    %151 = arith.addf %149, %150 : vector<256x128xf32>
    %152 = vector.shape_cast %151 : vector<256x128xf32> to vector<16x16x128xf32>
    %153 = arith.truncf %152 : vector<16x16x128xf32> to vector<16x16x128xbf16>
    %c0_92 = arith.constant 0 : index
    %c0_93 = arith.constant 0 : index
    %c0_94 = arith.constant 0 : index
    %c0_95 = arith.constant 0 : index
    %154 = vector.load %arg16[%c0_92, %c0_93, %c0_94, %c0_95] : memref<1x16x16x128xbf16, #tpu.memory_space<vmem>>, vector<1x16x16x128xbf16>
    %155 = vector.shape_cast %154 : vector<1x16x16x128xbf16> to vector<16x16x128xbf16>
    %156 = vector.shape_cast %153 : vector<16x16x128xbf16> to vector<1x16x16x128xbf16>
    tpu.vector_store %arg16[%c0_92, %c0_93, %c0_94, %c0_95], %156 {strides = array<i32>} : memref<1x16x16x128xbf16, #tpu.memory_space<vmem>>, vector<1x16x16x128xbf16>,
    return
  }
  func.func @transform_0(%arg0: i32) -> (i32, i32, i32, i32) {
    %c0_i32 = arith.constant 0 : i32
    %c0_i32_0 = arith.constant 0 : i32
    %c0_i32_1 = arith.constant 0 : i32
    %c0_i32_2 = arith.constant 0 : i32
    return %arg0, %c0_i32, %c0_i32_0, %c0_i32_1 : i32, i32, i32, i32
  }
  func.func @transform_1(%arg0: i32) -> (i32, i32) {
    %c0_i32 = arith.constant 0 : i32
    %c0_i32_0 = arith.constant 0 : i32
    %c0_i32_1 = arith.constant 0 : i32
    return %c0_i32, %c0_i32_0 : i32, i32
  }
  func.func @transform_2(%arg0: i32) -> (i32, i32) {
    %c0_i32 = arith.constant 0 : i32
    %c0_i32_0 = arith.constant 0 : i32
    %c0_i32_1 = arith.constant 0 : i32
    return %c0_i32, %c0_i32_0 : i32, i32
  }
  func.func @transform_3(%arg0: i32) -> (i32, i32, i32) {
    %c0_i32 = arith.constant 0 : i32
    %c0_i32_0 = arith.constant 0 : i32
    %c0_i32_1 = arith.constant 0 : i32
    %c0_i32_2 = arith.constant 0 : i32
    return %c0_i32, %c0_i32_0, %c0_i32_1 : i32, i32, i32
  }
  func.func @transform_4(%arg0: i32) -> (i32, i32) {
    %c0_i32 = arith.constant 0 : i32
    %c0_i32_0 = arith.constant 0 : i32
    %c0_i32_1 = arith.constant 0 : i32
    return %c0_i32, %c0_i32_0 : i32, i32
  }
  func.func @transform_5(%arg0: i32) -> (i32, i32) {
    %c0_i32 = arith.constant 0 : i32
    %c0_i32_0 = arith.constant 0 : i32
    %c0_i32_1 = arith.constant 0 : i32
    return %c0_i32, %c0_i32_0 : i32, i32
  }
  func.func @transform_6(%arg0: i32) -> (i32, i32) {
    %c0_i32 = arith.constant 0 : i32
    %c0_i32_0 = arith.constant 0 : i32
    %c0_i32_1 = arith.constant 0 : i32
    return %c0_i32, %c0_i32_0 : i32, i32
  }
  func.func @transform_7(%arg0: i32) -> (i32, i32, i32) {
    %c0_i32 = arith.constant 0 : i32
    %c0_i32_0 = arith.constant 0 : i32
    %c0_i32_1 = arith.constant 0 : i32
    %c0_i32_2 = arith.constant 0 : i32
    return %c0_i32, %c0_i32_0, %c0_i32_1 : i32, i32, i32
  }
  func.func @transform_8(%arg0: i32) -> (i32, i32) {
    %c0_i32 = arith.constant 0 : i32
    %c0_i32_0 = arith.constant 0 : i32
    %c0_i32_1 = arith.constant 0 : i32
    return %c0_i32, %c0_i32_0 : i32, i32
  }
  func.func @transform_9(%arg0: i32) -> (i32, i32) {
    %c0_i32 = arith.constant 0 : i32
    %c0_i32_0 = arith.constant 0 : i32
    %c0_i32_1 = arith.constant 0 : i32
    return %c0_i32, %c0_i32_0 : i32, i32
  }
  func.func @transform_10(%arg0: i32) -> (i32, i32) {
    %c0_i32 = arith.constant 0 : i32
    %c0_i32_0 = arith.constant 0 : i32
    %c0_i32_1 = arith.constant 0 : i32
    return %c0_i32, %c0_i32_0 : i32, i32
  }
  func.func @transform_11(%arg0: i32) -> (i32, i32) {
    %c0_i32 = arith.constant 0 : i32
    %c0_i32_0 = arith.constant 0 : i32
    %c0_i32_1 = arith.constant 0 : i32
    return %c0_i32, %c0_i32_0 : i32, i32
  }
  func.func @transform_12(%arg0: i32) -> (i32, i32) {
    %c0_i32 = arith.constant 0 : i32
    %c0_i32_0 = arith.constant 0 : i32
    %c0_i32_1 = arith.constant 0 : i32
    return %c0_i32, %c0_i32_0 : i32, i32
  }
  func.func @transform_13(%arg0: i32) -> (i32, i32) {
    %c0_i32 = arith.constant 0 : i32
    %c0_i32_0 = arith.constant 0 : i32
    %c0_i32_1 = arith.constant 0 : i32
    return %c0_i32, %c0_i32_0 : i32, i32
  }
  func.func @transform_14(%arg0: i32) -> (i32, i32) {
    %c0_i32 = arith.constant 0 : i32
    %c0_i32_0 = arith.constant 0 : i32
    %c0_i32_1 = arith.constant 0 : i32
    return %c0_i32, %c0_i32_0 : i32, i32
  }
  func.func @transform_15(%arg0: i32) -> (i32, i32, i32, i32) {
    %c0_i32 = arith.constant 0 : i32
    %c0_i32_0 = arith.constant 0 : i32
    %c0_i32_1 = arith.constant 0 : i32
    %c0_i32_2 = arith.constant 0 : i32
    return %arg0, %c0_i32, %c0_i32_0, %c0_i32_1 : i32, i32, i32, i32
  }
}

</mosaic_0001>

<bundles_post_ra>
// kernel: tpu_custom_call.1
= control target key start
LH: loop header
LB: loop body
LE: loop exit
PB: predicated region body
PF: predicated region fallthrough
CT: control target
= control target key end

     0   :  { %s12544_s0 = inlined_call_operand.hbm [shape: bf16[2,16,16,64], index: 0, kind: input, shape index: {}]   ;;  %s12545_s1 = inlined_call_operand.hbm [shape: f32[1,64], index: 1, kind: input, shape index: {}]   ;;  %s12546_s2 = inlined_call_operand.hbm [shape: f32[1,64], index: 2, kind: input, shape index: {}]   ;;  %s12547_s3 = inlined_call_operand.hbm [shape: bf16[3,192,128], index: 3, kind: input, shape index: {}]   ;;  %s12548_s4 = inlined_call_operand.hbm [shape: f32[1,128], index: 4, kind: input, shape index: {}]   ;;  %s12549_s5 = inlined_call_operand.hbm [shape: f32[1,128], index: 5, kind: input, shape index: {}]   ;;  %s12550_s6 = inlined_call_operand.hbm [shape: f32[1,128], index: 6, kind: input, shape index: {}]   ;;  %s12551_s7 = inlined_call_operand.hbm [shape: bf16[3,384,128], index: 7, kind: input, shape index: {}]   ;;  %s12552_s8 = inlined_call_operand.hbm [shape: f32[1,128], index: 8, kind: input, shape index: {}]   ;;  %s12553_s9 = inlined_call_operand.hbm [shape: f32[64,32], index: 9, kind: input, shape index: {}]   ;;  %s12554_s10 = inlined_call_operand.hbm [shape: f32[32,64], index: 10, kind: input, shape index: {}]   ;;  %s12555_s11 = inlined_call_operand.hbm [shape: f32[128,32], index: 11, kind: input, shape index: {}]   ;;  %s12556_s12 = inlined_call_operand.hbm [shape: f32[32,128], index: 12, kind: input, shape index: {}]   ;;  %s12557_s13 = inlined_call_operand.hbm [shape: bf16[64,128], index: 13, kind: input, shape index: {}]   ;;  %s12558_s14 = inlined_call_operand.hbm [shape: f32[1,128], index: 14, kind: input, shape index: {}]   ;;  %s12559_s15 = inlined_call_operand.hbm [shape: bf16[2,16,16,128], index: 15, kind: output, shape index: {}]  }
   0x1   :  { %12626 = sst [smem:[#allocation116_spill]] %s12544_s0 }
   0x2   :  { %12627 = sst [smem:[#allocation117_spill]] %s12545_s1 }
   0x3   :  { %12628 = sst [smem:[#allocation118_spill]] %s12547_s3 }
   0x4   :  { %12629 = sst [smem:[#allocation119_spill]] %s12549_s5 }
   0x5   :  { %12630 = sst [smem:[#allocation120_spill]] %s12551_s7 }
   0x6   :  { %12631 = sst [smem:[#allocation121_spill]] %s12559_s15 }
   0x7   :  { %20 = vsyncpa [#allocation4], 0 }
   0x8   :  { %22 = vsyncpa [#allocation4 + $0x1], 0 }
   0x9   :  { %23 = vsyncpa [#allocation7], 0 }
   0xa   :  { %24 = vsyncpa [#allocation10], 0 }
   0xb   :  { %25 = vsyncpa [#allocation13], 0 }
   0xc   :  { %26 = vsyncpa [#allocation16], 0 }
   0xd   :  { %27 = vsyncpa [#allocation19], 0 }
   0xe   :  { %28 = vsyncpa [#allocation22], 0 }
   0xf   :  { %29 = vsyncpa [#allocation25], 0 }
  0x10   :  { %30 = vsyncpa [#allocation5], 0 }
  0x11   :  { %32 = vsyncpa [#allocation5 + $0x1], 0  ;;  %s9159_s18 = smov 0   ;;  %s9161_s19 = smov 0  }
  0x12   :  { %s9163_s20 = smov 0   ;;  %s9165_s21 = smov 0  }
  0x13 LB: > { %12632 = sst [smem:[#allocation37_spill]] %s9039_s18  ;;  %s9053_s22 = smov [#allocation6]   ;;  %s9051_s21 = sphi %s9165_s21, %s12922_s21   ;;  %s9047_s20 = sphi %s9163_s20, %s12921_s20   ;;  %s9043_s19 = sphi %s9161_s19, %s12920_s19   ;;  %s9039_s18 = sphi %s9159_s18, %s12919_s18  }
  0x14   : > { %12633 = sst [smem:[#allocation38_spill]] %s9043_s19  ;;  %s402_s23 = sshll.u32 %s9053_s22, 4  ;;  %s9185_s23 = int_to_ptr.vmem [resolvable:$true] %s402_s23 }
  0x15   : > { %12634 = sst [smem:[#allocation39_spill]] %s9047_s20  ;;  %s9180_s24 = sadd.s32 4294967295, %s9051_s21  }
  0x16   : > { %12635 = sst [smem:[#allocation40_spill]] %s9180_s24  ;;  %p6552_p0 = scmp.ge.s32.totalorder %s9051_s21, 1 }
  0x17   : > { %p12570_p1 = scmp.eq.s32.totalorder %s9180_s24, 0  ;;  %p389_p2 = scmp.lt.s32.totalorder %s9051_s21, 3 }
  0x18   : > { %s9054_s26 = smov [#allocation9]   ;;  %s9055_s29 = smov [#allocation12]  }
  0x19   : > { %p9187_p3 = pnand %p6552_p0, %p389_p2  ;;  %s423_s27 = sshll.u32 %s9054_s26, 4  ;;  %s9194_s27 = int_to_ptr.vmem [resolvable:$true] %s423_s27 }
  0x1a   : > { %s448_s30 = sshll.u32 %s9055_s29, 4  ;;  %s12639_s1 = sld [smem:[#allocation117_spill]]  ;;  %s9202_s30 = int_to_ptr.vmem [resolvable:$true] %s448_s30 }
  0x1b   : > { %s12636_s25 = scalar_select %p9187_p3, 1, 0 }
  0x1c   : > { %p7978_p5 = pneg %p9187_p3 }
  0x1d   : > { %12637 = sst [smem:[#allocation41_spill]] %s12636_s25 }
  0x1e   : > { %p9198_p6 = pnand %p7978_p5, %p12570_p1 }
  0x20   : > { %s8535_s22 = scalar_lea.hbm %s12639_s1, 16  ;;  %p9212_p8 = pneg %p9198_p6 }
  0x21   : > { %p8536_p7 = scmp.ne.s32.totalorder %s12639_s1, %s8535_s22  ;;  %p8542_p11 = scmp.lt.u32.totalorder %s8535_s22, %s12639_s1 }
  0x23   : > { %p8538_p9 = pnand %p9212_p8, %p8536_p7 }
  0x25   : > { %p8539_p10 = pneg %p8538_p9 }
  0x27   : > { %p8544_p12 = pnand %p8542_p11, %p8539_p10 }
  0x29   : > { %8547 = shalt.err (!%p8544_p12)
}
  0x2a   : > { %s8548_s15 = scalar_lea.vmem %s9185_s23, 16  ;;  %s8555_s25 = scalar_lea.vmem %s9185_s23, 32 }
  0x2b   : > { %p8549_p13 = scmp.ne.s32.totalorder %s9185_s23, %s8548_s15  ;;  %p8556_p5 = scmp.lt.s32.totalorder %s9185_s23, %s9185_s23 }
  0x2c   : > { %p8557_p7 = scmp.lt.s32.totalorder %s8555_s25, %s8548_s15 }
  0x2d   : > { %p8551_p0 = pnand %p8549_p13, %p9212_p8 }
  0x2e   : > { %p8558_p9 = por %p8557_p7, %p8556_p5 }
  0x2f   : > { %p8552_p2 = pneg %p8551_p0 }
  0x31   : > { %p8559_p4 = pnand %p8558_p9, %p8552_p2 }
  0x33   : > { %8562 = shalt.err (!%p8559_p4)
}
  0x34   : > { %7981 = dma.hbm_to_vmem [thread:$0]  (!%p9198_p6), %s12639_s1, 16, %s9185_s23, [#allocation7]  }
  0x35   : > { %s12641_s3 = sld [smem:[#allocation118_spill]] }
  0x3b   : > { %s8563_s29 = scalar_lea.hbm %s12641_s3, 4608 }
  0x3c   : > { %p8564_p10 = scmp.ne.s32.totalorder %s12641_s3, %s8563_s29  ;;  %p8570_p4 = scmp.lt.u32.totalorder %s8563_s29, %s12641_s3 }
  0x3e   : > { %p8566_p11 = pnand %p8564_p10, %p9212_p8 }
  0x40   : > { %p8567_p12 = pneg %p8566_p11 }
  0x42   : > { %p8572_p13 = pnand %p8570_p4, %p8567_p12 }
  0x44   : > { %8575 = shalt.err (!%p8572_p13)
}
  0x45   : > { %s8576_s23 = scalar_lea.vmem %s9194_s27, 4608  ;;  %p8584_p7 = scmp.lt.s32.totalorder %s9194_s27, %s9194_s27 }
  0x46   : > { %p8577_p0 = scmp.ne.s32.totalorder %s9194_s27, %s8576_s23  ;;  %p8585_p9 = scmp.lt.s32.totalorder %s8576_s23, %s8576_s23 }
  0x48   : > { %p8579_p2 = pnand %p8577_p0, %p9212_p8  ;;  %p8586_p10 = por %p8585_p9, %p8584_p7 }
  0x4a   : > { %p8580_p5 = pneg %p8579_p2 }
  0x4c   : > { %p8587_p11 = pnand %p8586_p10, %p8580_p5 }
  0x4e   : > { %8590 = shalt.err (!%p8587_p11)
}
  0x4f   : > { %s12566_s18 = smov 64   ;;  %s12568_s24 = smov 4  }
  0x50   : > { %7987 = dma.hbm_to_vmem [thread:$0]  (!%p9198_p6), %s12641_s3, 4608, %s9194_s27, [#allocation10], %s12566_s18, %s12566_s18, %s12568_s24  }
  0x51   : > { %s12642_s5 = sld [smem:[#allocation119_spill]] }
  0x57   : > { %s8591_s29 = scalar_lea.hbm %s12642_s5, 16 }
  0x58   : > { %p8592_p12 = scmp.ne.s32.totalorder %s12642_s5, %s8591_s29  ;;  %p8598_p0 = scmp.lt.u32.totalorder %s8591_s29, %s12642_s5 }
  0x5a   : > { %p8594_p4 = pnand %p8592_p12, %p9212_p8 }
  0x5c   : > { %p8595_p13 = pneg %p8594_p4 }
  0x5e   : > { %p8600_p2 = pnand %p8598_p0, %p8595_p13 }
  0x60   : > { %8603 = shalt.err (!%p8600_p2)
}
  0x61   : > { %s8604_s27 = scalar_lea.vmem %s9202_s30, 16  ;;  %s8611_s0 = scalar_lea.vmem %s9202_s30, 32 }
  0x62   : > { %p8605_p5 = scmp.ne.s32.totalorder %s9202_s30, %s8604_s27  ;;  %p8612_p10 = scmp.lt.s32.totalorder %s9202_s30, %s9202_s30 }
  0x63   : > { %p8613_p11 = scmp.lt.s32.totalorder %s8611_s0, %s8604_s27 }
  0x64   : > { %p8607_p7 = pnand %p8605_p5, %p9212_p8 }
  0x65   : > { %p8614_p12 = por %p8613_p11, %p8612_p10 }
  0x66   : > { %p8608_p9 = pneg %p8607_p7 }
  0x68   : > { %p8615_p4 = pnand %p8614_p12, %p8608_p9 }
  0x6a   : > { %8618 = shalt.err (!%p8615_p4)
}
  0x6b   : > { %7993 = dma.hbm_to_vmem [thread:$0]  (!%p9198_p6), %s12642_s5, 16, %s9202_s30, [#allocation13]  }
  0x6c   : > { %s9058_s17 = smov [#allocation15]   ;;  %s9059_s29 = smov [#allocation18]  }
  0x6d   : > { %s469_s22 = sshll.u32 %s9058_s17, 4  ;;  %s493_s15 = sshll.u32 %s9059_s29, 4  ;;  %s470_s22 = int_to_ptr.vmem [resolvable:$true] %s469_s22  ;;  %s494_s15 = int_to_ptr.vmem [resolvable:$true] %s493_s15 }
  0x6e   : > { %s12643_s7 = sld [smem:[#allocation120_spill]] }
  0x74   : > { %s8619_s27 = scalar_lea.hbm %s12643_s7, 9216 }
  0x75   : > { %p8620_p13 = scmp.ne.s32.totalorder %s12643_s7, %s8619_s27  ;;  %p8626_p5 = scmp.lt.u32.totalorder %s8619_s27, %s12643_s7 }
  0x77   : > { %p8622_p0 = pnand %p8620_p13, %p9212_p8 }
  0x79   : > { %p8623_p2 = pneg %p8622_p0 }
  0x7b   : > { %p8628_p7 = pnand %p8626_p5, %p8623_p2 }
  0x7d   : > { %8631 = shalt.err (!%p8628_p7)
}
  0x7e   : > { %s8632_s30 = scalar_lea.vmem %s470_s22, 9216  ;;  %p8640_p12 = scmp.lt.s32.totalorder %s470_s22, %s470_s22 }
  0x7f   : > { %p8633_p9 = scmp.ne.s32.totalorder %s470_s22, %s8632_s30  ;;  %p8641_p4 = scmp.lt.s32.totalorder %s8632_s30, %s8632_s30 }
  0x81   : > { %p8635_p10 = pnand %p8633_p9, %p9212_p8  ;;  %p8642_p1 = por %p8641_p4, %p8640_p12 }
  0x83   : > { %p8636_p11 = pneg %p8635_p10 }
  0x85   : > { %p8643_p3 = pnand %p8642_p1, %p8636_p11 }
  0x87   : > { %8646 = shalt.err (!%p8643_p3)
}
  0x88   : > { %s12644_s18 = smov 4   ;;  %s12645_s16 = smov 64  }
  0x89   : > { %7999 = dma.hbm_to_vmem [thread:$0]  (!%p9198_p6), %s12643_s7, 9216, %s470_s22, [#allocation16], %s12645_s16, %s12645_s16, %s12644_s18  }
  0x8a   : > { %s8647_s23 = scalar_lea.hbm %s12553_s9, 1024 }
  0x8b   : > { %p8648_p1 = scmp.ne.s32.totalorder %s12553_s9, %s8647_s23  ;;  %p8654_p0 = scmp.lt.u32.totalorder %s8647_s23, %s12553_s9 }
  0x8d   : > { %p8650_p3 = pnand %p8648_p1, %p9212_p8 }
  0x8f   : > { %p8651_p13 = pneg %p8650_p3 }
  0x91   : > { %p8656_p2 = pnand %p8654_p0, %p8651_p13 }
  0x93   : > { %8659 = shalt.err (!%p8656_p2)
}
  0x94   : > { %s8660_s24 = scalar_lea.vmem %s494_s15, 1024  ;;  %p8668_p10 = scmp.lt.s32.totalorder %s494_s15, %s494_s15 }
  0x95   : > { %p8661_p5 = scmp.ne.s32.totalorder %s494_s15, %s8660_s24  ;;  %p8669_p11 = scmp.lt.s32.totalorder %s8660_s24, %s8660_s24 }
  0x97   : > { %p8663_p7 = pnand %p8661_p5, %p9212_p8  ;;  %p8670_p12 = por %p8669_p11, %p8668_p10 }
  0x99   : > { %p8664_p9 = pneg %p8663_p7 }
  0x9b   : > { %p8671_p4 = pnand %p8670_p12, %p8664_p9 }
  0x9d   : > { %8674 = shalt.err (!%p8671_p4)
}
  0x9e   : > { %s9060_s22 = smov 128   ;;  %s9061_s17 = smov 8  }
  0x9f   : > { %8005 = dma.hbm_to_vmem [thread:$0]  (!%p9198_p6), %s12553_s9, 1024, %s494_s15, [#allocation19], %s9060_s22, %s9060_s22, %s9061_s17  }
  0xa0   : > { %s9062_s23 = smov [#allocation21]   ;;  %s9063_s0 = smov [#allocation24]  }
  0xa1   : > { %s519_s27 = sshll.u32 %s9062_s23, 4  ;;  %s545_s1 = sshll.u32 %s9063_s0, 4  ;;  %s520_s27 = int_to_ptr.vmem [resolvable:$true] %s519_s27  ;;  %s546_s1 = int_to_ptr.vmem [resolvable:$true] %s545_s1 }
  0xa2   : > { %s8675_s3 = scalar_lea.hbm %s12555_s11, 2048 }
  0xa3   : > { %p8676_p1 = scmp.ne.s32.totalorder %s12555_s11, %s8675_s3  ;;  %p8682_p0 = scmp.lt.u32.totalorder %s8675_s3, %s12555_s11 }
  0xa5   : > { %p8678_p3 = pnand %p8676_p1, %p9212_p8 }
  0xa7   : > { %p8679_p13 = pneg %p8678_p3 }
  0xa9   : > { %p8684_p2 = pnand %p8682_p0, %p8679_p13 }
  0xab   : > { %8687 = shalt.err (!%p8684_p2)
}
  0xac   : > { %s8688_s15 = scalar_lea.vmem %s520_s27, 2048  ;;  %p8696_p10 = scmp.lt.s32.totalorder %s520_s27, %s520_s27 }
  0xad   : > { %p8689_p5 = scmp.ne.s32.totalorder %s520_s27, %s8688_s15  ;;  %p8697_p11 = scmp.lt.s32.totalorder %s8688_s15, %s8688_s15 }
  0xaf   : > { %p8691_p7 = pnand %p8689_p5, %p9212_p8  ;;  %p8698_p12 = por %p8697_p11, %p8696_p10 }
  0xb1   : > { %p8692_p9 = pneg %p8691_p7 }
  0xb3   : > { %p8699_p4 = pnand %p8698_p12, %p8692_p9 }
  0xb5   : > { %8702 = shalt.err (!%p8699_p4)
}
  0xb6   : > { %8011 = dma.hbm_to_vmem [thread:$0]  (!%p9198_p6), %s12555_s11, 2048, %s520_s27, [#allocation22], %s9060_s22, %s9060_s22, %s9061_s17  }
  0xb7   : > { %s8703_s20 = scalar_lea.hbm %s12557_s13, 512 }
  0xb8   : > { %p8704_p1 = scmp.ne.s32.totalorder %s12557_s13, %s8703_s20  ;;  %p8710_p0 = scmp.lt.u32.totalorder %s8703_s20, %s12557_s13 }
  0xba   : > { %p8706_p3 = pnand %p8704_p1, %p9212_p8 }
  0xbc   : > { %p8707_p13 = pneg %p8706_p3 }
  0xbe   : > { %p8712_p2 = pnand %p8710_p0, %p8707_p13 }
  0xc0   : > { %8715 = shalt.err (!%p8712_p2)
}
  0xc1   : > { %s8716_s30 = scalar_lea.vmem %s546_s1, 512  ;;  %p8724_p10 = scmp.lt.s32.totalorder %s546_s1, %s546_s1 }
  0xc2   : > { %p8717_p5 = scmp.ne.s32.totalorder %s546_s1, %s8716_s30  ;;  %p8725_p11 = scmp.lt.s32.totalorder %s8716_s30, %s8716_s30 }
  0xc4   : > { %p8719_p7 = pnand %p8717_p5, %p9212_p8  ;;  %p8726_p12 = por %p8725_p11, %p8724_p10 }
  0xc6   : > { %p8720_p9 = pneg %p8719_p7 }
  0xc8   : > { %p8727_p4 = pnand %p8726_p12, %p8720_p9 }
  0xca   : > { %8730 = shalt.err (!%p8727_p4)
}
  0xcb   : > { %8017 = dma.hbm_to_vmem [thread:$0]  (!%p9198_p6), %s12557_s13, 512, %s546_s1, [#allocation25], %s12645_s16, %s12645_s16, %s12644_s18  }
  0xcc   : > { %s9064_s15 = smov [#allocation8]   ;;  %s9065_s3 = smov [#allocation11]  }
  0xcd   : > { %s413_s5 = sshll.u32 %s9064_s15, 4  ;;  %s437_s7 = sshll.u32 %s9065_s3, 4  ;;  %s414_s5 = int_to_ptr.vmem [resolvable:$true] %s413_s5  ;;  %s438_s7 = int_to_ptr.vmem [resolvable:$true] %s437_s7 }
  0xce   : > { %s8731_s29 = scalar_lea.hbm %s12546_s2, 16 }
  0xcf   : > { %p8732_p1 = scmp.ne.s32.totalorder %s12546_s2, %s8731_s29  ;;  %p8738_p0 = scmp.lt.u32.totalorder %s8731_s29, %s12546_s2 }
  0xd1   : > { %p8734_p3 = pnand %p8732_p1, %p9212_p8 }
  0xd3   : > { %p8735_p13 = pneg %p8734_p3 }
  0xd5   : > { %p8740_p2 = pnand %p8738_p0, %p8735_p13 }
  0xd7   : > { %8743 = shalt.err (!%p8740_p2)
}
  0xd8   : > { %s8744_s1 = scalar_lea.vmem %s414_s5, 16  ;;  %s8751_s27 = scalar_lea.vmem %s414_s5, 32 }
  0xd9   : > { %p8745_p5 = scmp.ne.s32.totalorder %s414_s5, %s8744_s1  ;;  %p8752_p10 = scmp.lt.s32.totalorder %s414_s5, %s414_s5 }
  0xda   : > { %p8753_p11 = scmp.lt.s32.totalorder %s8751_s27, %s8744_s1 }
  0xdb   : > { %p8747_p7 = pnand %p8745_p5, %p9212_p8 }
  0xdc   : > { %p8754_p12 = por %p8753_p11, %p8752_p10 }
  0xdd   : > { %p8748_p9 = pneg %p8747_p7 }
  0xdf   : > { %p8755_p4 = pnand %p8754_p12, %p8748_p9 }
  0xe1   : > { %8758 = shalt.err (!%p8755_p4)
}
  0xe2   : > { %7984 = dma.hbm_to_vmem [thread:$0]  (!%p9198_p6), %s12546_s2, 16, %s414_s5, [#allocation7]  }
  0xe3   : > { %s8759_s20 = scalar_lea.hbm %s12548_s4, 16 }
  0xe4   : > { %p8760_p1 = scmp.ne.s32.totalorder %s12548_s4, %s8759_s20  ;;  %p8766_p0 = scmp.lt.u32.totalorder %s8759_s20, %s12548_s4 }
  0xe6   : > { %p8762_p3 = pnand %p8760_p1, %p9212_p8 }
  0xe8   : > { %p8763_p13 = pneg %p8762_p3 }
  0xea   : > { %p8768_p2 = pnand %p8766_p0, %p8763_p13 }
  0xec   : > { %8771 = shalt.err (!%p8768_p2)
}
  0xed   : > { %s8772_s30 = scalar_lea.vmem %s438_s7, 16  ;;  %s8779_s5 = scalar_lea.vmem %s438_s7, 32 }
  0xee   : > { %p8773_p5 = scmp.ne.s32.totalorder %s438_s7, %s8772_s30  ;;  %p8780_p10 = scmp.lt.s32.totalorder %s438_s7, %s438_s7 }
  0xef   : > { %p8781_p11 = scmp.lt.s32.totalorder %s8779_s5, %s8772_s30 }
  0xf0   : > { %p8775_p7 = pnand %p8773_p5, %p9212_p8 }
  0xf1   : > { %p8782_p12 = por %p8781_p11, %p8780_p10 }
  0xf2   : > { %p8776_p9 = pneg %p8775_p7 }
  0xf4   : > { %p8783_p4 = pnand %p8782_p12, %p8776_p9 }
  0xf6   : > { %8786 = shalt.err (!%p8783_p4)
}
  0xf7   : > { %7990 = dma.hbm_to_vmem [thread:$0]  (!%p9198_p6), %s12548_s4, 16, %s438_s7, [#allocation10]  }
  0xf8   : > { %s9066_s24 = smov [#allocation14]   ;;  %s9067_s3 = smov [#allocation17]  }
  0xf9   : > { %s459_s15 = sshll.u32 %s9066_s24, 4  ;;  %s483_s19 = sshll.u32 %s9067_s3, 4  ;;  %s460_s15 = int_to_ptr.vmem [resolvable:$true] %s459_s15  ;;  %s484_s19 = int_to_ptr.vmem [resolvable:$true] %s483_s19 }
  0xfa   : > { %s8787_s25 = scalar_lea.hbm %s12550_s6, 16 }
  0xfb   : > { %p8788_p1 = scmp.ne.s32.totalorder %s12550_s6, %s8787_s25  ;;  %p8794_p0 = scmp.lt.u32.totalorder %s8787_s25, %s12550_s6 }
  0xfd   : > { %p8790_p3 = pnand %p8788_p1, %p9212_p8 }
  0xff   : > { %p8791_p13 = pneg %p8790_p3 }
 0x101   : > { %p8796_p2 = pnand %p8794_p0, %p8791_p13 }
 0x103   : > { %8799 = shalt.err (!%p8796_p2)
}
 0x104   : > { %s8800_s7 = scalar_lea.vmem %s460_s15, 16  ;;  %s8807_s1 = scalar_lea.vmem %s460_s15, 32 }
 0x105   : > { %p8801_p5 = scmp.ne.s32.totalorder %s460_s15, %s8800_s7  ;;  %p8808_p10 = scmp.lt.s32.totalorder %s460_s15, %s460_s15 }
 0x106   : > { %p8809_p11 = scmp.lt.s32.totalorder %s8807_s1, %s8800_s7 }
 0x107   : > { %p8803_p7 = pnand %p8801_p5, %p9212_p8 }
 0x108   : > { %p8810_p12 = por %p8809_p11, %p8808_p10 }
 0x109   : > { %p8804_p9 = pneg %p8803_p7 }
 0x10b   : > { %p8811_p4 = pnand %p8810_p12, %p8804_p9 }
 0x10d   : > { %8814 = shalt.err (!%p8811_p4)
}
 0x10e   : > { %7996 = dma.hbm_to_vmem [thread:$0]  (!%p9198_p6), %s12550_s6, 16, %s460_s15, [#allocation13]  }
 0x10f   : > { %s8815_s29 = scalar_lea.hbm %s12552_s8, 16 }
 0x110   : > { %p8816_p1 = scmp.ne.s32.totalorder %s12552_s8, %s8815_s29  ;;  %p8822_p0 = scmp.lt.u32.totalorder %s8815_s29, %s12552_s8 }
 0x112   : > { %p8818_p3 = pnand %p8816_p1, %p9212_p8 }
 0x114   : > { %p8819_p13 = pneg %p8818_p3 }
 0x116   : > { %p8824_p2 = pnand %p8822_p0, %p8819_p13 }
 0x118   : > { %8827 = shalt.err (!%p8824_p2)
}
 0x119   : > { %s8828_s5 = scalar_lea.vmem %s484_s19, 16  ;;  %s8835_s15 = scalar_lea.vmem %s484_s19, 32 }
 0x11a   : > { %p8829_p5 = scmp.ne.s32.totalorder %s484_s19, %s8828_s5  ;;  %p8836_p10 = scmp.lt.s32.totalorder %s484_s19, %s484_s19 }
 0x11b   : > { %p8837_p11 = scmp.lt.s32.totalorder %s8835_s15, %s8828_s5 }
 0x11c   : > { %p8831_p7 = pnand %p8829_p5, %p9212_p8 }
 0x11d   : > { %p8838_p12 = por %p8837_p11, %p8836_p10 }
 0x11e   : > { %p8832_p9 = pneg %p8831_p7 }
 0x120   : > { %p8839_p4 = pnand %p8838_p12, %p8832_p9 }
 0x122   : > { %8842 = shalt.err (!%p8839_p4)
}
 0x123   : > { %8002 = dma.hbm_to_vmem [thread:$0]  (!%p9198_p6), %s12552_s8, 16, %s484_s19, [#allocation16]  }
 0x124   : > { %s9068_s27 = smov [#allocation20]   ;;  %s9069_s3 = smov [#allocation23]  }
 0x125   : > { %s506_s24 = sshll.u32 %s9068_s27, 4  ;;  %s532_s20 = sshll.u32 %s9069_s3, 4  ;;  %s507_s24 = int_to_ptr.vmem [resolvable:$true] %s506_s24  ;;  %s533_s20 = int_to_ptr.vmem [resolvable:$true] %s532_s20 }
 0x126   : > { %s8843_s23 = scalar_lea.hbm %s12554_s10, 512 }
 0x127   : > { %p8844_p1 = scmp.ne.s32.totalorder %s12554_s10, %s8843_s23  ;;  %p8850_p0 = scmp.lt.u32.totalorder %s8843_s23, %s12554_s10 }
 0x129   : > { %p8846_p3 = pnand %p8844_p1, %p9212_p8 }
 0x12b   : > { %p8847_p13 = pneg %p8846_p3 }
 0x12d   : > { %p8852_p2 = pnand %p8850_p0, %p8847_p13 }
 0x12f   : > { %8855 = shalt.err (!%p8852_p2)
}
 0x130   : > { %s8856_s19 = scalar_lea.vmem %s507_s24, 512  ;;  %p8864_p10 = scmp.lt.s32.totalorder %s507_s24, %s507_s24 }
 0x131   : > { %p8857_p5 = scmp.ne.s32.totalorder %s507_s24, %s8856_s19  ;;  %p8865_p11 = scmp.lt.s32.totalorder %s8856_s19, %s8856_s19 }
 0x133   : > { %p8859_p7 = pnand %p8857_p5, %p9212_p8  ;;  %p8866_p12 = por %p8865_p11, %p8864_p10 }
 0x135   : > { %p8860_p9 = pneg %p8859_p7 }
 0x137   : > { %p8867_p4 = pnand %p8866_p12, %p8860_p9 }
 0x139   : > { %8870 = shalt.err (!%p8867_p4)
}
 0x13a   : > { %8008 = dma.hbm_to_vmem [thread:$0]  (!%p9198_p6), %s12554_s10, 512, %s507_s24, [#allocation19], %s9060_s22, %s9060_s22, %s9061_s17  }
 0x13b   : > { %s8871_s29 = scalar_lea.hbm %s12556_s12, 512 }
 0x13c   : > { %p8872_p1 = scmp.ne.s32.totalorder %s12556_s12, %s8871_s29  ;;  %p8878_p0 = scmp.lt.u32.totalorder %s8871_s29, %s12556_s12 }
 0x13e   : > { %p8874_p3 = pnand %p8872_p1, %p9212_p8 }
 0x140   : > { %p8875_p13 = pneg %p8874_p3 }
 0x142   : > { %p8880_p2 = pnand %p8878_p0, %p8875_p13 }
 0x144   : > { %8883 = shalt.err (!%p8880_p2)
}
 0x145   : > { %s8884_s5 = scalar_lea.vmem %s533_s20, 512  ;;  %p8892_p10 = scmp.lt.s32.totalorder %s533_s20, %s533_s20 }
 0x146   : > { %p8885_p5 = scmp.ne.s32.totalorder %s533_s20, %s8884_s5  ;;  %p8893_p11 = scmp.lt.s32.totalorder %s8884_s5, %s8884_s5 }
 0x148   : > { %p8887_p7 = pnand %p8885_p5, %p9212_p8  ;;  %p8894_p12 = por %p8893_p11, %p8892_p10 }
 0x14a   : > { %p8888_p9 = pneg %p8887_p7 }
 0x14c   : > { %p8895_p4 = pnand %p8894_p12, %p8888_p9 }
 0x14e   : > { %8898 = shalt.err (!%p8895_p4)
}
 0x14f   : > { %8014 = dma.hbm_to_vmem [thread:$0]  (!%p9198_p6), %s12556_s12, 512, %s533_s20, [#allocation22], %s9060_s22, %s9060_s22, %s9061_s17  }
 0x150   : > { %s9070_s19 = smov [#allocation26]   ;;  %s8899_s3 = scalar_lea.hbm %s12558_s14, 16 }
 0x151   : > { %s559_s7 = sshll.u32 %s9070_s19, 4  ;;  %p8900_p1 = scmp.ne.s32.totalorder %s12558_s14, %s8899_s3  ;;  %s560_s7 = int_to_ptr.vmem [resolvable:$true] %s559_s7 }
 0x152   : > { %p8906_p0 = scmp.lt.u32.totalorder %s8899_s3, %s12558_s14 }
 0x153   : > { %p8902_p3 = pnand %p8900_p1, %p9212_p8 }
 0x155   : > { %p8903_p13 = pneg %p8902_p3 }
 0x157   : > { %p8908_p2 = pnand %p8906_p0, %p8903_p13 }
 0x159   : > { %8911 = shalt.err (!%p8908_p2)
}
 0x15a   : > { %s8912_s22 = scalar_lea.vmem %s560_s7, 16  ;;  %s8919_s17 = scalar_lea.vmem %s560_s7, 32 }
 0x15b   : > { %p8913_p5 = scmp.ne.s32.totalorder %s560_s7, %s8912_s22  ;;  %p8920_p10 = scmp.lt.s32.totalorder %s560_s7, %s560_s7 }
 0x15c   : > { %p8921_p11 = scmp.lt.s32.totalorder %s8919_s17, %s8912_s22 }
 0x15d   : > { %p8915_p7 = pnand %p8913_p5, %p9212_p8 }
 0x15e   : > { %p8922_p12 = por %p8921_p11, %p8920_p10 }
 0x15f   : > { %p8916_p9 = pneg %p8915_p7 }
 0x161   : > { %p8923_p4 = pnand %p8922_p12, %p8916_p9 }
 0x163   : > { %8926 = shalt.err (!%p8923_p4)
}
 0x164   : > { %s12646_s5 = sld [smem:[#allocation39_spill]]  ;;  %s12647_s24 = sld [smem:[#allocation38_spill]] }
 0x165   : > { %s12648_s26 = sld [smem:[#allocation37_spill]]  ;;  %s12649_s15 = sld [smem:[#allocation40_spill]] }
 0x166   : > { %8020 = dma.hbm_to_vmem [thread:$0]  (!%p9198_p6), %s12558_s14, 16, %s560_s7, [#allocation25]  }
 0x167   : > { %s6551_s19 = sadd.s32 4294967294, %s9051_s21   ;;  %s9502_s28 = sadd.s32 1, %s9051_s21  }
 0x168   : > { %s42_s1 = ssub.s32 %s9051_s21, %s9502_s28  ;;  %p53_p3 = scmp.eq.s32.totalorder %s9051_s21, 0 }
 0x169   : > { %p43_p8 = scmp.eq.s32.totalorder %s42_s1, 0  ;;  %p382_p7 = scmp.eq.s32.totalorder %s6551_s19, 1 }
 0x16a   : > { %s45_s27 = sadd.s32 1, %s12646_s5  ;;  %p52_p1 = scmp.ne.s32.totalorder %s12646_s5, %s12647_s24 }
 0x16b   : > { %p58_p13 = scmp.ne.s32.totalorder %s12647_s24, %s12648_s26  ;;  %p12651_p2 = scmp.eq.s32.totalorder %s12649_s15, 0 }
 0x16c   : > { %s9513_s3 = scalar_select %p43_p8, %s12646_s5, %s45_s27  }
 0x16d   : > { %p9515_p0 = por %p53_p3, %p52_p1  ;;  %p9521_p6 = por %p12651_p2, %p58_p13 }
 0x16e   : > { %p376_p5 = scmp.eq.s32.totalorder %s12649_s15, 1  ;;  %p8043_p9 = scmp.lt.s32.totalorder %s9051_s21, 2 }
 0x16f   : > { %s570_s25 = sand.u32 1, %s12646_s5   ;;  %p9532_p11 = por %p382_p7, %p58_p13 }
 0x170   : > { %p9528_p10 = por %p376_p5, %p52_p1  ;;  %s6568_s22 = sshll.u32 %s570_s25, 7 }
 0x171   : > { %s12654_s0 = scalar_select %p9532_p11, 1, 0 }
 0x172   : > { %s12653_s23 = scalar_select %p9528_p10, 1, 0 }
 0x173   : > { %s6823_s17 = sshll.u32 %s9051_s21, 11  ;;  %s12655_s24 = sld [smem:[#allocation116_spill]] }
 0x174   : > { %s574_s5 = scalar_lea.vmem [#allocation3], %s6568_s22  ;;  %p9546_p12 = pnand %p8043_p9, %p9515_p0 }
 0x175   : > { %s581_s15 = sshll.u32 %s574_s5, 4  ;;  %s9550_s1 = scalar_lea.sflag [#allocation4], %s570_s25  ;;  %s9542_s15 = int_to_ptr.vmem [resolvable:$true] %s581_s15 }
 0x176   : > { %p8929_p8 = pneg %p9546_p12 }
 0x179   : > { %s9540_s26 = scalar_lea.hbm %s12655_s24, %s6823_s17  ;;  %s8932_s29 = scalar_lea.hbm %s12655_s24, 4096 }
 0x17a   : > { %s8927_s27 = scalar_lea.hbm %s9540_s26, 2048  ;;  %p8933_p13 = scmp.lt.u32.totalorder %s9540_s26, %s12655_s24 }
 0x17b   : > { %p8928_p4 = scmp.ne.s32.totalorder %s9540_s26, %s8927_s27  ;;  %p8934_p0 = scmp.lt.u32.totalorder %s8932_s29, %s8927_s27 }
 0x17c   : > { %p8936_p5 = scmp.lt.u32.totalorder %s8927_s27, %s9540_s26 }
 0x17d   : > { %p8930_p1 = pnand %p8929_p8, %p8928_p4  ;;  %p8935_p2 = por %p8934_p0, %p8933_p13 }
 0x17f   : > { %p8931_p3 = pneg %p8930_p1  ;;  %p8937_p7 = por %p8936_p5, %p8935_p2 }
 0x181   : > { %p8938_p9 = pnand %p8937_p7, %p8931_p3 }
 0x183   : > { %8941 = shalt.err (!%p8938_p9)
}
 0x184   : > { %s8942_s25 = scalar_lea.vmem %s9542_s15, 2048  ;;  %s9071_s5 = smov [#allocation3]  }
 0x185   : > { %p8943_p4 = scmp.ne.s32.totalorder %s9542_s15, %s8942_s25  ;;  %s8947_s22 = sshll.u32 %s9071_s5, 4  ;;  %s8948_s22 = int_to_ptr.vmem [resolvable:$false] %s8947_s22 }
 0x186   : > { %s8949_s17 = scalar_lea.vmem %s8948_s22, 4096  ;;  %p8950_p10 = scmp.lt.s32.totalorder %s9542_s15, %s8948_s22 }
 0x187   : > { %p8945_p1 = pnand %p8943_p4, %p8929_p8  ;;  %p8951_p13 = scmp.lt.s32.totalorder %s8949_s17, %s8942_s25 }
 0x189   : > { %p8946_p11 = pneg %p8945_p1  ;;  %p8952_p0 = por %p8951_p13, %p8950_p10 }
 0x18b   : > { %p8953_p2 = pnand %p8952_p0, %p8946_p11 }
 0x18d   : > { %8956 = shalt.err (!%p8953_p2)
}
 0x18e   : > { %8024 = dma.hbm_to_vmem [thread:$0]  (!%p9546_p12), %s9540_s26, 2048, %s9542_s15, %s9550_s1, %s12645_s16, %s12645_s16, %s12644_s18  }
 0x18f   : > { %s12657_s27 = sld [smem:[#allocation41_spill]] }
 0x195   : > { %p12658_p8 = scmp.ne.s32.totalorder %s12657_s27, 0 }
 0x197   : > { %593 = sbr.rel (%p12658_p8) target bundleno = 3090 (0xc12), region = 80 }
 0x19e   : > { %s12659_s29 = sld [smem:[#allocation38_spill]] }
 0x1a4   : > { %s9584_s20 = sand.u32 1, %s12659_s29  }
 0x1a5   : > { %s6572_s30 = sshll.u32 %s9584_s20, 7  ;;  %s596_s25 = scalar_lea.sflag [#allocation4], %s9584_s20 }
 0x1a6   : > { %s9590_s19 = scalar_lea.vmem [#allocation3], %s6572_s30 }
 0x1a7   : > { %9002 = dma.done.wait (%p9521_p6), %s596_s25, 2048  }
 0x1a8   : > { %9004 = vsyncadd (%p9521_p6), %s596_s25, 4294965248  ;;  %s12660_s18 = sld [smem:[#allocation40_spill]] }
 0x1ae   : > { %p12661_p10 = scmp.eq.s32.totalorder %s12660_s18, 0 }
 0x1b0   : > { %9006 = dma.done.wait (%p12661_p10), [#allocation7], 32   ;;  %p12662_p11 = pmov %p12661_p10 }
 0x1b1   : > { %p12663_p12 = pmov %p12661_p10 }
 0x1b2   : > { %9008 = vsyncadd (%p12662_p11), [#allocation7], 4294967264 }
 0x1b3   : > { %9010 = dma.done.wait (%p12663_p12), [#allocation10], 4624   ;;  %p12664_p3 = pmov %p12661_p10 }
 0x1b5   : > { %9012 = vsyncadd (%p12664_p3), [#allocation10], 4294962672  ;;  %p12665_p5 = pmov %p12664_p3 }
 0x1b6   : > { %p12666_p7 = pmov %p12664_p3 }
 0x1b7   : > { %9014 = dma.done.wait (%p12665_p5), [#allocation13], 32  }
 0x1b8   : > { %9016 = vsyncadd (%p12666_p7), [#allocation13], 4294967264  ;;  %p12667_p6 = pmov %p12664_p3 }
 0x1b9   : > { %p12668_p9 = pmov %p12664_p3 }
 0x1ba   : > { %9018 = dma.done.wait (%p12667_p6), [#allocation16], 9232  }
 0x1bb   : > { %9020 = vsyncadd (%p12668_p9), [#allocation16], 4294958064  ;;  %p12669_p4 = pmov %p12664_p3 }
 0x1bc   : > { %p12670_p1 = pmov %p12664_p3 }
 0x1bd   : > { %9022 = dma.done.wait (%p12669_p4), [#allocation19], 1536  }
 0x1be   : > { %9024 = vsyncadd (%p12670_p1), [#allocation19], 4294965760  ;;  %p12671_p13 = pmov %p12670_p1 }
 0x1bf   : > { %p12672_p0 = pmov %p12670_p1 }
 0x1c0   : > { %9026 = dma.done.wait (%p12671_p13), [#allocation22], 2560  }
 0x1c1   : > { %9028 = vsyncadd (%p12672_p0), [#allocation22], 4294964736  ;;  %p12673_p2 = pmov %p12672_p0 }
 0x1c2   : > { %p12674_p8 = pmov %p12672_p0 }
 0x1c3   : > { %9030 = dma.done.wait (%p12673_p2), [#allocation25], 528  }
 0x1c4   : > { %9032 = vsyncadd (%p12674_p8), [#allocation25], 4294966768  ;;  %v12575_v0 = vmov 0.0|0.0   ;;  %vm9073_vm0 = vmmov 0   ;;  %v12577_v1 = vmov 0.0   ;;  %v769_v2 = vld [vmem:[#allocation18] sm:$0xff] }
 0x1c5   : > { %7718 = vmatprep.subr.bf16.mxu1 %v12575_v0  ;;  %7418 = vmatprep.mubr.msk.f32.mxu1 %vm9073_vm0, %v12577_v1  ;;  %v770_v3 = vld [vmem:[#allocation18 + $0x8] sm:$0xff]  ;;  %v771_v4 = vld [vmem:[#allocation18 + $0x10] sm:$0xff]  ;;  %v772_v6 = vld [vmem:[#allocation18 + $0x18] sm:$0xff]  ;;  %vm781_vm1 = vcmask 523264   ;;  %vm952_vm2 = vcmask 1040384   ;;  %vm1036_vm3 = vcmask 261120  }
 0x1c6   : > { %7736 = vmatprep.subr.bf16.mxu0 %v12575_v0  ;;  %7464 = vmatprep.mubr.msk.f32.mxu0 %vm9073_vm0, %v12577_v1  ;;  %v7719_v5 = vpack.c.bf16 %v770_v3, %v769_v2  ;;  %v773_v7 = vld [vmem:[#allocation18 + $0x20] sm:$0xff]  ;;  %v774_v8 = vld [vmem:[#allocation18 + $0x28] sm:$0xff]  ;;  %v7722_v9 = vpack.c.bf16 %v772_v6, %v771_v4  ;;  %v9630_v10 = vld [vmem:[#allocation18 + $0x30] sm:$0xff]  ;;  %vm1550_vm4 = vsmask.f32 256  ;;  %vm1841_vm5 = vcmask 1046528  }
 0x1c7   : > { %v9632_v11 = vld [vmem:[#allocation18 + $0x38] sm:$0xff]  ;;  %v7725_v13 = vpack.c.bf16 %v774_v8, %v773_v7  ;;  %v707_v16 = vld [vmem:[%s9590_s19 + $0x10] sm:$0xff]   ;;  %v709_v17 = vld [vmem:[%s9590_s19 + $0x18] sm:$0xff]   ;;  %vm1584_vm7 = vsmask.f32 7424  ;;  %s9075_s16 = smov 64  }
 0x1c8   : > { %v703_v12 = vld [vmem:[%s9590_s19] sm:$0xff]   ;;  %7720 = vmatpush3.bf16.msra.mxu1 %v7719_v5  ;;  %v7728_v14 = vpack.c.bf16 %v9632_v11, %v9630_v10  ;;  %v705_v15 = vld [vmem:[%s9590_s19 + $0x8] sm:$0xff]   ;;  %v715_v22 = vld [vmem:[%s9590_s19 + $0x30] sm:$0xff]   ;;  %v9652_v25 = vunpack.c.l.bf16 %v707_v16  ;;  %v9654_v26 = vunpack.c.h.bf16 %v707_v16  ;;  %v9659_v30 = vunpack.c.l.bf16 %v709_v17  ;;  %s12358_s7 = scalar_lea.vmem [#allocation27], %s6572_s30  ;;  %s6856_s26 = sshll.u32 %s12660_s18, 11 }
 0x1c9   : > { %v9640_v18 = vunpack.c.l.bf16 %v703_v12  ;;  %v9642_v19 = vunpack.c.h.bf16 %v703_v12  ;;  %7721 = vmatprep.subr.bf16.mxu1 %v12575_v0  ;;  %v711_v20 = vld [vmem:[%s9590_s19 + $0x20] sm:$0xff]   ;;  %v713_v21 = vld [vmem:[%s9590_s19 + $0x28] sm:$0xff]   ;;  %v9648_v23 = vunpack.c.l.bf16 %v705_v15  ;;  %v9650_v24 = vunpack.c.h.bf16 %v705_v15  ;;  %v717_v27 = vld [vmem:[%s9590_s19 + $0x38] sm:$0xff]   ;;  %s6345_s15 = sshll.u32 %s12358_s7, 4  ;;  %s12914_s22 = sld [smem:[#allocation121_spill]]  ;;  %s12497_s15 = int_to_ptr.vmem [resolvable:$true] %s6345_s15 }
 0x1ca   : > { %12678 = vst [vmem:[#allocation45_spill] sm:$0xff] %v9654_v26  ;;  %v719_v28 = vld [vmem:[%s9590_s19 + $0x40] sm:$0xff]   ;;  %v721_v29 = vld [vmem:[%s9590_s19 + $0x48] sm:$0xff]   ;;  %12679 = vst [vmem:[#allocation46_spill] sm:$0xff] %v9659_v30  ;;  %v9661_v31 = vunpack.c.h.bf16 %v709_v17  ;;  %v9663_v32 = vunpack.c.l.bf16 %v711_v20  ;;  %v9665_v33 = vunpack.c.h.bf16 %v711_v20  ;;  %v9670_v37 = vunpack.c.l.bf16 %v713_v21  ;;  %s6332_s27 = scalar_lea.sflag [#allocation5], %s9584_s20  ;;  %s8957_s29 = scalar_lea.vmem %s12497_s15, 2048 }
 0x1cb   : > { %12675 = vst [vmem:[#allocation42_spill] sm:$0xff] %v9642_v19  ;;  %12676 = vst [vmem:[#allocation43_spill] sm:$0xff] %v9648_v23  ;;  %v723_v34 = vld [vmem:[%s9590_s19 + $0x50] sm:$0xff]   ;;  %v725_v35 = vld [vmem:[%s9590_s19 + $0x58] sm:$0xff]   ;;  %v9672_v38 = vunpack.c.h.bf16 %v713_v21  ;;  %v9674_v39 = vunpack.c.l.bf16 %v715_v22  ;;  %v9676_v40 = vunpack.c.h.bf16 %v715_v22  ;;  %v9681_v44 = vunpack.c.l.bf16 %v717_v27  ;;  %p8958_p10 = scmp.ne.s32.totalorder %s12497_s15, %s8957_s29  ;;  %p12915_p11 = scmp.ne.s32.totalorder %s12653_s23, 0 }
 0x1cc   : > { %12677 = vst [vmem:[#allocation44_spill] sm:$0xff] %v9650_v24  ;;  %12680 = vst [vmem:[#allocation47_spill] sm:$0xff] %v9661_v31  ;;  %v727_v36 = vld [vmem:[%s9590_s19 + $0x60] sm:$0xff]   ;;  %7723 = vmatpush3.bf16.msra.mxu1 %v7722_v9  ;;  %v729_v41 = vld [vmem:[%s9590_s19 + $0x68] sm:$0xff]   ;;  %v9683_v45 = vunpack.c.h.bf16 %v717_v27  ;;  %v9685_v46 = vunpack.c.l.bf16 %v719_v28  ;;  %v9687_v47 = vunpack.c.h.bf16 %v719_v28  ;;  %v9690_v48 = vunpack.c.l.bf16 %v721_v29  ;;  %s9077_s30 = smov [#allocation27]  }
 0x1cd   : > { %12681 = vst [vmem:[#allocation48_spill] sm:$0xff] %v9663_v32  ;;  %12682 = vst [vmem:[#allocation49_spill] sm:$0xff] %v9665_v33  ;;  %v731_v42 = vld [vmem:[%s9590_s19 + $0x70] sm:$0xff]   ;;  %v733_v43 = vld [vmem:[%s9590_s19 + $0x78] sm:$0xff]   ;;  %7724 = vmatprep.subr.bf16.mxu1 %v12575_v0  ;;  %v9692_v49 = vunpack.c.h.bf16 %v721_v29  ;;  %v9694_v50 = vunpack.c.l.bf16 %v723_v34  ;;  %v9696_v51 = vunpack.c.h.bf16 %v723_v34  ;;  %v9698_v52 = vunpack.c.l.bf16 %v725_v35  ;;  %p8959_p12 = pnand %p8958_p10, %p12915_p11  ;;  %s8961_s25 = sshll.u32 %s9077_s30, 4  ;;  %s8962_s25 = int_to_ptr.vmem [resolvable:$false] %s8961_s25 }
 0x1ce   : > { %12683 = vst [vmem:[#allocation50_spill] sm:$0xff] %v9670_v37  ;;  %12684 = vst [vmem:[#allocation51_spill] sm:$0xff] %v9672_v38  ;;  %v9700_v53 = vunpack.c.h.bf16 %v725_v35  ;;  %v9702_v54 = vunpack.c.l.bf16 %v727_v36  ;;  %v9704_v55 = vunpack.c.h.bf16 %v727_v36  ;;  %v9706_v56 = vunpack.c.l.bf16 %v729_v41  ;;  %p8964_p5 = scmp.lt.s32.totalorder %s12497_s15, %s8962_s25 }
 0x1cf   : > { %12685 = vst [vmem:[#allocation52_spill] sm:$0xff] %v9674_v39  ;;  %12686 = vst [vmem:[#allocation53_spill] sm:$0xff] %v9676_v40  ;;  %v9708_v57 = vunpack.c.h.bf16 %v729_v41  ;;  %v9710_v58 = vunpack.c.l.bf16 %v731_v42  ;;  %v9712_v59 = vunpack.c.h.bf16 %v731_v42  ;;  %v9714_v60 = vunpack.c.l.bf16 %v733_v43  ;;  %s12495_s17 = scalar_lea.hbm %s12914_s22, %s6856_s26  ;;  %p8960_p3 = pneg %p8959_p12 }
 0x1d0   : > { %12687 = vst [vmem:[#allocation54_spill] sm:$0xff] %v9681_v44  ;;  %12688 = vst [vmem:[#allocation55_spill] sm:$0xff] %v9683_v45  ;;  %7726 = vmatpush3.bf16.msra.mxu1 %v7725_v13  ;;  %v9716_v61 = vunpack.c.h.bf16 %v733_v43  ;;  %v782_v62 = vsel %vm781_vm1, %v9640_v18, 0.0  ;;  %v783_v63 = vsel %vm781_vm1, %v9642_v19, 0.0  ;;  %v785_v3 = vsel %vm781_vm1, %v9648_v23, 0.0 }
 0x1d1   : > { %12689 = vst [vmem:[#allocation56_spill] sm:$0xff] %v9685_v46  ;;  %12690 = vst [vmem:[#allocation57_spill] sm:$0xff] %v9687_v47  ;;  %7727 = vmatprep.subr.bf16.mxu1 %v12575_v0  ;;  %v784_v2 = vadd.f32 %v783_v63, %v782_v62  ;;  %v787_v4 = vsel %vm781_vm1, %v9650_v24, 0.0  ;;  %v789_v5 = vsel %vm781_vm1, %v9652_v25, 0.0  ;;  %v791_v6 = vsel %vm781_vm1, %v9654_v26, 0.0 }
 0x1d2   : > { %12691 = vst [vmem:[#allocation58_spill] sm:$0xff] %v9690_v48  ;;  %12692 = vst [vmem:[#allocation59_spill] sm:$0xff] %v9692_v49  ;;  %v793_v7 = vsel %vm781_vm1, %v9659_v30, 0.0  ;;  %v795_v8 = vsel %vm781_vm1, %v9661_v31, 0.0  ;;  %v797_v9 = vsel %vm781_vm1, %v9663_v32, 0.0  ;;  %v799_v13 = vsel %vm781_vm1, %v9665_v33, 0.0 }
 0x1d3   : > { %12693 = vst [vmem:[#allocation60_spill] sm:$0xff] %v9694_v50  ;;  %12694 = vst [vmem:[#allocation61_spill] sm:$0xff] %v9696_v51  ;;  %v786_v12 = vadd.f32 %v785_v3, %v784_v2  ;;  %v801_v15 = vsel %vm781_vm1, %v9670_v37, 0.0  ;;  %v803_v16 = vsel %vm781_vm1, %v9672_v38, 0.0  ;;  %v9748_v17 = vsel %vm781_vm1, %v9674_v39, 0.0 }
 0x1d4   : > { %12695 = vst [vmem:[#allocation62_spill] sm:$0xff] %v9698_v52  ;;  %12696 = vst [vmem:[#allocation63_spill] sm:$0xff] %v9700_v53  ;;  %7729 = vmatpush3.bf16.msra.mxu1 %v7728_v14  ;;  %v9752_v20 = vsel %vm781_vm1, %v9676_v40, 0.0  ;;  %v9756_v21 = vsel %vm781_vm1, %v9681_v44, 0.0  ;;  %v9760_v22 = vsel %vm781_vm1, %v9683_v45, 0.0  ;;  %v9764_v10 = vsel %vm781_vm1, %v9685_v46, 0.0 }
 0x1d5   : > { %12697 = vst [vmem:[#allocation64_spill] sm:$0xff] %v9702_v54  ;;  %12698 = vst [vmem:[#allocation65_spill] sm:$0xff] %v9704_v55  ;;  %v788_v27 = vadd.f32 %v787_v4, %v786_v12  ;;  %v9768_v11 = vsel %vm781_vm1, %v9687_v47, 0.0  ;;  %v9772_v14 = vsel %vm781_vm1, %v9690_v48, 0.0  ;;  %7730 = vmatprep.subr.bf16.mxu1 %v12575_v0  ;;  %v9777_v28 = vsel %vm781_vm1, %v9692_v49, 0.0 }
 0x1d6   : > { %12699 = vst [vmem:[#allocation66_spill] sm:$0xff] %v9706_v56  ;;  %12700 = vst [vmem:[#allocation67_spill] sm:$0xff] %v9710_v58  ;;  %v9781_v29 = vsel %vm781_vm1, %v9694_v50, 0.0  ;;  %v9785_v34 = vsel %vm781_vm1, %v9696_v51, 0.0  ;;  %v9789_v35 = vsel %vm781_vm1, %v9698_v52, 0.0  ;;  %v9793_v41 = vsel %vm781_vm1, %v9700_v53, 0.0 }
 0x1d7   : > { %12701 = vst [vmem:[#allocation68_spill] sm:$0xff] %v9712_v59  ;;  %12702 = vst [vmem:[#allocation69_spill] sm:$0xff] %v9716_v61  ;;  %v790_v36 = vadd.f32 %v789_v5, %v788_v27  ;;  %v9797_v42 = vsel %vm781_vm1, %v9702_v54, 0.0  ;;  %v9801_v43 = vsel %vm781_vm1, %v9704_v55, 0.0  ;;  %v9805_v62 = vsel %vm781_vm1, %v9706_v56, 0.0 }
 0x1d8   : > { %v9809_v63 = vsel %vm781_vm1, %v9708_v57, 0.0  ;;  %v9813_v2 = vsel %vm781_vm1, %v9710_v58, 0.0  ;;  %v9817_v3 = vsel %vm781_vm1, %v9712_v59, 0.0  ;;  %v9821_v5 = vsel %vm781_vm1, %v9714_v60, 0.0  ;;  %vm10150_vm6 = vmand %vm952_vm2, %vm1550_vm4 }
 0x1d9   : > { %v792_v4 = vadd.f32 %v791_v6, %v790_v36  ;;  %v9825_v12 = vsel %vm781_vm1, %v9716_v61, 0.0  ;;  %v851_v0 = vmul.f32 %v9640_v18, %v9640_v18  ;;  %v852_v1 = vmul.f32 %v9642_v19, %v9642_v19 }
 0x1da   : > { %v853_v59 = vmul.f32 %v9648_v23, %v9648_v23  ;;  %v854_v6 = vmul.f32 %v9650_v24, %v9650_v24  ;;  %v855_v36 = vmul.f32 %v9652_v25, %v9652_v25  ;;  %v856_v61 = vmul.f32 %v9654_v26, %v9654_v26 }
 0x1db   : > { %v794_v27 = vadd.f32 %v793_v7, %v792_v4  ;;  %v857_v7 = vmul.f32 %v9659_v30, %v9659_v30  ;;  %v858_v4 = vmul.f32 %v9661_v31, %v9661_v31  ;;  %v859_v19 = vmul.f32 %v9663_v32, %v9663_v32 }
 0x1dc   : > { %v861_v24 = vmul.f32 %v9670_v37, %v9670_v37  ;;  %v862_v23 = vmul.f32 %v9672_v38, %v9672_v38  ;;  %v863_v26 = vmul.f32 %v9674_v39, %v9674_v39  ;;  %v864_v30 = vmul.f32 %v9676_v40, %v9676_v40 }
 0x1dd   : > { %v796_v58 = vadd.f32 %v795_v8, %v794_v27  ;;  %v860_v8 = vmul.f32 %v9665_v33, %v9665_v33  ;;  %v865_v31 = vmul.f32 %v9681_v44, %v9681_v44  ;;  %v866_v32 = vmul.f32 %v9683_v45, %v9683_v45 }
 0x1de   : > { %v868_v33 = vmul.f32 %v9687_v47, %v9687_v47  ;;  %v869_v38 = vmul.f32 %v9690_v48, %v9690_v48  ;;  %v870_v39 = vmul.f32 %v9692_v49, %v9692_v49  ;;  %v871_v40 = vmul.f32 %v9694_v50, %v9694_v50 }
 0x1df   : > { %v798_v27 = vadd.f32 %v797_v9, %v796_v58  ;;  %v867_v58 = vmul.f32 %v9685_v46, %v9685_v46  ;;  %v872_v44 = vmul.f32 %v9696_v51, %v9696_v51  ;;  %v873_v45 = vmul.f32 %v9698_v52, %v9698_v52 }
 0x1e0   : > { %v874_v47 = vmul.f32 %v9700_v53, %v9700_v53  ;;  %v884_v46 = vsel %vm781_vm1, %v852_v1, 0.0  ;;  %v886_v48 = vsel %vm781_vm1, %v853_v59, 0.0  ;;  %v875_v49 = vmul.f32 %v9702_v54, %v9702_v54 }
 0x1e1   : > { %v800_v9 = vadd.f32 %v799_v13, %v798_v27  ;;  %v883_v13 = vsel %vm781_vm1, %v851_v0, 0.0  ;;  %v876_v50 = vmul.f32 %v9704_v55, %v9704_v55  ;;  %v877_v51 = vmul.f32 %v9706_v56, %v9706_v56 }
 0x1e2   : > { %v885_v52 = vadd.f32 %v884_v46, %v883_v13  ;;  %v878_v0 = vmul.f32 %v9708_v57, %v9708_v57  ;;  %v890_v1 = vsel %vm781_vm1, %v855_v36, 0.0  ;;  %v892_v59 = vsel %vm781_vm1, %v856_v61, 0.0 }
 0x1e3   : > { %v802_v27 = vadd.f32 %v801_v15, %v800_v9  ;;  %v888_v15 = vsel %vm781_vm1, %v854_v6, 0.0  ;;  %v894_v54 = vsel %vm781_vm1, %v857_v7, 0.0  ;;  %v896_v53 = vsel %vm781_vm1, %v858_v4, 0.0 }
 0x1e4   : > { %v887_v9 = vadd.f32 %v886_v48, %v885_v52  ;;  %v898_v56 = vsel %vm781_vm1, %v859_v19, 0.0  ;;  %v900_v46 = vsel %vm781_vm1, %v860_v8, 0.0  ;;  %v904_v6 = vsel %vm781_vm1, %v862_v23, 0.0 }
 0x1e5   : > { %v804_v37 = vadd.f32 %v803_v16, %v802_v27  ;;  %v902_v16 = vsel %vm781_vm1, %v861_v24, 0.0  ;;  %v906_v36 = vsel %vm781_vm1, %v863_v26, 0.0  ;;  %v908_v48 = vsel %vm781_vm1, %v864_v30, 0.0 }
 0x1e6   : > { %v889_v13 = vadd.f32 %v888_v15, %v887_v9  ;;  %v910_v61 = vsel %vm781_vm1, %v865_v31, 0.0  ;;  %v912_v7 = vsel %vm781_vm1, %v866_v32, 0.0  ;;  %v918_v24 = vsel %vm781_vm1, %v869_v38, 0.0 }
 0x1e7   : > { %v806_v55 = vadd.f32 %v9748_v17, %v804_v37  ;;  %v914_v37 = vsel %vm781_vm1, %v867_v58, 0.0  ;;  %v916_v17 = vsel %vm781_vm1, %v868_v33, 0.0  ;;  %v920_v4 = vsel %vm781_vm1, %v870_v39, 0.0 }
 0x1e8   : > { %v891_v19 = vadd.f32 %v890_v1, %v889_v13  ;;  %v922_v26 = vsel %vm781_vm1, %v871_v40, 0.0  ;;  %v924_v30 = vsel %vm781_vm1, %v872_v44, 0.0  ;;  %v928_v32 = vsel %vm781_vm1, %v874_v47, 0.0 }
 0x1e9   : > { %v808_v52 = vadd.f32 %v9752_v20, %v806_v55  ;;  %v926_v55 = vsel %vm781_vm1, %v873_v45, 0.0  ;;  %v930_v20 = vsel %vm781_vm1, %v875_v49, 0.0  ;;  %v932_v8 = vsel %vm781_vm1, %v876_v50, 0.0 }
 0x1ea   : > { %v893_v31 = vadd.f32 %v892_v59, %v891_v19  ;;  %v934_v38 = vsel %vm781_vm1, %v877_v51, 0.0  ;;  %v936_v39 = vsel %vm781_vm1, %v878_v0, 0.0 }
 0x1eb   : > { %v810_v23 = vadd.f32 %v9756_v21, %v808_v52  ;;  %v12704_v52 = vld [vmem:[#allocation68_spill] sm:$0xff] }
 0x1ec   : > { %v895_v21 = vadd.f32 %v894_v54, %v893_v31 }
 0x1ed   : > { %v812_v33 = vadd.f32 %v9760_v22, %v810_v23 }
 0x1ee   : > { %v897_v58 = vadd.f32 %v896_v53, %v895_v21 }
 0x1ef   : > { %v814_v40 = vadd.f32 %v9764_v10, %v812_v33 }
 0x1f0   : > { %v899_v45 = vadd.f32 %v898_v56, %v897_v58 }
 0x1f1   : > { %v816_v44 = vadd.f32 %v9768_v11, %v814_v40 }
 0x1f2   : > { %v901_v47 = vadd.f32 %v900_v46, %v899_v45 }
 0x1f3   : > { %v818_v27 = vadd.f32 %v9772_v14, %v816_v44 }
 0x1f4   : > { %v903_v15 = vadd.f32 %v902_v16, %v901_v47 }
 0x1f5   : > { %v820_v49 = vadd.f32 %v9777_v28, %v818_v27 }
 0x1f6   : > { %v905_v22 = vadd.f32 %v904_v6, %v903_v15  ;;  %v12703_v6 = vld [vmem:[#allocation67_spill] sm:$0xff] }
 0x1f7   : > { %v822_v50 = vadd.f32 %v9781_v29, %v820_v49  ;;  %v778_v15 = vld [vmem:[#allocation20 + $0x8] sm:$0xff] }
 0x1f8   : > { %v907_v1 = vadd.f32 %v906_v36, %v905_v22  ;;  %v12707_v22 = vmov 0.0|0.0  }
 0x1f9   : > { %v824_v51 = vadd.f32 %v9785_v34, %v822_v50 }
 0x1fa   : > { %v909_v0 = vadd.f32 %v908_v48, %v907_v1  ;;  %v780_v1 = vld [vmem:[#allocation20 + $0x18] sm:$0xff] }
 0x1fb   : > { %v826_v54 = vadd.f32 %v9789_v35, %v824_v51  ;;  %v779_v51 = vld [vmem:[#allocation20 + $0x10] sm:$0xff] }
 0x1fc   : > { %v911_v10 = vadd.f32 %v910_v61, %v909_v0 }
 0x1fd   : > { %v828_v53 = vadd.f32 %v9793_v41, %v826_v54  ;;  %v7734_v54 = vpack.c.bf16 %v780_v1, %v779_v51 }
 0x1fe   : > { %v913_v11 = vadd.f32 %v912_v7, %v911_v10 }
 0x1ff   : > { %v830_v56 = vadd.f32 %v9797_v42, %v828_v53  ;;  %v879_v42 = vmul.f32 %v12703_v6, %v12703_v6 }
 0x200   : > { %v915_v9 = vadd.f32 %v914_v37, %v913_v11 }
 0x201   : > { %v832_v14 = vadd.f32 %v9801_v43, %v830_v56  ;;  %v938_v61 = vsel %vm781_vm1, %v879_v42, 0.0 }
 0x202   : > { %v917_v59 = vadd.f32 %v916_v17, %v915_v9 }
 0x203   : > { %v834_v28 = vadd.f32 %v9805_v62, %v832_v14 }
 0x204   : > { %v919_v46 = vadd.f32 %v918_v24, %v917_v59 }
 0x205   : > { %v836_v29 = vadd.f32 %v9809_v63, %v834_v28  ;;  %v880_v63 = vmul.f32 %v12704_v52, %v12704_v52 }
 0x206   : > { %v921_v16 = vadd.f32 %v920_v4, %v919_v46 }
 0x207   : > { %v838_v34 = vadd.f32 %v9813_v2, %v836_v29  ;;  %v881_v2 = vmul.f32 %v9714_v60, %v9714_v60  ;;  %v940_v17 = vsel %vm781_vm1, %v880_v63, 0.0  ;;  %v1122_v29 = vlaneseq }
 0x208   : > { %v923_v13 = vadd.f32 %v922_v26, %v921_v16 }
 0x209   : > { %v840_v35 = vadd.f32 %v9817_v3, %v838_v34  ;;  %v9950_v46 = vshrl.u32 %v1122_v29, 7  ;;  %v6590_v34 = vld [vmem:[#allocation6] ss:$0 sm:$0xff] }
 0x20a   : > { %v925_v36 = vadd.f32 %v924_v30, %v923_v13 }
 0x20b   : > { %v842_v41 = vadd.f32 %v9821_v5, %v840_v35  ;;  %v12705_v5 = vld [vmem:[#allocation69_spill] sm:$0xff]  ;;  %12708 = vst [vmem:[#allocation67_spill] sm:$0xff] %v9950_v46  ;;  %v12611_v16 = vsub.s32 1, %v9950_v46 }
 0x20c   : > { %v927_v48 = vadd.f32 %v926_v55, %v925_v36  ;;  %v882_v19 = vmul.f32 %v12705_v5, %v12705_v5 }
 0x20d   : > { %v844_v43 = vadd.f32 %v9825_v12, %v842_v41  ;;  %v942_v12 = vsel %vm781_vm1, %v881_v2, 0.0 }
 0x20e   : > { %v929_v3 = vadd.f32 %v928_v32, %v927_v48  ;;  %v944_v26 = vsel %vm781_vm1, %v882_v19, 0.0 }
 0x20f   : > { %v845_v62 = vrot.slane %v844_v43, 4 }
 0x210   : > { %v931_v7 = vadd.f32 %v930_v20, %v929_v3 }
 0x211   : > { %v846_v37 = vadd.f32 %v845_v62, %v844_v43  ;;  %v768_v43 = vld [vmem:[#allocation8] sm:$0x1]  ;;  %v12610_v62 = vsub.s32 0, %v9950_v46 }
 0x212   : > { %v933_v24 = vadd.f32 %v932_v8, %v931_v7 }
 0x213   : > { %v847_v23 = vrot.slane %v846_v37, 2 }
 0x214   : > { %v935_v4 = vadd.f32 %v934_v38, %v933_v24  ;;  %v12706_v38 = vmov 0.0   ;;  %v12712_v24 = vld [vmem:[#allocation47_spill] sm:$0xff] }
 0x215   : > { %v848_v32 = vadd.f32 %v847_v23, %v846_v37  ;;  %v12710_v37 = vld [vmem:[#allocation45_spill] sm:$0xff] }
 0x216   : > { %v937_v30 = vadd.f32 %v936_v39, %v935_v4  ;;  %v777_v39 = vld [vmem:[#allocation20] sm:$0xff] }
 0x217   : > { %v849_v58 = vrot.slane %v848_v32, 1  ;;  %v7731_v50 = vpack.c.bf16 %v778_v15, %v777_v39 }
 0x218   : > { %v939_v55 = vadd.f32 %v938_v61, %v937_v30  ;;  %v12709_v61 = vld [vmem:[#allocation42_spill] sm:$0xff]  ;;  %v12714_v30 = vld [vmem:[#allocation44_spill] sm:$0xff] }
 0x219   : > { %v850_v27 = vadd.f32 %v849_v58, %v848_v32  ;;  %v12717_v32 = vld [vmem:[#allocation48_spill] sm:$0xff] }
 0x21a   : > { %v941_v31 = vadd.f32 %v940_v17, %v939_v55  ;;  %v12711_v17 = vld [vmem:[#allocation46_spill] sm:$0xff] }
 0x21c   : > { %v943_v33 = vadd.f32 %v942_v12, %v941_v31 }
 0x21e   : > { %v945_v21 = vadd.f32 %v944_v26, %v943_v33  ;;  %v12716_v33 = vld [vmem:[#allocation51_spill] sm:$0xff] }
 0x220   : > { %v946_v20 = vrot.slane %v945_v21, 4 }
 0x222   : > { %v947_v40 = vadd.f32 %v946_v20, %v945_v21 }
 0x224   : > { %v948_v44 = vrot.slane %v947_v40, 2 }
 0x226   : > { %v949_v45 = vadd.f32 %v948_v44, %v947_v40  ;;  %v12718_v40 = vld [vmem:[#allocation49_spill] sm:$0xff]  ;;  %v12719_v44 = vld [vmem:[#allocation54_spill] sm:$0xff] }
 0x228   : > { %v950_v47 = vrot.slane %v949_v45, 1 }
 0x22a   : > { %v951_v49 = vadd.f32 %v950_v47, %v949_v45 }
 0x22c   : > { %v953_v8 = vsel %vm952_vm2, %v850_v27, %v951_v49 }
 0x22d   : > { %7419 = vmatmul.mubr.msk.f32.vlgmr.msra.gmra.mrb[0].mxu1 %vm781_vm1, %v953_v8 }
 0x22e   : > { %7429 = vmatprep.mubr.msk.f32.mxu1 %vm9073_vm0, %v12706_v38  ;;  %7732 = vmatpush3.bf16.msra.mxu1 %v7731_v50 }
 0x22f   : > { %7733 = vmatprep.subr.bf16.mxu1 %v12707_v22 }
 0x232   : > { %7735 = vmatpush3.bf16.msra.mxu1 %v7734_v54 }
 0x300   : > { %v1023_v0 = vpop.f32.mrb[0].mxu1 }
 0x301   : > { %v1027_v53 = vmul.f32 0.001953125, %v1023_v0  ;;  %v7420_v10 = vpop.f32.mrb[1].mxu1 }
 0x303   : > { %v1028_v56 = vmul.f32 %v1027_v53, %v1027_v53 }
 0x305   : > { %v1030_v11 = vrot.slane %v1028_v56, 7 }
 0x307   : > { %v1032_v14 = vsub.f32 %v1027_v53, %v1030_v11 }
 0x309   : > { %v1033_v9 = vadd.f32 1e-05, %v1032_v14 }
 0x30b   : > { %8259 = vrsqrt.f32 %v1033_v9 }
 0x315   : > { %v8260_v28 = vpop.eup %8259 }
 0x316   : > { %v1035_v59 = vsel %vm952_vm2, %v1027_v53, %v8260_v28 }
 0x317   : > { %7430 = vmatmul.mubr.msk.f32.vlgmr.msra.gmra.mrb[2].mxu1 %vm1036_vm3, %v1035_v59 }
 0x3ea   : > { %v1106_v35 = vpop.f32.mrb[2].mxu1 }
 0x3eb   : > { %v1116_v13 = vmul.f32 %v6590_v34, %v1106_v35  ;;  %v7431_v41 = vpop.f32.mrb[3].mxu1 }
 0x3ed   : > { %v1118_v42 = vrot.slane %v1116_v13, 1  ;;  %v9955_v36 = vrot.slane %v1116_v13, %v12611_v16  ;;  %v12720_v13 = vld [vmem:[#allocation55_spill] sm:$0xff] }
 0x3ef   : > { %v1120_v48 = vmul.f32 %v1118_v42, %v1106_v35  ;;  %v1126_v2 = vmul.f32 %v9955_v36, %v9640_v18  ;;  %v1127_v3 = vmul.f32 %v9955_v36, %v12709_v61  ;;  %v1130_v7 = vmul.f32 %v9955_v36, %v9652_v25  ;;  %v12713_v18 = vld [vmem:[#allocation43_spill] sm:$0xff]  ;;  %v12715_v25 = vld [vmem:[#allocation50_spill] sm:$0xff]  ;;  %v12721_v42 = vld [vmem:[#allocation52_spill] sm:$0xff] }
 0x3f0   : > { %v1131_v19 = vmul.f32 %v9955_v36, %v12710_v37  ;;  %v1132_v12 = vmul.f32 %v9955_v36, %v12711_v17  ;;  %v1133_v4 = vmul.f32 %v9955_v36, %v12712_v24  ;;  %v1128_v26 = vmul.f32 %v9955_v36, %v12713_v18 }
 0x3f1   : > { %v1121_v63 = vsub.f32 %v768_v43, %v1120_v48  ;;  %v1129_v55 = vmul.f32 %v9955_v36, %v12714_v30  ;;  %v1136_v31 = vmul.f32 %v9955_v36, %v12715_v25  ;;  %v1137_v21 = vmul.f32 %v9955_v36, %v12716_v33  ;;  %v12722_v25 = vld [vmem:[#allocation53_spill] sm:$0xff] }
 0x3f2   : > { %v1134_v20 = vmul.f32 %v9955_v36, %v12717_v32  ;;  %v1135_v58 = vmul.f32 %v9955_v36, %v12718_v40  ;;  %v1140_v45 = vmul.f32 %v9955_v36, %v12719_v44  ;;  %v1141_v41 = vmul.f32 %v9955_v36, %v12720_v13  ;;  %v12723_v44 = vld [vmem:[#allocation58_spill] sm:$0xff] }
 0x3f3   : > { %v9972_v23 = vrot.slane %v1121_v63, %v12610_v62  ;;  %v1138_v43 = vmul.f32 %v9955_v36, %v12721_v42 }
 0x3f5   : > { %v9989_v27 = vadd.f32 %v9972_v23, %v1126_v2  ;;  %v9992_v47 = vadd.f32 %v9972_v23, %v1127_v3  ;;  %v9995_v49 = vadd.f32 %v9972_v23, %v1130_v7  ;;  %v9998_v8 = vadd.f32 %v9972_v23, %v1131_v19 }
 0x3f6   : > { %v10001_v39 = vadd.f32 %v9972_v23, %v1132_v12  ;;  %v10004_v15 = vadd.f32 %v9972_v23, %v1133_v4  ;;  %v10007_v50 = vadd.f32 %v9972_v23, %v1128_v26  ;;  %v10010_v51 = vadd.f32 %v9972_v23, %v1129_v55 }
 0x3f7   : > { %v1196_v1 = vsub.f32 0.0, %v9989_v27  ;;  %v1197_v54 = vsub.f32 0.0, %v9992_v47  ;;  %v1200_v0 = vsub.f32 0.0, %v9995_v49  ;;  %v1201_v53 = vsub.f32 0.0, %v9998_v8 }
 0x3f8   : > { %v1202_v10 = vsub.f32 0.0, %v10001_v39  ;;  %v1203_v56 = vsub.f32 0.0, %v10004_v15  ;;  %v1198_v11 = vsub.f32 0.0, %v10007_v50  ;;  %v1199_v14 = vsub.f32 0.0, %v10010_v51 }
 0x3f9   : > { %v1228_v9 = vmul.f32 1.442695, %v1196_v1  ;;  %v1230_v28 = vmul.f32 1.442695, %v1197_v54  ;;  %v1236_v59 = vmul.f32 1.442695, %v1200_v0  ;;  %v10021_v29 = vadd.f32 %v9972_v23, %v1136_v31 }
 0x3fa   : > { %v1238_v34 = vmul.f32 1.442695, %v1201_v53  ;;  %v10024_v35 = vadd.f32 %v9972_v23, %v1137_v21  ;;  %v1240_v48 = vmul.f32 1.442695, %v1202_v10  ;;  %v1242_v63 = vmul.f32 1.442695, %v1203_v56 }
 0x3fb   : > { %8261 = vpow2.f32 %v1228_v9  ;;  %v1206_v2 = vsub.f32 0.0, %v10021_v29  ;;  %v10033_v3 = vadd.f32 %v9972_v23, %v1134_v20  ;;  %v10036_v7 = vadd.f32 %v9972_v23, %v1135_v58  ;;  %v12724_v1 = vld [vmem:[#allocation59_spill] sm:$0xff]  ;;  %v12725_v0 = vld [vmem:[#allocation56_spill] sm:$0xff]  ;;  %v12727_v9 = vld [vmem:[#allocation62_spill] sm:$0xff] }
 0x3fc   : > { %8263 = vpow2.f32 %v1230_v28  ;;  %v1207_v61 = vsub.f32 0.0, %v10024_v35  ;;  %v1232_v37 = vmul.f32 1.442695, %v1198_v11  ;;  %v1234_v19 = vmul.f32 1.442695, %v1199_v14  ;;  %v12726_v11 = vld [vmem:[#allocation57_spill] sm:$0xff] }
 0x3fd   : > { %8265 = vpow2.f32 %v1236_v59  ;;  %v10039_v17 = vadd.f32 %v9972_v23, %v1140_v45  ;;  %v1204_v12 = vsub.f32 0.0, %v10033_v3  ;;  %v1205_v24 = vsub.f32 0.0, %v10036_v7 }
 0x3fe   : > { %8267 = vpow2.f32 %v1238_v34  ;;  %v10044_v4 = vadd.f32 %v9972_v23, %v1141_v41  ;;  %v1248_v18 = vmul.f32 1.442695, %v1206_v2  ;;  %v10048_v30 = vadd.f32 %v9972_v23, %v1138_v43 }
 0x3ff   : > { %8269 = vpow2.f32 %v1240_v48  ;;  %v1210_v26 = vsub.f32 0.0, %v10039_v17  ;;  %v1250_v55 = vmul.f32 1.442695, %v1207_v61  ;;  %v1139_v31 = vmul.f32 %v9955_v36, %v12722_v25 }
 0x400   : > { %8271 = vpow2.f32 %v1242_v63  ;;  %v1244_v33 = vmul.f32 1.442695, %v1204_v12  ;;  %v1246_v21 = vmul.f32 1.442695, %v1205_v24  ;;  %v1211_v32 = vsub.f32 0.0, %v10044_v4 }
 0x401   : > { %8273 = vpow2.f32 %v1232_v37  ;;  %v10054_v20 = vadd.f32 %v9972_v23, %v1139_v31  ;;  %v1256_v40 = vmul.f32 1.442695, %v1210_v26  ;;  %v1208_v58 = vsub.f32 0.0, %v10048_v30  ;;  %v12728_v26 = vld [vmem:[#allocation63_spill] sm:$0xff] }
 0x402   : > { %8275 = vpow2.f32 %v1234_v19  ;;  %v1144_v45 = vmul.f32 %v9955_v36, %v12723_v44  ;;  %v1145_v54 = vmul.f32 %v9955_v36, %v12724_v1  ;;  %v1142_v53 = vmul.f32 %v9955_v36, %v12725_v0  ;;  %v12730_v0 = vld [vmem:[#allocation61_spill] sm:$0xff] }
 0x403   : > { %8277 = vpow2.f32 %v1248_v18  ;;  %v1143_v14 = vmul.f32 %v9955_v36, %v12726_v11  ;;  %v1148_v28 = vmul.f32 %v9955_v36, %v12727_v9  ;;  %v10070_v13 = vmul.f32 1.442695, %v1211_v32 }
 0x404   : > { %8279 = vpow2.f32 %v1250_v55  ;;  %v10064_v56 = vadd.f32 %v9972_v23, %v1144_v45  ;;  %v1209_v41 = vsub.f32 0.0, %v10054_v20  ;;  %v10073_v48 = vmul.f32 1.442695, %v1208_v58 }
 0x405   : > { %v8262_v10 = vpop.eup %8261  ;;  %8281 = vpow2.f32 %v1244_v33  ;;  %v10076_v63 = vadd.f32 %v9972_v23, %v1145_v54  ;;  %v10079_v37 = vadd.f32 %v9972_v23, %v1142_v53  ;;  %v10082_v19 = vadd.f32 %v9972_v23, %v1143_v14 }
 0x406   : > { %v8264_v59 = vpop.eup %8263  ;;  %v1292_v34 = vadd.f32 1.0, %v8262_v10  ;;  %8283 = vpow2.f32 %v1246_v21  ;;  %v1214_v18 = vsub.f32 0.0, %v10064_v56  ;;  %v1149_v55 = vmul.f32 %v9955_v36, %v12728_v26  ;;  %v12729_v21 = vld [vmem:[#allocation60_spill] sm:$0xff] }
 0x407   : > { %v8266_v42 = vpop.eup %8265  ;;  %v1293_v43 = vadd.f32 1.0, %v8264_v59  ;;  %8285 = vpow2.f32 %v1256_v40  ;;  %v10088_v33 = vadd.f32 %v9972_v23, %v1148_v28  ;;  %v1146_v32 = vmul.f32 %v9955_v36, %v12729_v21 }
 0x408   : > { %v8268_v2 = vpop.eup %8267  ;;  %8287 = vrcp.f32 %v1292_v34  ;;  %v1296_v61 = vadd.f32 1.0, %v8266_v42  ;;  %v1215_v44 = vsub.f32 0.0, %v10076_v63  ;;  %v10094_v45 = vadd.f32 %v9972_v23, %v1149_v55 }
 0x409   : > { %v8270_v12 = vpop.eup %8269  ;;  %8289 = vrcp.f32 %v1293_v43  ;;  %v1297_v24 = vadd.f32 1.0, %v8268_v2  ;;  %v1147_v53 = vmul.f32 %v9955_v36, %v12730_v0  ;;  %v10099_v10 = vadd.f32 %v9972_v23, %v1146_v32 }
 0x40a   : > { %v8272_v25 = vpop.eup %8271  ;;  %8291 = vrcp.f32 %v1296_v61  ;;  %v1298_v31 = vadd.f32 1.0, %v8270_v12  ;;  %v1212_v9 = vsub.f32 0.0, %v10079_v37  ;;  %v1213_v28 = vsub.f32 0.0, %v10082_v19 }
 0x40b   : > { %v8274_v40 = vpop.eup %8273  ;;  %8293 = vrcp.f32 %v1297_v24  ;;  %v1299_v58 = vadd.f32 1.0, %v8272_v25  ;;  %v1218_v42 = vsub.f32 0.0, %v10088_v33  ;;  %v10105_v43 = vadd.f32 %v9972_v23, %v1147_v53 }
 0x40c   : > { %v8276_v1 = vpop.eup %8275  ;;  %8295 = vrcp.f32 %v1298_v31  ;;  %v1294_v54 = vadd.f32 1.0, %v8274_v40  ;;  %v1254_v12 = vmul.f32 1.442695, %v1209_v41  ;;  %v1264_v24 = vmul.f32 1.442695, %v1214_v18  ;;  %v12731_v18 = vld [vmem:[#allocation66_spill] sm:$0xff] }
 0x40d   : > { %v8278_v11 = vpop.eup %8277  ;;  %8297 = vrcp.f32 %v1299_v58  ;;  %v1295_v14 = vadd.f32 1.0, %v8276_v1  ;;  %v1219_v25 = vsub.f32 0.0, %v10094_v45  ;;  %v1216_v31 = vsub.f32 0.0, %v10099_v10 }
 0x40e   : > { %v8280_v59 = vpop.eup %8279  ;;  %8299 = vrcp.f32 %v1294_v54  ;;  %v1302_v34 = vadd.f32 1.0, %v8278_v11  ;;  %v10109_v40 = vmul.f32 1.442695, %v1215_v44  ;;  %v10111_v58 = vmul.f32 1.442695, %v1212_v9 }
 0x40f   : > { %v8282_v2 = vpop.eup %8281  ;;  %8301 = vrcp.f32 %v1295_v14  ;;  %v1303_v61 = vadd.f32 1.0, %v8280_v59  ;;  %v10113_v54 = vmul.f32 1.442695, %v1213_v28  ;;  %v10115_v0 = vmul.f32 1.442695, %v1218_v42 }
 0x410   : > { %v8284_v26 = vpop.eup %8283  ;;  %8303 = vrcp.f32 %v1302_v34  ;;  %v1300_v55 = vadd.f32 1.0, %v8282_v2  ;;  %v1217_v41 = vsub.f32 0.0, %v10105_v43  ;;  %v1152_v53 = vmul.f32 %v9955_v36, %v12731_v18 }
 0x411   : > { %v8286_v21 = vpop.eup %8285  ;;  %v1301_v32 = vadd.f32 1.0, %v8284_v26  ;;  %8305 = vrcp.f32 %v1303_v61  ;;  %v1153_v44 = vmul.f32 %v9955_v36, %v9708_v57  ;;  %v10124_v28 = vmul.f32 1.442695, %v1219_v25 }
 0x412   : > { %v8288_v1 = vpop.eup %8287  ;;  %v1306_v59 = vadd.f32 1.0, %v8286_v21  ;;  %8307 = vrcp.f32 %v1300_v55  ;;  %v10126_v42 = vmul.f32 1.442695, %v1216_v31  ;;  %v10130_v18 = vadd.f32 %v9972_v23, %v1152_v53 }
 0x413   : > { %v8290_v11 = vpop.eup %8289  ;;  %v1356_v14 = vmul.f32 %v8288_v1, %v9989_v27  ;;  %8309 = vrcp.f32 %v1301_v32  ;;  %v10133_v27 = vadd.f32 %v9972_v23, %v1153_v44  ;;  %v10137_v55 = vmul.f32 1.442695, %v1217_v41  ;;  %v12733_v32 = vld [vmem:[#allocation65_spill] sm:$0xff] }
 0x414   : > { %v8292_v9 = vpop.eup %8291  ;;  %v1357_v34 = vmul.f32 %v8290_v11, %v9992_v47  ;;  %8311 = vpow2.f32 %v10070_v13  ;;  %v10144_v1 = vmul.f32 %v9955_v36, %v12733_v32 }
 0x415   : > { %v8294_v2 = vpop.eup %8293  ;;  %v1360_v26 = vmul.f32 %v8292_v9, %v9995_v49  ;;  %8313 = vrcp.f32 %v1306_v59  ;;  %v12732_v49 = vld [vmem:[#allocation64_spill] sm:$0xff] }
 0x416   : > { %v8296_v61 = vpop.eup %8295  ;;  %v1388_v57 = vpack.c.bf16 %v1357_v34, %v1356_v14  ;;  %v1361_v47 = vmul.f32 %v8294_v2, %v9998_v8  ;;  %v1150_v21 = vmul.f32 %v9955_v36, %v12732_v49  ;;  %8315 = vpow2.f32 %v10073_v48 }
 0x417   : > { %v8298_v25 = vpop.eup %8297  ;;  %v1362_v31 = vmul.f32 %v8296_v61, %v10001_v39  ;;  %8317 = vpow2.f32 %v1254_v12 }
 0x418   : > { %v8300_v53 = vpop.eup %8299  ;;  %v1406_v11 = vshrl.u32 %v1388_v57, 16  ;;  %v1390_v14 = vpack.c.bf16 %v1361_v47, %v1360_v26  ;;  %v1363_v8 = vmul.f32 %v8298_v25, %v10004_v15  ;;  %v1409_v2 = vshll.u32 %v1388_v57, 16 }
 0x419   : > { %v8302_v13 = vpop.eup %8301  ;;  %v1358_v41 = vmul.f32 %v8300_v53, %v10007_v50  ;;  %8319 = vpow2.f32 %v1264_v24  ;;  %v10159_v47 = vadd.f32 %v9972_v23, %v1150_v21 }
 0x41a   : > { %v8304_v9 = vpop.eup %8303  ;;  %v1408_v34 = vrot.slane %v1406_v11, 7  ;;  %v1420_v15 = vshrl.u32 %v1390_v14, 16  ;;  %v1391_v26 = vpack.c.bf16 %v1363_v8, %v1362_v31  ;;  %v1423_v48 = vshll.u32 %v1390_v14, 16 }
 0x41b   : > { %v1359_v61 = vmul.f32 %v8302_v13, %v10010_v51  ;;  %v8306_v32 = vpop.eup %8305  ;;  %v1366_v31 = vmul.f32 %v8304_v9, %v10021_v29  ;;  %8321 = vpow2.f32 %v10109_v40 }
 0x41c   : > { %v1411_v25 = vor.u32 %v1409_v2, %v1408_v34  ;;  %v1568_v50 = vsel %vm10150_vm6, %v1408_v34, 0  ;;  %v1422_v12 = vrot.slane %v1420_v15, 7  ;;  %v1427_v49 = vshrl.u32 %v1391_v26, 16  ;;  %v8308_v14 = vpop.eup %8307 }
 0x41d   : > { %v1593_v53 = vshll.u32 %v1568_v50, 16  ;;  %v1430_v11 = vshll.u32 %v1391_v26, 16  ;;  %v1389_v57 = vpack.c.bf16 %v1359_v61, %v1358_v41  ;;  %v8310_v13 = vpop.eup %8309  ;;  %v1843_v2 = vrot.slane %v1568_v50, 1 }
 0x41e   : > { %v10166_v51 = vsel %vm10150_vm6, 0, %v1411_v25  ;;  %v1425_v24 = vor.u32 %v1423_v48, %v1422_v12  ;;  %v10170_v21 = vsel %vm10150_vm6, %v1422_v12, 0  ;;  %v1429_v8 = vrot.slane %v1427_v49, 7  ;;  %v8312_v29 = vpop.eup %8311 }
 0x41f   : > { %12736 = vst [vmem:[#allocation68_spill] sm:$0xff] %v10166_v51  ;;  %12737 = vst [vmem:[#allocation69_spill] sm:$0xff] %v10170_v21  ;;  %v1842_v34 = vrot.slane %v10166_v51, 1  ;;  %v1617_v15 = vshll.u32 %v10170_v21, 16  ;;  %v1586_v9 = vshrl.u32 %v10166_v51, 16  ;;  %v1588_v26 = vshll.u32 %v10166_v51, 16  ;;  %v10181_v61 = vpop.eup %8313 }
 0x420   : > { %v10177_v41 = vsel %vm10150_vm6, 0, %v1425_v24  ;;  %v1432_v48 = vor.u32 %v1430_v11, %v1429_v8  ;;  %v1595_v40 = vrot.slane %v1593_v53, 1  ;;  %v8316_v49 = vpop.eup %8315  ;;  %v10196_v11 = vsel %vm10150_vm6, %v1429_v8, 0 }
 0x421   : > { %12738 = vst [vmem:[#allocation42_spill] sm:$0xff] %v10177_v41  ;;  %v10184_v25 = vsel %vm1841_vm5, %v1842_v34, %v1843_v2  ;;  %v1610_v50 = vshrl.u32 %v10177_v41, 16  ;;  %v1612_v12 = vshll.u32 %v10177_v41, 16  ;;  %v1590_v24 = vrot.slane %v1588_v26, 1  ;;  %12740 = vst [vmem:[#allocation46_spill] sm:$0xff] %v10196_v11  ;;  %v8318_v2 = vpop.eup %8317 }
 0x422   : > { %12739 = vst [vmem:[#allocation45_spill] sm:$0xff] %v10184_v25  ;;  %6604 = vmatprep.mubr.msk.bf16.mxu1 %vm781_vm1, %v10184_v25  ;;  %v10192_v62 = vsel %vm10150_vm6, 0, %v1432_v48  ;;  %v1413_v34 = vshrl.u32 %v1389_v57, 16  ;;  %v1619_v44 = vrot.slane %v1617_v15, 1  ;;  %v1629_v53 = vshll.u32 %v10196_v11, 16 }
 0x423   : > { %v1614_v16 = vrot.slane %v1612_v12, 1  ;;  %v1624_v59 = vshll.u32 %v10192_v62, 16  ;;  %v1591_v46 = vor.u32 %v1590_v24, %v1586_v9  ;;  %v1416_v22 = vshll.u32 %v1389_v57, 16  ;;  %v8320_v25 = vpop.eup %8319 }
 0x424   : > { %v1415_v38 = vrot.slane %v1413_v34, 7  ;;  %v1367_v26 = vmul.f32 %v8306_v32, %v10024_v35  ;;  %v1622_v21 = vshrl.u32 %v10192_v62, 16  ;;  %v1364_v8 = vmul.f32 %v8308_v14, %v10033_v3 }
 0x425   : > { %v1615_v48 = vor.u32 %v1614_v16, %v1610_v50  ;;  %v1626_v41 = vrot.slane %v1624_v59, 1  ;;  %v1596_v51 = vsel %vm1584_vm7, %v1591_v46, %v1595_v40  ;;  %v1365_v16 = vmul.f32 %v8310_v13, %v10036_v7 }
 0x426   : > { %v1418_v12 = vor.u32 %v1416_v22, %v1415_v38  ;;  %v10206_v15 = vsel %vm10150_vm6, %v1415_v38, 0  ;;  %v1393_v11 = vpack.c.bf16 %v1367_v26, %v1366_v31  ;;  %1777 = vrot.lane.b32.xlu0 %v1596_v51, %s9075_s16  ;;  %v10213_v59 = vadd.f32 %v9972_v23, %v10144_v1 }
 0x427   : > { %v1620_v9 = vsel %vm1584_vm7, %v1615_v48, %v1619_v44  ;;  %v1627_v35 = vor.u32 %v1626_v41, %v1622_v21  ;;  %v1631_v22 = vrot.slane %v1629_v53, 1  ;;  %v1307_v3 = vadd.f32 1.0, %v8312_v29  ;;  %v8322_v44 = vpop.eup %8321 }
 0x428   : > { %1781 = vrot.lane.b32.xlu1 %v1620_v9, %s9075_s16  ;;  %v10218_v38 = vsel %vm10150_vm6, 0, %v1418_v12  ;;  %v1441_v46 = vshrl.u32 %v1393_v11, 16  ;;  %v1605_v57 = vshll.u32 %v10206_v15, 16  ;;  %v1444_v31 = vshll.u32 %v1393_v11, 16 }
 0x429   : > { %v1600_v32 = vshll.u32 %v10218_v38, 16  ;;  %v12741_v7 = vsub.f32 0.0, %v10130_v18  ;;  %v1632_v1 = vsel %vm1584_vm7, %v1627_v35, %v1631_v22  ;;  %v1392_v21 = vpack.c.bf16 %v1365_v16, %v1364_v8 }
 0x42a   : > { %v1443_v51 = vrot.slane %v1441_v46, 7  ;;  %8323 = vrcp.f32 %v1307_v3  ;;  %v1598_v13 = vshrl.u32 %v10218_v38, 16  ;;  %v1304_v50 = vadd.f32 1.0, %v8316_v49 }
 0x42b   : > { %v10224_v14 = vmul.f32 1.442695, %v12741_v7  ;;  %v1602_v41 = vrot.slane %v1600_v32, 1  ;;  %v1305_v29 = vadd.f32 1.0, %v8318_v2  ;;  %v1434_v11 = vshrl.u32 %v1392_v21, 16 }
 0x42c   : > { %1783 = vrot.lane.b32.xlu1 %v1632_v1, %s9075_s16  ;;  %v1446_v40 = vor.u32 %v1444_v31, %v1443_v51  ;;  %v10231_v24 = vsel %vm10150_vm6, %v1443_v51, 0  ;;  %v1310_v34 = vadd.f32 1.0, %v8320_v25  ;;  %v1607_v26 = vrot.slane %v1605_v57, 1 }
 0x42d   : > { %v1603_v53 = vor.u32 %v1602_v41, %v1598_v13  ;;  %8325 = vrcp.f32 %v1304_v50  ;;  %v1311_v48 = vadd.f32 1.0, %v8322_v44  ;;  %v1436_v12 = vrot.slane %v1434_v11, 7 }
 0x42e   : > { %v10235_v8 = vsel %vm10150_vm6, 0, %v1446_v40  ;;  %v1437_v49 = vshll.u32 %v1392_v21, 16  ;;  %8327 = vrcp.f32 %v1305_v29  ;;  %v1653_v35 = vshll.u32 %v10231_v24, 16 }
 0x42f   : > { %v1608_v2 = vsel %vm1584_vm7, %v1603_v53, %v1607_v26  ;;  %v1648_v9 = vshll.u32 %v10235_v8, 16  ;;  %v1220_v16 = vsub.f32 0.0, %v10159_v47  ;;  %v10244_v22 = vsel %vm10150_vm6, %v1436_v12, 0  ;;  %v8116_v53 = vld [vmem:[#allocation9 + $0x68] sm:$0xff]  }
 0x430   : > { %1779 = vrot.lane.b32.xlu0 %v1608_v2, %s9075_s16  ;;  %v1439_v25 = vor.u32 %v1437_v49, %v1436_v12  ;;  %8329 = vrcp.f32 %v1310_v34  ;;  %v1156_v46 = vmul.f32 %v9955_v36, %v9714_v60  ;;  %v1646_v3 = vshrl.u32 %v10235_v8, 16  ;;  %v8115_v60 = vld [vmem:[#allocation9 + $0x60] sm:$0xff]  }
 0x431   : > { %v1650_v44 = vrot.slane %v1648_v9, 1  ;;  %8331 = vrcp.f32 %v1311_v48  ;;  %v1157_v32 = vmul.f32 %v9955_v36, %v12705_v5  ;;  %v1370_v31 = vmul.f32 %v10181_v61, %v10039_v17 }
 0x432   : > { %v10253_v57 = vsel %vm10150_vm6, 0, %v1439_v25  ;;  %8333 = vpow2.f32 %v10111_v58  ;;  %v10259_v7 = vadd.f32 %v9972_v23, %v1156_v46  ;;  %v1655_v51 = vrot.slane %v1653_v35, 1 }
 0x433   : > { %v1651_v1 = vor.u32 %v1650_v44, %v1646_v3  ;;  %v1636_v21 = vshll.u32 %v10253_v57, 16  ;;  %v1641_v13 = vshll.u32 %v10244_v22, 16  ;;  %v1634_v41 = vshrl.u32 %v10253_v57, 16 }
 0x434   : > { %v8324_v5 = vpop.eup %8323  ;;  %8335 = vpow2.f32 %v10113_v54  ;;  %v10266_v50 = vadd.f32 %v9972_v23, %v1157_v32  ;;  %v9076_v29 = vmov 0   ;;  %v12742_v40 = vsub.f32 0.0, %v10133_v27 }
 0x435   : > { %v1656_v17 = vsel %vm1584_vm7, %v1651_v1, %v1655_v51  ;;  %v1638_v58 = vrot.slane %v1636_v21, 1  ;;  %v1371_v61 = vmul.f32 %v8324_v5, %v10044_v4  ;;  %8337 = vpow2.f32 %v10115_v0  ;;  %2089 = vmatprep.subr.bf16.mxu1 %v9076_v29 }
 0x436   : > { %1787 = vrot.lane.b32.xlu1 %v1656_v17, %s9075_s16  ;;  %8339 = vpow2.f32 %v10124_v28  ;;  %v1282_v54 = vmul.f32 1.442695, %v12742_v40  ;;  %v1221_v11 = vsub.f32 0.0, %v10213_v59  ;;  %v1276_v34 = vmul.f32 1.442695, %v1220_v16  ;;  %2090 = vmatpush1.bf16.msra.mxu1 %v8115_v60  ;;  %v8118_v17 = vld [vmem:[#allocation9 + $0x78] sm:$0xff]  }
 0x437   : > { %v8326_v26 = vpop.eup %8325  ;;  %v1639_v48 = vor.u32 %v1638_v58, %v1634_v41  ;;  %v1643_v4 = vrot.slane %v1641_v13, 1  ;;  %v1395_v12 = vpack.c.bf16 %v1371_v61, %v1370_v31  ;;  %8341 = vpow2.f32 %v10126_v42  ;;  %2091 = vmatprep.subr.bf16.mxu1 %v9076_v29 }
 0x438   : > { %v8328_v0 = vpop.eup %8327  ;;  %v1368_v49 = vmul.f32 %v8326_v26, %v10048_v30  ;;  %8343 = vpow2.f32 %v10137_v55  ;;  %v1226_v28 = vsub.f32 0.0, %v10259_v7  ;;  %v1227_v2 = vsub.f32 0.0, %v10266_v50  ;;  %v8117_v30 = vld [vmem:[#allocation9 + $0x70] sm:$0xff]  }
 0x439   : > { %v1644_v9 = vsel %vm1584_vm7, %v1639_v48, %v1643_v4  ;;  %v1455_v35 = vshrl.u32 %v1395_v12, 16  ;;  %v1369_v16 = vmul.f32 %v8328_v0, %v10054_v20  ;;  %v1458_v42 = vshll.u32 %v1395_v12, 16 }
 0x43a   : > { %v8330_v25 = vpop.eup %8329  ;;  %1785 = vrot.lane.b32.xlu0 %v1644_v9, %s9075_s16  ;;  %8345 = vpow2.f32 %v10224_v14  ;;  %v1278_v46 = vmul.f32 1.442695, %v1221_v11  ;;  %2092 = vmatpush1.bf16.msra.mxu1 %v8116_v53  ;;  %v1288_v60 = vmul.f32 1.442695, %v1226_v28  ;;  %v10290_v1 = vmul.f32 1.442695, %v1227_v2 }
 0x43b   : > { %v8332_v3 = vpop.eup %8331  ;;  %v1457_v55 = vrot.slane %v1455_v35, 7  ;;  %v1394_v44 = vpack.c.bf16 %v1369_v16, %v1368_v49  ;;  %v1374_v32 = vmul.f32 %v8330_v25, %v10064_v56  ;;  %8347 = vpow2.f32 %v1282_v54  ;;  %2093 = vmatprep.subr.bf16.mxu1 %v9076_v29  ;;  %v8119_v2 = vld [vmem:[#allocation9 + $0x80] sm:$0xff]  }
 0x43c   : > { %v8334_v31 = vpop.eup %8333  ;;  %v1375_v20 = vmul.f32 %v8332_v3, %v10076_v63  ;;  %8349 = vpow2.f32 %v1276_v34  ;;  %v10298_v13 = vmul.f32 %v9955_v36, %v12703_v6  ;;  %v10302_v63 = vmul.f32 %v9955_v36, %v12704_v52 }
 0x43d   : > { %v1460_v51 = vor.u32 %v1458_v42, %v1457_v55  ;;  %v10294_v14 = vsel %vm10150_vm6, %v1457_v55, 0  ;;  %v1448_v21 = vshrl.u32 %v1394_v44, 16  ;;  %v1308_v41 = vadd.f32 1.0, %v8334_v31 }
 0x43e   : > { %v8336_v56 = vpop.eup %8335  ;;  %v1397_v5 = vpack.c.bf16 %v1375_v20, %v1374_v32  ;;  %8351 = vpow2.f32 %v1278_v46  ;;  %2094 = vmatpush1.bf16.msra.mxu1 %v8117_v30  ;;  %v1451_v54 = vshll.u32 %v1394_v44, 16  ;;  %v1677_v53 = vshll.u32 %v10294_v14, 16 }
 0x43f   : > { %v8338_v58 = vpop.eup %8337  ;;  %v10306_v61 = vsel %vm10150_vm6, 0, %v1460_v51  ;;  %v1450_v40 = vrot.slane %v1448_v21, 7  ;;  %v1309_v11 = vadd.f32 1.0, %v8336_v56  ;;  %2095 = vmatprep.subr.bf16.mxu1 %v9076_v29  ;;  %8353 = vpow2.f32 %v1288_v60 }
 0x440   : > { %v8340_v6 = vpop.eup %8339  ;;  %v1672_v34 = vshll.u32 %v10306_v61, 16  ;;  %v1469_v26 = vshrl.u32 %v1397_v5, 16  ;;  %v1670_v36 = vshrl.u32 %v10306_v61, 16  ;;  %8355 = vrcp.f32 %v1308_v41 }
 0x441   : > { %v8342_v52 = vpop.eup %8341  ;;  %v1453_v48 = vor.u32 %v1451_v54, %v1450_v40  ;;  %v10314_v4 = vsel %vm10150_vm6, %v1450_v40, 0  ;;  %v1472_v28 = vshll.u32 %v1397_v5, 16  ;;  %8357 = vrcp.f32 %v1309_v11  ;;  %v8120_v5 = vld [vmem:[#allocation9 + $0x88] sm:$0xff]  }
 0x442   : > { %v8344_v12 = vpop.eup %8343  ;;  %v1674_v0 = vrot.slane %v1672_v34, 1  ;;  %v1471_v49 = vrot.slane %v1469_v26, 7  ;;  %2096 = vmatpush1.bf16.msra.mxu1 %v8118_v17  ;;  %v1314_v35 = vadd.f32 1.0, %v8338_v58  ;;  %v1315_v16 = vadd.f32 1.0, %v8340_v6 }
 0x443   : > { %v10318_v9 = vsel %vm10150_vm6, 0, %v1453_v48  ;;  %v1312_v25 = vadd.f32 1.0, %v8342_v52  ;;  %2097 = vmatprep.subr.bf16.mxu1 %v9076_v29  ;;  %v1679_v30 = vrot.slane %v1677_v53, 1  ;;  %v1665_v55 = vshll.u32 %v10314_v4, 16 }
 0x444   : > { %v8346_v42 = vpop.eup %8345  ;;  %v1675_v46 = vor.u32 %v1674_v0, %v1670_v36  ;;  %v1660_v3 = vshll.u32 %v10318_v9, 16  ;;  %v1474_v32 = vor.u32 %v1472_v28, %v1471_v49  ;;  %v10325_v31 = vsel %vm10150_vm6, %v1471_v49, 0  ;;  %v8121_v49 = vld [vmem:[#allocation9 + $0x90] sm:$0xff]  }
 0x445   : > { %v8348_v44 = vpop.eup %8347  ;;  %8359 = vrcp.f32 %v1314_v35  ;;  %v1313_v20 = vadd.f32 1.0, %v8344_v12  ;;  %v1658_v21 = vshrl.u32 %v10318_v9, 16  ;;  %v1318_v17 = vadd.f32 1.0, %v8346_v42 }
 0x446   : > { %v8350_v60 = vpop.eup %8349  ;;  %v1680_v51 = vsel %vm1584_vm7, %v1675_v46, %v1679_v30  ;;  %v1662_v56 = vrot.slane %v1660_v3, 1  ;;  %8361 = vrcp.f32 %v1315_v16  ;;  %2098 = vmatpush1.bf16.msra.mxu1 %v8119_v2  ;;  %v10332_v41 = vsel %vm10150_vm6, 0, %v1474_v32 }
 0x447   : > { %1791 = vrot.lane.b32.xlu1 %v1680_v51, %s9075_s16  ;;  %8363 = vrcp.f32 %v1312_v25  ;;  %v1319_v58 = vadd.f32 1.0, %v8348_v44  ;;  %2099 = vmatprep.subr.bf16.mxu1 %v9076_v29  ;;  %v1667_v11 = vrot.slane %v1665_v55, 1  ;;  %v1696_v6 = vshll.u32 %v10332_v41, 16 }
 0x448   : > { %v8352_v40 = vpop.eup %8351  ;;  %v1663_v54 = vor.u32 %v1662_v56, %v1658_v21  ;;  %v1701_v34 = vshll.u32 %v10325_v31, 16  ;;  %8365 = vrcp.f32 %v1313_v20  ;;  %v1316_v53 = vadd.f32 1.0, %v8350_v60  ;;  %v8123_v21 = vld [vmem:[#allocation9 + $0xa0] sm:$0xff]  }
 0x449   : > { %v1317_v26 = vadd.f32 1.0, %v8352_v40  ;;  %v10339_v52 = vadd.f32 %v9972_v23, %v10298_v13  ;;  %v8354_v36 = vpop.eup %8353  ;;  %v1694_v12 = vshrl.u32 %v10332_v41, 16  ;;  %v1698_v0 = vrot.slane %v1696_v6, 1 }
 0x44a   : > { %v1668_v48 = vsel %vm1584_vm7, %v1663_v54, %v1667_v11  ;;  %8367 = vrcp.f32 %v1318_v17  ;;  %2100 = vmatpush1.bf16.msra.mxu1 %v8120_v5  ;;  %v8356_v28 = vpop.eup %8355  ;;  %v10346_v2 = vadd.f32 %v9972_v23, %v10302_v63  ;;  %v1703_v16 = vrot.slane %v1701_v34, 1  ;;  %v8122_v23 = vld [vmem:[#allocation9 + $0x98] sm:$0xff]  }
 0x44b   : > { %1789 = vrot.lane.b32.xlu0 %v1668_v48, %s9075_s16  ;;  %8369 = vrcp.f32 %v1319_v58  ;;  %2101 = vmatprep.subr.bf16.mxu1 %v9076_v29  ;;  %v8358_v13 = vpop.eup %8357  ;;  %v1699_v35 = vor.u32 %v1698_v0, %v1694_v12  ;;  %v1372_v25 = vmul.f32 %v8356_v28, %v10079_v37  ;;  %v1224_v46 = vsub.f32 0.0, %v10339_v52  ;;  %v8124_v12 = vld [vmem:[#allocation9 + $0xa8] sm:$0xff]  }
 0x44c   : > { %8371 = vrcp.f32 %v1316_v53  ;;  %v1373_v42 = vmul.f32 %v8358_v13, %v10082_v19  ;;  %v1225_v55 = vsub.f32 0.0, %v10346_v2  ;;  %v1322_v44 = vadd.f32 1.0, %v8354_v36 }
 0x44d   : > { %8373 = vrcp.f32 %v1317_v26  ;;  %v1704_v30 = vsel %vm1584_vm7, %v1699_v35, %v1703_v16  ;;  %v1284_v51 = vmul.f32 1.442695, %v1224_v46 }
 0x44e   : > { %8375 = vpow2.f32 %v10290_v1  ;;  %2102 = vmatpush1.bf16.msra.mxu1 %v8121_v49  ;;  %1795 = vrot.lane.b32.xlu1 %v1704_v30, %s9075_s16  ;;  %v1396_v3 = vpack.c.bf16 %v1373_v42, %v1372_v25  ;;  %v1286_v40 = vmul.f32 1.442695, %v1225_v55 }
 0x44f   : > { %v8360_v63 = vpop.eup %8359  ;;  %2103 = vmatprep.subr.bf16.mxu1 %v9076_v29  ;;  %8377 = vrcp.f32 %v1322_v44 }
 0x450   : > { %v8362_v37 = vpop.eup %8361  ;;  %v1378_v19 = vmul.f32 %v8360_v63, %v10088_v33  ;;  %v1462_v20 = vshrl.u32 %v1396_v3, 16  ;;  %v1465_v17 = vshll.u32 %v1396_v3, 16  ;;  %8379 = vpow2.f32 %v1284_v51 }
 0x451   : > { %v8364_v32 = vpop.eup %8363  ;;  %v1379_v60 = vmul.f32 %v8362_v37, %v10094_v45  ;;  %8381 = vpow2.f32 %v1286_v40  ;;  %v8125_v37 = vld [vmem:[#allocation9 + $0xb0] sm:$0xff]  }
 0x452   : > { %v1376_v1 = vmul.f32 %v8364_v32, %v10099_v10  ;;  %2104 = vmatpush1.bf16.msra.mxu1 %v8122_v23  ;;  %v8366_v56 = vpop.eup %8365  ;;  %v1464_v5 = vrot.slane %v1462_v20, 7 }
 0x453   : > { %v1399_v58 = vpack.c.bf16 %v1379_v60, %v1378_v19  ;;  %2105 = vmatprep.subr.bf16.mxu1 %v9076_v29  ;;  %v1377_v33 = vmul.f32 %v8366_v56, %v10105_v43 }
 0x454   : > { %v8368_v54 = vpop.eup %8367  ;;  %v1467_v6 = vor.u32 %v1465_v17, %v1464_v5  ;;  %v10364_v45 = vsel %vm10150_vm6, %v1464_v5, 0 }
 0x455   : > { %v8370_v11 = vpop.eup %8369  ;;  %v1483_v10 = vshrl.u32 %v1399_v58, 16  ;;  %v1689_v53 = vshll.u32 %v10364_v45, 16  ;;  %v1398_v26 = vpack.c.bf16 %v1377_v33, %v1376_v1  ;;  %v1382_v36 = vmul.f32 %v8368_v54, %v10130_v18  ;;  %v8126_v33 = vld [vmem:[#allocation9 + $0xb8] sm:$0xff]  }
 0x456   : > { %v8372_v34 = vpop.eup %8371  ;;  %v1383_v48 = vmul.f32 %v8370_v11, %v10133_v27  ;;  %2106 = vmatpush1.bf16.msra.mxu1 %v8123_v21  ;;  %v10371_v0 = vsel %vm10150_vm6, 0, %v1467_v6  ;;  %v1486_v28 = vshll.u32 %v1399_v58, 16 }
 0x457   : > { %v8374_v43 = vpop.eup %8373  ;;  %v1485_v49 = vrot.slane %v1483_v10, 7  ;;  %2107 = vmatprep.subr.bf16.mxu1 %v9076_v29  ;;  %v1682_v35 = vshrl.u32 %v10371_v0, 16  ;;  %v1684_v16 = vshll.u32 %v10371_v0, 16  ;;  %v1476_v18 = vshrl.u32 %v1398_v26, 16 }
 0x458   : > { %v8376_v13 = vpop.eup %8375  ;;  %v1380_v27 = vmul.f32 %v8372_v34, %v10159_v47  ;;  %v1691_v25 = vrot.slane %v1689_v53, 1  ;;  %v1401_v30 = vpack.c.bf16 %v1383_v48, %v1382_v36  ;;  %v1479_v3 = vshll.u32 %v1398_v26, 16 }
 0x459   : > { %v1488_v42 = vor.u32 %v1486_v28, %v1485_v49  ;;  %v10379_v46 = vsel %vm10150_vm6, %v1485_v49, 0  ;;  %v1686_v23 = vrot.slane %v1684_v16, 1  ;;  %v1478_v63 = vrot.slane %v1476_v18, 7  ;;  %v8378_v17 = vpop.eup %8377 }
 0x45a   : > { %v1381_v55 = vmul.f32 %v8374_v43, %v10213_v59  ;;  %2108 = vmatpush1.bf16.msra.mxu1 %v8124_v12  ;;  %v1725_v47 = vshll.u32 %v10379_v46, 16  ;;  %v1497_v44 = vshrl.u32 %v1401_v30, 16  ;;  %v1323_v32 = vadd.f32 1.0, %v8376_v13  ;;  %v8380_v11 = vpop.eup %8379 }
 0x45b   : > { %v10384_v19 = vsel %vm10150_vm6, 0, %v1488_v42  ;;  %2109 = vmatprep.subr.bf16.mxu1 %v9076_v29  ;;  %v1687_v20 = vor.u32 %v1686_v23, %v1682_v35  ;;  %v1500_v1 = vshll.u32 %v1401_v30, 16  ;;  %v1481_v21 = vor.u32 %v1479_v3, %v1478_v63  ;;  %v8382_v12 = vpop.eup %8381 }
 0x45c   : > { %v1718_v60 = vshrl.u32 %v10384_v19, 16  ;;  %v1720_v51 = vshll.u32 %v10384_v19, 16  ;;  %v10392_v59 = vsel %vm10150_vm6, %v1478_v63, 0  ;;  %v1499_v56 = vrot.slane %v1497_v44, 7 }
 0x45d   : > { %v1400_v5 = vpack.c.bf16 %v1381_v55, %v1380_v27  ;;  %v1692_v58 = vsel %vm1584_vm7, %v1687_v20, %v1691_v25  ;;  %v1713_v54 = vshll.u32 %v10392_v59, 16  ;;  %8383 = vrcp.f32 %v1323_v32 }
 0x45e   : > { %v1722_v40 = vrot.slane %v1720_v51, 1  ;;  %2110 = vmatpush1.bf16.msra.mxu1 %v8125_v37  ;;  %1793 = vrot.lane.b32.xlu0 %v1692_v58, %s9075_s16  ;;  %v10399_v6 = vsel %vm10150_vm6, 0, %v1481_v21  ;;  %v1502_v10 = vor.u32 %v1500_v1, %v1499_v56  ;;  %v10403_v34 = vsel %vm10150_vm6, %v1499_v56, 0 }
 0x45f   : > { %v1490_v53 = vshrl.u32 %v1400_v5, 16  ;;  %2111 = vmatprep.subr.bf16.mxu1 %v9076_v29  ;;  %v1727_v36 = vrot.slane %v1725_v47, 1  ;;  %v1708_v48 = vshll.u32 %v10399_v6, 16  ;;  %v1749_v49 = vshll.u32 %v10403_v34, 16 }
 0x460   : > { %v1723_v26 = vor.u32 %v1722_v40, %v1718_v60  ;;  %v10409_v43 = vsel %vm10150_vm6, 0, %v1502_v10  ;;  %v1493_v13 = vshll.u32 %v1400_v5, 16  ;;  %v1706_v16 = vshrl.u32 %v10399_v6, 16 }
 0x461   : > { %v1492_v28 = vrot.slane %v1490_v53, 7  ;;  %v1710_v18 = vrot.slane %v1708_v48, 1  ;;  %v1744_v27 = vshll.u32 %v10409_v43, 16  ;;  %v1715_v25 = vrot.slane %v1713_v54, 1 }
 0x462   : > { %v1728_v35 = vsel %vm1584_vm7, %v1723_v26, %v1727_v36  ;;  %2112 = vmatpush1.bf16.msra.mxu1 %v8126_v33  ;;  %v1742_v63 = vshrl.u32 %v10409_v43, 16  ;;  %v1320_v55 = vadd.f32 1.0, %v8380_v11  ;;  %v1751_v37 = vrot.slane %v1749_v49, 1 }
 0x463   : > { %1799 = vrot.lane.b32.xlu1 %v1728_v35, %s9075_s16  ;;  %v1495_v42 = vor.u32 %v1493_v13, %v1492_v28  ;;  %v10418_v30 = vsel %vm10150_vm6, %v1492_v28, 0  ;;  %2408 = vmatprep.subr.bf16.mxu1 %v9076_v29  ;;  %v1711_v23 = vor.u32 %v1710_v18, %v1706_v16  ;;  %v1746_v3 = vrot.slane %v1744_v27, 1 }
 0x464   : > { %v1321_v44 = vadd.f32 1.0, %v8382_v12  ;;  %v1737_v51 = vshll.u32 %v10418_v30, 16  ;;  %v1386_v1 = vmul.f32 %v8378_v17, %v10259_v7  ;;  %8385 = vrcp.f32 %v1320_v55 }
 0x465   : > { %v10424_v47 = vsel %vm10150_vm6, 0, %v1495_v42  ;;  %v1716_v32 = vsel %vm1584_vm7, %v1711_v23, %v1715_v25  ;;  %v1747_v20 = vor.u32 %v1746_v3, %v1742_v63 }
 0x466   : > { %v1732_v60 = vshll.u32 %v10424_v47, 16  ;;  %1797 = vrot.lane.b32.xlu0 %v1716_v32, %s9075_s16  ;;  %v1730_v5 = vshrl.u32 %v10424_v47, 16  ;;  %8387 = vrcp.f32 %v1321_v44  ;;  %v1739_v33 = vrot.slane %v1737_v51, 1 }
 0x467   : > { %v8384_v21 = vpop.eup %8383  ;;  %v1752_v56 = vsel %vm1584_vm7, %v1747_v20, %v1751_v37 }
 0x468   : > { %v1734_v58 = vrot.slane %v1732_v60, 1  ;;  %1803 = vrot.lane.b32.xlu1 %v1752_v56, %s9075_s16  ;;  %v1387_v40 = vmul.f32 %v8384_v21, %v10266_v50  ;;  %v1845_v56 = vrot.slane %v10218_v38, 1 }
 0x46a   : > { %v1735_v54 = vor.u32 %v1734_v58, %v1730_v5  ;;  %v1403_v11 = vpack.c.bf16 %v1387_v40, %v1386_v1  ;;  %v8127_v5 = vld [vmem:[#allocation9] sm:$0xff]   ;;  %v1846_v40 = vrot.slane %v10206_v15, 1  ;;  %v8129_v15 = vld [vmem:[#allocation9 + $0x10] sm:$0xff]  }
 0x46c   : > { %v1740_v10 = vsel %vm1584_vm7, %v1735_v54, %v1739_v33  ;;  %v1511_v7 = vshrl.u32 %v1403_v11, 16  ;;  %v1514_v53 = vshll.u32 %v1403_v11, 16  ;;  %v12743_v54 = vld [vmem:[#allocation68_spill] sm:$0xff]  ;;  %v10473_v11 = vsel %vm1841_vm5, %v1845_v56, %v1846_v40 }
 0x46d   : > { %1801 = vrot.lane.b32.xlu0 %v1740_v10, %s9075_s16  ;;  %v8128_v10 = vld [vmem:[#allocation9 + $0x8] sm:$0xff]  }
 0x46e   : > { %v1513_v17 = vrot.slane %v1511_v7, 7  ;;  %v8386_v26 = vpop.eup %8385  ;;  %v12744_v7 = vld [vmem:[#allocation42_spill] sm:$0xff] }
 0x46f   : > { %v1384_v49 = vmul.f32 %v8386_v26, %v10339_v52 }
 0x470   : > { %v1516_v36 = vor.u32 %v1514_v53, %v1513_v17  ;;  %v10439_v48 = vsel %vm10150_vm6, %v1513_v17, 0  ;;  %v8388_v12 = vpop.eup %8387  ;;  %v1848_v17 = vrot.slane %v12744_v7, 1  ;;  %v12745_v53 = vld [vmem:[#allocation69_spill] sm:$0xff] }
 0x471   : > { %v1385_v28 = vmul.f32 %v8388_v12, %v10346_v2  ;;  %v1773_v35 = vshll.u32 %v10439_v48, 16  ;;  %v1849_v26 = vrot.slane %v12745_v53, 1  ;;  %v1866_v53 = vrot.slane %v10371_v0, 1 }
 0x472   : > { %v10444_v50 = vsel %vm10150_vm6, 0, %v1516_v36 }
 0x473   : > { %v1768_v13 = vshll.u32 %v10444_v50, 16  ;;  %v1402_v16 = vpack.c.bf16 %v1385_v28, %v1384_v49  ;;  %v1766_v18 = vshrl.u32 %v10444_v50, 16  ;;  %v1775_v23 = vrot.slane %v1773_v35, 1  ;;  %v8130_v28 = vld [vmem:[#allocation9 + $0x18] sm:$0xff]  }
 0x474   : > { %v10487_v49 = vsel %vm1841_vm5, %v1848_v17, %v1849_v26  ;;  %v1851_v35 = vrot.slane %v10192_v62, 1  ;;  %v1867_v26 = vrot.slane %v10364_v45, 1 }
 0x475   : > { %v1770_v27 = vrot.slane %v1768_v13, 1  ;;  %v1504_v25 = vshrl.u32 %v1402_v16, 16  ;;  %v1507_v3 = vshll.u32 %v1402_v16, 16  ;;  %v8131_v16 = vld [vmem:[#allocation9 + $0x20] sm:$0xff]  }
 0x477   : > { %v1771_v42 = vor.u32 %v1770_v27, %v1766_v18  ;;  %v1506_v63 = vrot.slane %v1504_v25, 7  ;;  %v12746_v18 = vld [vmem:[#allocation46_spill] sm:$0xff] }
 0x479   : > { %v1776_v52 = vsel %vm1584_vm7, %v1771_v42, %v1775_v23  ;;  %v1509_v55 = vor.u32 %v1507_v3, %v1506_v63  ;;  %v10454_v2 = vsel %vm10150_vm6, %v1506_v63, 0  ;;  %v8132_v42 = vld [vmem:[#allocation9 + $0x28] sm:$0xff]   ;;  %v1854_v63 = vrot.slane %v10253_v57, 1  ;;  %v8133_v3 = vld [vmem:[#allocation9 + $0x30] sm:$0xff]  }
 0x47a   : > { %1807 = vrot.lane.b32.xlu1 %v1776_v52, %s9075_s16  ;;  %v1761_v32 = vshll.u32 %v10454_v2, 16  ;;  %v1855_v52 = vrot.slane %v10244_v22, 1  ;;  %v1857_v22 = vrot.slane %v10235_v8, 1 }
 0x47b   : > { %v10458_v37 = vsel %vm10150_vm6, 0, %v1509_v55 }
 0x47c   : > { %v1756_v44 = vshll.u32 %v10458_v37, 16  ;;  %v1754_v20 = vshrl.u32 %v10458_v37, 16  ;;  %v1763_v1 = vrot.slane %v1761_v32, 1  ;;  %v8134_v32 = vld [vmem:[#allocation9 + $0x38] sm:$0xff]  }
 0x47e   : > { %v1758_v60 = vrot.slane %v1756_v44, 1  ;;  %v10515_v44 = vsel %vm1841_vm5, %v1854_v63, %v1855_v52  ;;  %v1879_v52 = vrot.slane %v10418_v30, 1 }
 0x480   : > { %v1759_v51 = vor.u32 %v1758_v60, %v1754_v20  ;;  %v8135_v60 = vld [vmem:[#allocation9 + $0x40] sm:$0xff]  }
 0x482   : > { %v1764_v21 = vsel %vm1584_vm7, %v1759_v51, %v1763_v1 }
 0x483   : > { %1805 = vrot.lane.b32.xlu0 %v1764_v21, %s9075_s16  ;;  %v8136_v21 = vld [vmem:[#allocation9 + $0x48] sm:$0xff]  }
 0x498   : > { %v1778_v58 = vpop.permute.xlu0 %1777 }
 0x499   : > { %v10469_v33 = vsel %vm781_vm1, %v12743_v54, %v1778_v58  ;;  %v8138_v54 = vld [vmem:[#allocation9 + $0x58] sm:$0xff]  }
 0x49a   : > { %2122 = vmatmul.mubr.bf16.vlgmr.msra.gmra.mrb[4].mxu1 %v10469_v33  ;;  %v1782_v13 = vpop.permute.xlu1 %1781 }
 0x49b   : > { %2409 = vmatpush1.bf16.msra.mxu1 %v8127_v5  ;;  %6605 = vmatprep.mubr.msk.bf16.mxu1 %vm781_vm1, %v10473_v11  ;;  %v10497_v27 = vsel %vm781_vm1, %v12744_v7, %v1782_v13  ;;  %v8137_v5 = vld [vmem:[#allocation9 + $0x50] sm:$0xff]   ;;  %v1864_v7 = vrot.slane %v10294_v14, 1  ;;  %v1870_v13 = vrot.slane %v10325_v31, 1 }
 0x49c   : > { %2410 = vmatprep.subr.bf16.mxu1 %v9076_v29 }
 0x49e   : > { %v1784_v23 = vpop.permute.xlu1 %1783 }
 0x49f   : > { %2411 = vmatpush1.bf16.msra.mxu1 %v8128_v10  ;;  %v10511_v55 = vsel %vm781_vm1, %v10192_v62, %v1784_v23  ;;  %v1858_v62 = vrot.slane %v10231_v24, 1  ;;  %v1860_v24 = vrot.slane %v10318_v9, 1  ;;  %v1876_v23 = vrot.slane %v10379_v46, 1 }
 0x4a0   : > { %2412 = vmatprep.subr.bf16.mxu1 %v9076_v29 }
 0x4a1   : > { %v10529_v1 = vsel %vm1841_vm5, %v1857_v22, %v1858_v62  ;;  %v1882_v22 = vrot.slane %v10403_v34, 1  ;;  %v1884_v62 = vrot.slane %v10458_v37, 1 }
 0x4a2   : > { %v1780_v36 = vpop.permute.xlu0 %1779 }
 0x4a3   : > { %v10483_v12 = vsel %vm781_vm1, %v10218_v38, %v1780_v36  ;;  %2413 = vmatpush1.bf16.msra.mxu1 %v8129_v15  ;;  %v1852_v38 = vrot.slane %v12746_v18, 1  ;;  %v1873_v18 = vrot.slane %v10392_v59, 1 }
 0x4a4   : > { %2130 = vmatmul.mubr.bf16.gmra.mrb[8].mxu1 %v10483_v12  ;;  %2414 = vmatprep.subr.bf16.mxu1 %v9076_v29 }
 0x4a5   : > { %6606 = vmatprep.mubr.msk.bf16.mxu1 %vm781_vm1, %v10487_v49  ;;  %v10501_v25 = vsel %vm1841_vm5, %v1851_v35, %v1852_v38 }
 0x4a7   : > { %2415 = vmatpush1.bf16.msra.mxu1 %v8130_v28  ;;  %v1869_v28 = vrot.slane %v10332_v41, 1 }
 0x4a8   : > { %2416 = vmatprep.subr.bf16.mxu1 %v9076_v29  ;;  %v1788_v56 = vpop.permute.xlu1 %1787 }
 0x4a9   : > { %v10539_v58 = vsel %vm781_vm1, %v10235_v8, %v1788_v56 }
 0x4ab   : > { %2417 = vmatpush1.bf16.msra.mxu1 %v8131_v16  ;;  %v1872_v16 = vrot.slane %v10399_v6, 1 }
 0x4ac   : > { %2138 = vmatmul.mubr.bf16.gmra.mrb[12].mxu1 %v10497_v27  ;;  %2418 = vmatprep.subr.bf16.mxu1 %v9076_v29  ;;  %v1786_v20 = vpop.permute.xlu0 %1785 }
 0x4ad   : > { %6607 = vmatprep.mubr.msk.bf16.mxu1 %vm781_vm1, %v10501_v25  ;;  %v10525_v51 = vsel %vm781_vm1, %v10253_v57, %v1786_v20  ;;  %v1861_v57 = vrot.slane %v10314_v4, 1  ;;  %v1863_v4 = vrot.slane %v10306_v61, 1  ;;  %v1881_v20 = vrot.slane %v10409_v43, 1 }
 0x4af   : > { %2419 = vmatpush1.bf16.msra.mxu1 %v8132_v42  ;;  %v10543_v40 = vsel %vm1841_vm5, %v1860_v24, %v1861_v57  ;;  %v10557_v17 = vsel %vm1841_vm5, %v1863_v4, %v1864_v7  ;;  %v1875_v42 = vrot.slane %v10384_v19, 1  ;;  %v1887_v24 = vrot.slane %v10444_v50, 1  ;;  %v8141_v4 = vld [vmem:[#allocation9 + $0xd0] sm:$0xff]   ;;  %v8144_v7 = vld [vmem:[#allocation9 + $0xe8] sm:$0xff]  }
 0x4b0   : > { %2420 = vmatprep.subr.bf16.mxu1 %v9076_v29 }
 0x4b3   : > { %2421 = vmatpush1.bf16.msra.mxu1 %v8133_v3  ;;  %v1878_v3 = vrot.slane %v10424_v47, 1 }
 0x4b4   : > { %2146 = vmatmul.mubr.bf16.gmra.mrb[16].mxu1 %v10511_v55  ;;  %2422 = vmatprep.subr.bf16.mxu1 %v9076_v29 }
 0x4b5   : > { %6608 = vmatprep.mubr.msk.bf16.mxu1 %vm781_vm1, %v10515_v44 }
 0x4b7   : > { %2423 = vmatpush1.bf16.msra.mxu1 %v8134_v32 }
 0x4b8   : > { %2424 = vmatprep.subr.bf16.mxu1 %v9076_v29 }
 0x4b9   : > { %v1792_v15 = vpop.permute.xlu1 %1791 }
 0x4ba   : > { %v10565_v14 = vsel %vm781_vm1, %v10306_v61, %v1792_v15  ;;  %v10581_v61 = vsel %vm1841_vm5, %v1869_v28, %v1870_v13  ;;  %v8145_v15 = vld [vmem:[#allocation9 + $0xf0] sm:$0xff]   ;;  %v8150_v13 = vld [vmem:[#allocation9 + $0x118] sm:$0xff]  }
 0x4bb   : > { %2425 = vmatpush1.bf16.msra.mxu1 %v8135_v60  ;;  %v8149_v28 = vld [vmem:[#allocation9 + $0x110] sm:$0xff]  }
 0x4bc   : > { %2154 = vmatmul.mubr.bf16.gmra.mrb[20].mxu1 %v10525_v51  ;;  %2426 = vmatprep.subr.bf16.mxu1 %v9076_v29 }
 0x4bd   : > { %6609 = vmatprep.mubr.msk.bf16.mxu1 %vm781_vm1, %v10529_v1  ;;  %v1790_v10 = vpop.permute.xlu0 %1789 }
 0x4be   : > { %v10553_v8 = vsel %vm781_vm1, %v10318_v9, %v1790_v10  ;;  %v10569_v9 = vsel %vm1841_vm5, %v1866_v53, %v1867_v26  ;;  %v8140_v10 = vld [vmem:[#allocation9 + $0xc8] sm:$0xff]   ;;  %v8146_v53 = vld [vmem:[#allocation9 + $0xf8] sm:$0xff]   ;;  %v8147_v26 = vld [vmem:[#allocation9 + $0x100] sm:$0xff]  }
 0x4bf   : > { %2427 = vmatpush1.bf16.msra.mxu1 %v8136_v21  ;;  %v1885_v21 = vrot.slane %v10454_v2, 1 }
 0x4c0   : > { %2428 = vmatprep.subr.bf16.mxu1 %v9076_v29  ;;  %v1796_v35 = vpop.permute.xlu1 %1795 }
 0x4c1   : > { %v10589_v31 = vsel %vm781_vm1, %v10332_v41, %v1796_v35  ;;  %v10605_v41 = vsel %vm1841_vm5, %v1875_v42, %v1876_v23  ;;  %v3004_v35 = vld [vmem:[#allocation21 + $0x48] sm:$0xff]  ;;  %v3005_v42 = vld [vmem:[#allocation21 + $0x50] sm:$0xff]  ;;  %v3006_v23 = vld [vmem:[#allocation21 + $0x58] sm:$0xff] }
 0x4c3   : > { %2429 = vmatpush1.bf16.msra.mxu1 %v8137_v5  ;;  %v1888_v5 = vrot.slane %v10439_v48, 1  ;;  %v12747_v48 = vld [vmem:[#allocation45_spill] sm:$0xff] }
 0x4c4   : > { %2162 = vmatmul.mubr.bf16.gmra.mrb[24].mxu1 %v10539_v58  ;;  %2430 = vmatprep.subr.bf16.mxu1 %v9076_v29 }
 0x4c5   : > { %6610 = vmatprep.mubr.msk.bf16.mxu1 %vm781_vm1, %v10543_v40 }
 0x4c7   : > { %2431 = vmatpush1.bf16.msra.mxu1 %v8138_v54 }
 0x4c8   : > { %2748 = vmatprep.subr.bf16.mxu1 %v9076_v29 }
 0x4cc   : > { %2170 = vmatmul.mubr.bf16.gmra.mrb[28].mxu1 %v10553_v8 }
 0x4cd   : > { %6611 = vmatprep.mubr.msk.bf16.mxu1 %vm781_vm1, %v10557_v17 }
 0x4d0   : > { %v1794_v36 = vpop.permute.xlu0 %1793 }
 0x4d1   : > { %v10577_v45 = vsel %vm781_vm1, %v10371_v0, %v1794_v36  ;;  %v10593_v0 = vsel %vm1841_vm5, %v1872_v16, %v1873_v18  ;;  %v8148_v36 = vld [vmem:[#allocation9 + $0x108] sm:$0xff]  }
 0x4d4   : > { %2178 = vmatmul.mubr.bf16.gmra.mrb[32].mxu1 %v10565_v14 }
 0x4d5   : > { %6612 = vmatprep.mubr.msk.bf16.mxu1 %vm781_vm1, %v10569_v9  ;;  %v1800_v63 = vpop.permute.xlu1 %1799 }
 0x4d6   : > { %v10613_v46 = vsel %vm781_vm1, %v10384_v19, %v1800_v63  ;;  %v10629_v19 = vsel %vm1841_vm5, %v1881_v20, %v1882_v22  ;;  %v3008_v63 = vld [vmem:[#allocation21 + $0x68] sm:$0xff]  ;;  %v3009_v20 = vld [vmem:[#allocation21 + $0x70] sm:$0xff]  ;;  %v3010_v22 = vld [vmem:[#allocation21 + $0x78] sm:$0xff] }
 0x4d8   : > { %v1798_v38 = vpop.permute.xlu0 %1797 }
 0x4d9   : > { %v10601_v59 = vsel %vm781_vm1, %v10399_v6, %v1798_v38  ;;  %v10617_v6 = vsel %vm1841_vm5, %v1878_v3, %v1879_v52 }
 0x4da   : > { %v1804_v60 = vpop.permute.xlu1 %1803 }
 0x4db   : > { %v10637_v34 = vsel %vm781_vm1, %v10409_v43, %v1804_v60  ;;  %v10653_v43 = vsel %vm1841_vm5, %v1887_v24, %v1888_v5  ;;  %v10775_v5 = vld [vmem:[#allocation11] ss:$0 sm:$0xff] }
 0x4dc   : > { %2186 = vmatmul.mubr.bf16.gmra.mrb[36].mxu1 %v10577_v45 }
 0x4dd   : > { %6613 = vmatprep.mubr.msk.bf16.mxu1 %vm781_vm1, %v10581_v61 }
 0x4df   : > { %v1802_v32 = vpop.permute.xlu0 %1801 }
 0x4e0   : > { %v10625_v30 = vsel %vm781_vm1, %v10424_v47, %v1802_v32  ;;  %v10641_v47 = vsel %vm1841_vm5, %v1884_v62, %v1885_v21 }
 0x4e4   : > { %2194 = vmatmul.mubr.bf16.gmra.mrb[40].mxu1 %v10589_v31 }
 0x4e5   : > { %6614 = vmatprep.mubr.msk.bf16.mxu1 %vm781_vm1, %v10593_v0 }
 0x4ec   : > { %2202 = vmatmul.mubr.bf16.gmra.mrb[44].mxu1 %v10601_v59  ;;  %v1808_v57 = vpop.permute.xlu1 %1807 }
 0x4ed   : > { %6615 = vmatprep.mubr.msk.bf16.mxu1 %vm781_vm1, %v10605_v41  ;;  %v10659_v54 = vsel %vm781_vm1, %v10444_v50, %v1808_v57  ;;  %v8142_v50 = vld [vmem:[#allocation9 + $0xd8] sm:$0xff]  }
 0x4f4   : > { %2210 = vmatmul.mubr.bf16.gmra.mrb[48].mxu1 %v10613_v46 }
 0x4f5   : > { %6616 = vmatprep.mubr.msk.bf16.mxu1 %vm781_vm1, %v10617_v6  ;;  %v1806_v56 = vpop.permute.xlu0 %1805 }
 0x4f6   : > { %v10649_v2 = vsel %vm781_vm1, %v10458_v37, %v1806_v56  ;;  %v8139_v37 = vld [vmem:[#allocation9 + $0xc0] sm:$0xff]  }
 0x4fc   : > { %2218 = vmatmul.mubr.bf16.gmra.mrb[52].mxu1 %v10625_v30 }
 0x4fd   : > { %6617 = vmatprep.mubr.msk.bf16.mxu1 %vm781_vm1, %v10629_v19 }
 0x504   : > { %2226 = vmatmul.mubr.bf16.gmra.mrb[56].mxu1 %v10637_v34 }
 0x505   : > { %6618 = vmatprep.mubr.msk.bf16.mxu1 %vm781_vm1, %v10641_v47 }
 0x50c   : > { %2234 = vmatmul.mubr.bf16.gmra.mrb[60].mxu1 %v10649_v2 }
 0x50d   : > { %6619 = vmatprep.mubr.msk.bf16.mxu1 %vm781_vm1, %v10653_v43 }
 0x514   : > { %2242 = vmatmul.mubr.bf16.gmra.mrb[64].mxu1 %v10659_v54 }
 0x515   : > { %6632 = vmatprep.mubr.msk.bf16.mxu1 %vm781_vm1, %v12747_v48 }
 0x51c   : > { %2441 = vmatmul.mubr.bf16.vlgmr.msra.gmra.mrb[8].mxu1 %v10469_v33  ;;  %v8143_v33 = vld [vmem:[#allocation9 + $0xe0] sm:$0xff]  }
 0x51d   : > { %2749 = vmatpush1.bf16.msra.mxu1 %v8139_v37  ;;  %6633 = vmatprep.mubr.msk.bf16.mxu1 %vm781_vm1, %v10473_v11 }
 0x51e   : > { %2750 = vmatprep.subr.bf16.mxu1 %v9076_v29 }
 0x521   : > { %2751 = vmatpush1.bf16.msra.mxu1 %v8140_v10 }
 0x522   : > { %2752 = vmatprep.subr.bf16.mxu1 %v9076_v29 }
 0x524   : > { %2449 = vmatmul.mubr.bf16.gmra.mrb[12].mxu1 %v10483_v12 }
 0x525   : > { %6634 = vmatprep.mubr.msk.bf16.mxu1 %vm781_vm1, %v10487_v49  ;;  %2753 = vmatpush1.bf16.msra.mxu1 %v8141_v4 }
 0x526   : > { %2754 = vmatprep.subr.bf16.mxu1 %v9076_v29 }
 0x529   : > { %2755 = vmatpush1.bf16.msra.mxu1 %v8142_v50 }
 0x52a   : > { %2756 = vmatprep.subr.bf16.mxu1 %v9076_v29 }
 0x52c   : > { %2457 = vmatmul.mubr.bf16.gmra.mrb[16].mxu1 %v10497_v27 }
 0x52d   : > { %6635 = vmatprep.mubr.msk.bf16.mxu1 %vm781_vm1, %v10501_v25  ;;  %2757 = vmatpush1.bf16.msra.mxu1 %v8143_v33 }
 0x52e   : > { %2758 = vmatprep.subr.bf16.mxu1 %v9076_v29 }
 0x531   : > { %2759 = vmatpush1.bf16.msra.mxu1 %v8144_v7 }
 0x532   : > { %2760 = vmatprep.subr.bf16.mxu1 %v9076_v29 }
 0x534   : > { %2465 = vmatmul.mubr.bf16.gmra.mrb[20].mxu1 %v10511_v55 }
 0x535   : > { %6636 = vmatprep.mubr.msk.bf16.mxu1 %vm781_vm1, %v10515_v44  ;;  %2761 = vmatpush1.bf16.msra.mxu1 %v8145_v15 }
 0x536   : > { %2762 = vmatprep.subr.bf16.mxu1 %v9076_v29 }
 0x539   : > { %2763 = vmatpush1.bf16.msra.mxu1 %v8146_v53 }
 0x53a   : > { %2764 = vmatprep.subr.bf16.mxu1 %v9076_v29 }
 0x53c   : > { %2473 = vmatmul.mubr.bf16.gmra.mrb[24].mxu1 %v10525_v51 }
 0x53d   : > { %6637 = vmatprep.mubr.msk.bf16.mxu1 %vm781_vm1, %v10529_v1  ;;  %2765 = vmatpush1.bf16.msra.mxu1 %v8147_v26 }
 0x53e   : > { %2766 = vmatprep.subr.bf16.mxu1 %v9076_v29 }
 0x541   : > { %2767 = vmatpush1.bf16.msra.mxu1 %v8148_v36 }
 0x542   : > { %2768 = vmatprep.subr.bf16.mxu1 %v9076_v29 }
 0x544   : > { %2481 = vmatmul.mubr.bf16.gmra.mrb[28].mxu1 %v10539_v58 }
 0x545   : > { %6638 = vmatprep.mubr.msk.bf16.mxu1 %vm781_vm1, %v10543_v40  ;;  %2769 = vmatpush1.bf16.msra.mxu1 %v8149_v28 }
 0x546   : > { %2770 = vmatprep.subr.bf16.mxu1 %v9076_v29  ;;  %v2995_v29 = vld [vmem:[#allocation21] sm:$0xff] }
 0x549   : > { %2771 = vmatpush1.bf16.msra.mxu1 %v8150_v13 }
 0x54c   : > { %2489 = vmatmul.mubr.bf16.gmra.mrb[32].mxu1 %v10553_v8 }
 0x54d   : > { %6639 = vmatprep.mubr.msk.bf16.mxu1 %vm781_vm1, %v10557_v17 }
 0x554   : > { %2497 = vmatmul.mubr.bf16.gmra.mrb[36].mxu1 %v10565_v14 }
 0x555   : > { %6640 = vmatprep.mubr.msk.bf16.mxu1 %vm781_vm1, %v10569_v9 }
 0x55c   : > { %2505 = vmatmul.mubr.bf16.gmra.mrb[40].mxu1 %v10577_v45 }
 0x55d   : > { %6641 = vmatprep.mubr.msk.bf16.mxu1 %vm781_vm1, %v10581_v61 }
 0x564   : > { %2513 = vmatmul.mubr.bf16.gmra.mrb[44].mxu1 %v10589_v31 }
 0x565   : > { %6642 = vmatprep.mubr.msk.bf16.mxu1 %vm781_vm1, %v10593_v0 }
 0x56c   : > { %2521 = vmatmul.mubr.bf16.gmra.mrb[48].mxu1 %v10601_v59 }
 0x56d   : > { %6643 = vmatprep.mubr.msk.bf16.mxu1 %vm781_vm1, %v10605_v41 }
 0x574   : > { %2529 = vmatmul.mubr.bf16.gmra.mrb[52].mxu1 %v10613_v46 }
 0x575   : > { %6644 = vmatprep.mubr.msk.bf16.mxu1 %vm781_vm1, %v10617_v6 }
 0x57c   : > { %2537 = vmatmul.mubr.bf16.gmra.mrb[56].mxu1 %v10625_v30 }
 0x57d   : > { %6645 = vmatprep.mubr.msk.bf16.mxu1 %vm781_vm1, %v10629_v19 }
 0x584   : > { %2545 = vmatmul.mubr.bf16.gmra.mrb[60].mxu1 %v10637_v34 }
 0x585   : > { %6646 = vmatprep.mubr.msk.bf16.mxu1 %vm781_vm1, %v10641_v47 }
 0x58c   : > { %2553 = vmatmul.mubr.bf16.gmra.mrb[64].mxu1 %v10649_v2 }
 0x58d   : > { %6659 = vmatprep.mubr.msk.bf16.mxu1 %vm781_vm1, %v10473_v11  ;;  %v2996_v11 = vld [vmem:[#allocation21 + $0x8] sm:$0xff] }
 0x594   : > { %2781 = vmatmul.mubr.bf16.vlgmr.msra.gmra.mrb[4].mxu1 %v10483_v12  ;;  %v2997_v12 = vld [vmem:[#allocation21 + $0x10] sm:$0xff] }
 0x595   : > { %6660 = vmatprep.mubr.msk.bf16.mxu1 %vm781_vm1, %v10487_v49  ;;  %v7737_v49 = vpack.c.bf16 %v2996_v11, %v2995_v29 }
 0x597   : > { %7738 = vmatpush3.bf16.msra.mxu0 %v7737_v49 }
 0x59c   : > { %2789 = vmatmul.mubr.bf16.gmra.mrb[8].mxu1 %v10497_v27  ;;  %v2998_v27 = vld [vmem:[#allocation21 + $0x18] sm:$0xff] }
 0x59d   : > { %6661 = vmatprep.mubr.msk.bf16.mxu1 %vm781_vm1, %v10501_v25  ;;  %v7740_v25 = vpack.c.bf16 %v2998_v27, %v2997_v12 }
 0x5a4   : > { %2797 = vmatmul.mubr.bf16.gmra.mrb[12].mxu1 %v10511_v55  ;;  %v12748_v55 = vmov 0.0|0.0  }
 0x5a5   : > { %6662 = vmatprep.mubr.msk.bf16.mxu1 %vm781_vm1, %v10515_v44  ;;  %7739 = vmatprep.subr.bf16.mxu0 %v12748_v55 }
 0x5a6   : > { %7741 = vmatpush3.bf16.msra.mxu0 %v7740_v25 }
 0x5a7   : > { %7742 = vmatprep.subr.bf16.mxu0 %v12748_v55 }
 0x5ac   : > { %2805 = vmatmul.mubr.bf16.gmra.mrb[16].mxu1 %v10525_v51 }
 0x5ad   : > { %6663 = vmatprep.mubr.msk.bf16.mxu1 %vm781_vm1, %v10529_v1 }
 0x5b4   : > { %2813 = vmatmul.mubr.bf16.gmra.mrb[20].mxu1 %v10539_v58 }
 0x5b5   : > { %6664 = vmatprep.mubr.msk.bf16.mxu1 %vm781_vm1, %v10543_v40  ;;  %v2999_v40 = vld [vmem:[#allocation21 + $0x20] sm:$0xff] }
 0x5bc   : > { %2821 = vmatmul.mubr.bf16.gmra.mrb[24].mxu1 %v10553_v8  ;;  %v3000_v8 = vld [vmem:[#allocation21 + $0x28] sm:$0xff] }
 0x5bd   : > { %6665 = vmatprep.mubr.msk.bf16.mxu1 %vm781_vm1, %v10557_v17  ;;  %v3001_v17 = vld [vmem:[#allocation21 + $0x30] sm:$0xff] }
 0x5c4   : > { %2829 = vmatmul.mubr.bf16.gmra.mrb[28].mxu1 %v10565_v14  ;;  %v7743_v14 = vpack.c.bf16 %v3000_v8, %v2999_v40 }
 0x5c5   : > { %6666 = vmatprep.mubr.msk.bf16.mxu1 %vm781_vm1, %v10569_v9  ;;  %v3002_v9 = vld [vmem:[#allocation21 + $0x38] sm:$0xff] }
 0x5c6   : > { %7744 = vmatpush3.bf16.msra.mxu0 %v7743_v14 }
 0x5c7   : > { %7745 = vmatprep.subr.bf16.mxu0 %v12748_v55 }
 0x5cc   : > { %2837 = vmatmul.mubr.bf16.gmra.mrb[32].mxu1 %v10577_v45  ;;  %v7746_v45 = vpack.c.bf16 %v3002_v9, %v3001_v17 }
 0x5cd   : > { %6667 = vmatprep.mubr.msk.bf16.mxu1 %vm781_vm1, %v10581_v61  ;;  %v3003_v61 = vld [vmem:[#allocation21 + $0x40] sm:$0xff] }
 0x5ce   : > { %7747 = vmatpush3.bf16.msra.mxu0 %v7746_v45 }
 0x5cf   : > { %7748 = vmatprep.subr.bf16.mxu0 %v12748_v55 }
 0x5d4   : > { %2845 = vmatmul.mubr.bf16.gmra.mrb[36].mxu1 %v10589_v31 }
 0x5d5   : > { %6668 = vmatprep.mubr.msk.bf16.mxu1 %vm781_vm1, %v10593_v0  ;;  %v7749_v0 = vpack.c.bf16 %v3004_v35, %v3003_v61 }
 0x5d7   : > { %7750 = vmatpush3.bf16.msra.mxu0 %v7749_v0 }
 0x5d8   : > { %7751 = vmatprep.subr.bf16.mxu0 %v12748_v55 }
 0x5dc   : > { %2853 = vmatmul.mubr.bf16.gmra.mrb[40].mxu1 %v10601_v59  ;;  %v7752_v59 = vpack.c.bf16 %v3006_v23, %v3005_v42 }
 0x5dd   : > { %6669 = vmatprep.mubr.msk.bf16.mxu1 %vm781_vm1, %v10605_v41  ;;  %v3007_v41 = vld [vmem:[#allocation21 + $0x60] sm:$0xff] }
 0x5de   : > { %7753 = vmatpush3.bf16.msra.mxu0 %v7752_v59 }
 0x5df   : > { %7754 = vmatprep.subr.bf16.mxu0 %v12748_v55 }
 0x5e4   : > { %2861 = vmatmul.mubr.bf16.gmra.mrb[44].mxu1 %v10613_v46 }
 0x5e5   : > { %6670 = vmatprep.mubr.msk.bf16.mxu1 %vm781_vm1, %v10617_v6  ;;  %v7755_v6 = vpack.c.bf16 %v3008_v63, %v3007_v41 }
 0x5e7   : > { %7756 = vmatpush3.bf16.msra.mxu0 %v7755_v6 }
 0x5e8   : > { %7757 = vmatprep.subr.bf16.mxu0 %v12748_v55 }
 0x5ec   : > { %2869 = vmatmul.mubr.bf16.gmra.mrb[48].mxu1 %v10625_v30  ;;  %v7758_v30 = vpack.c.bf16 %v3010_v22, %v3009_v20 }
 0x5ed   : > { %6671 = vmatprep.mubr.msk.bf16.mxu1 %vm781_vm1, %v10629_v19 }
 0x5ee   : > { %7759 = vmatpush3.bf16.msra.mxu0 %v7758_v30 }
 0x5ef   : > { %7760 = vmatprep.subr.bf16.mxu0 %v12748_v55 }
 0x5f4   : > { %2877 = vmatmul.mubr.bf16.gmra.mrb[52].mxu1 %v10637_v34 }
 0x5f5   : > { %6672 = vmatprep.mubr.msk.bf16.mxu1 %vm781_vm1, %v10641_v47 }
 0x5fc   : > { %2885 = vmatmul.mubr.bf16.gmra.mrb[56].mxu1 %v10649_v2 }
 0x5fd   : > { %6673 = vmatprep.mubr.msk.bf16.mxu1 %vm781_vm1, %v10653_v43 }
 0x604   : > { %2893 = vmatmul.mubr.bf16.gmra.mrb[60].mxu1 %v10659_v54 }
 0x65f   : > { %v10765_v44 = vpop.f32.mrb[64].mxu1 }
 0x660   : > { %v2556_v51 = vpop.f32.mrb[65].mxu1 }
 0x661   : > { %v10767_v1 = vpop.f32.mrb[66].mxu1 }
 0x662   : > { %v2559_v58 = vpop.f32.mrb[67].mxu1 }
 0x667   : > { %v2782_v16 = vpop.f32.mrb[4].mxu1 }
 0x668   : > { %v2784_v18 = vpop.f32.mrb[5].mxu1  ;;  %v10781_v43 = vadd.f32 %v10775_v5, %v2782_v16 }
 0x669   : > { %v2785_v31 = vpop.f32.mrb[6].mxu1 }
 0x66a   : > { %v2787_v38 = vpop.f32.mrb[7].mxu1  ;;  %v10778_v2 = vadd.f32 %v10775_v5, %v2785_v31  ;;  %v3052_v4 = vmul.f32 %v10781_v43, %v10781_v43 }
 0x66c   : > { %v3053_v48 = vmul.f32 %v10778_v2, %v10778_v2  ;;  %v3015_v50 = vadd.f32 %v10778_v2, %v10781_v43 }
 0x66e   : > { %v3084_v53 = vadd.f32 %v3053_v48, %v3052_v4 }
 0x66f   : > { %v2790_v3 = vpop.f32.mrb[8].mxu1 }
 0x670   : > { %v2792_v52 = vpop.f32.mrb[9].mxu1  ;;  %v10784_v57 = vadd.f32 %v10775_v5, %v2790_v3 }
 0x671   : > { %v2793_v46 = vpop.f32.mrb[10].mxu1 }
 0x672   : > { %v2795_v32 = vpop.f32.mrb[11].mxu1  ;;  %v3054_v33 = vmul.f32 %v10784_v57, %v10784_v57  ;;  %v10795_v7 = vadd.f32 %v10775_v5, %v2793_v46  ;;  %v3016_v26 = vadd.f32 %v10784_v57, %v3015_v50 }
 0x674   : > { %v3085_v28 = vadd.f32 %v3084_v53, %v3054_v33  ;;  %v3055_v13 = vmul.f32 %v10795_v7, %v10795_v7  ;;  %v3017_v11 = vadd.f32 %v10795_v7, %v3016_v26 }
 0x676   : > { %v3086_v51 = vadd.f32 %v3085_v28, %v3055_v13 }
 0x677   : > { %v2798_v19 = vpop.f32.mrb[12].mxu1 }
 0x678   : > { %v2800_v60 = vpop.f32.mrb[13].mxu1  ;;  %v10799_v36 = vadd.f32 %v10775_v5, %v2798_v19 }
 0x679   : > { %v2801_v62 = vpop.f32.mrb[14].mxu1 }
 0x67a   : > { %v2803_v21 = vpop.f32.mrb[15].mxu1  ;;  %v3056_v12 = vmul.f32 %v10799_v36, %v10799_v36  ;;  %v10807_v49 = vadd.f32 %v10775_v5, %v2801_v62  ;;  %v3018_v58 = vadd.f32 %v10799_v36, %v3017_v11 }
 0x67c   : > { %v3087_v17 = vadd.f32 %v3086_v51, %v3056_v12  ;;  %v3057_v14 = vmul.f32 %v10807_v49, %v10807_v49  ;;  %v3019_v9 = vadd.f32 %v10807_v49, %v3018_v58 }
 0x67e   : > { %v3088_v16 = vadd.f32 %v3087_v17, %v3057_v14 }
 0x67f   : > { %v2806_v34 = vpop.f32.mrb[16].mxu1 }
 0x680   : > { %v2808_v47 = vpop.f32.mrb[17].mxu1  ;;  %v10811_v40 = vadd.f32 %v10775_v5, %v2806_v34 }
 0x681   : > { %v2809_v56 = vpop.f32.mrb[18].mxu1 }
 0x682   : > { %v2811_v24 = vpop.f32.mrb[19].mxu1  ;;  %v3058_v45 = vmul.f32 %v10811_v40, %v10811_v40  ;;  %v10819_v61 = vadd.f32 %v10775_v5, %v2809_v56  ;;  %v3020_v18 = vadd.f32 %v10811_v40, %v3019_v9 }
 0x684   : > { %v3089_v42 = vadd.f32 %v3088_v16, %v3058_v45  ;;  %v3059_v23 = vmul.f32 %v10819_v61, %v10819_v61  ;;  %v3021_v41 = vadd.f32 %v10819_v61, %v3020_v18 }
 0x686   : > { %v3090_v52 = vadd.f32 %v3089_v42, %v3059_v23 }
 0x687   : > { %v2814_v54 = vpop.f32.mrb[20].mxu1 }
 0x688   : > { %v2816_v37 = vpop.f32.mrb[21].mxu1  ;;  %v10823_v31 = vadd.f32 %v10775_v5, %v2814_v54 }
 0x689   : > { %v2817_v10 = vpop.f32.mrb[22].mxu1 }
 0x68a   : > { %v2819_v15 = vpop.f32.mrb[23].mxu1  ;;  %v3060_v63 = vmul.f32 %v10823_v31, %v10823_v31  ;;  %v10831_v3 = vadd.f32 %v10775_v5, %v2817_v10  ;;  %v3022_v46 = vadd.f32 %v10823_v31, %v3021_v41 }
 0x68c   : > { %v3091_v20 = vadd.f32 %v3090_v52, %v3060_v63  ;;  %v3061_v22 = vmul.f32 %v10831_v3, %v10831_v3  ;;  %v3023_v60 = vadd.f32 %v10831_v3, %v3022_v46 }
 0x68e   : > { %v3092_v47 = vadd.f32 %v3091_v20, %v3061_v22 }
 0x68f   : > { %v2822_v29 = vpop.f32.mrb[24].mxu1 }
 0x690   : > { %v2824_v27 = vpop.f32.mrb[25].mxu1  ;;  %v10835_v6 = vadd.f32 %v10775_v5, %v2822_v29 }
 0x691   : > { %v2825_v25 = vpop.f32.mrb[26].mxu1 }
 0x692   : > { %v2827_v8 = vpop.f32.mrb[27].mxu1  ;;  %v3062_v62 = vmul.f32 %v10835_v6, %v10835_v6  ;;  %v10843_v21 = vadd.f32 %v10775_v5, %v2825_v25  ;;  %v3024_v56 = vadd.f32 %v10835_v6, %v3023_v60 }
 0x694   : > { %v3093_v54 = vadd.f32 %v3092_v47, %v3062_v62  ;;  %v3063_v48 = vmul.f32 %v10843_v21, %v10843_v21  ;;  %v3025_v10 = vadd.f32 %v10843_v21, %v3024_v56 }
 0x696   : > { %v3094_v53 = vadd.f32 %v3093_v54, %v3063_v48 }
 0x697   : > { %v2830_v35 = vpop.f32.mrb[28].mxu1 }
 0x698   : > { %v2832_v0 = vpop.f32.mrb[29].mxu1  ;;  %v10847_v24 = vadd.f32 %v10775_v5, %v2830_v35 }
 0x699   : > { %v2833_v38 = vpop.f32.mrb[30].mxu1 }
 0x69a   : > { %v2835_v59 = vpop.f32.mrb[31].mxu1  ;;  %v3064_v4 = vmul.f32 %v10847_v24, %v10847_v24  ;;  %v10855_v50 = vadd.f32 %v10775_v5, %v2833_v38  ;;  %v3026_v26 = vadd.f32 %v10847_v24, %v3025_v10 }
 0x69c   : > { %v3095_v29 = vadd.f32 %v3094_v53, %v3064_v4  ;;  %v3065_v11 = vmul.f32 %v10855_v50, %v10855_v50  ;;  %v3027_v12 = vadd.f32 %v10855_v50, %v3026_v26 }
 0x69e   : > { %v3096_v58 = vadd.f32 %v3095_v29, %v3065_v11 }
 0x69f   : > { %v2838_v32 = vpop.f32.mrb[32].mxu1 }
 0x6a0   : > { %v2840_v30 = vpop.f32.mrb[33].mxu1  ;;  %v10859_v28 = vadd.f32 %v10775_v5, %v2838_v32 }
 0x6a1   : > { %v2841_v19 = vpop.f32.mrb[34].mxu1 }
 0x6a2   : > { %v2843_v34 = vpop.f32.mrb[35].mxu1  ;;  %v3066_v27 = vmul.f32 %v10859_v28, %v10859_v28  ;;  %v10867_v25 = vadd.f32 %v10775_v5, %v2841_v19  ;;  %v3028_v8 = vadd.f32 %v10859_v28, %v3027_v12 }
 0x6a4   : > { %v3097_v45 = vadd.f32 %v3096_v58, %v3066_v27  ;;  %v3067_v35 = vmul.f32 %v10867_v25, %v10867_v25  ;;  %v3029_v18 = vadd.f32 %v10867_v25, %v3028_v8 }
 0x6a6   : > { %v3098_v42 = vadd.f32 %v3097_v45, %v3067_v35 }
 0x6a7   : > { %v2846_v37 = vpop.f32.mrb[36].mxu1 }
 0x6a8   : > { %v2848_v33 = vpop.f32.mrb[37].mxu1  ;;  %v10871_v17 = vadd.f32 %v10775_v5, %v2846_v37 }
 0x6a9   : > { %v2849_v15 = vpop.f32.mrb[38].mxu1 }
 0x6aa   : > { %v2851_v13 = vpop.f32.mrb[39].mxu1  ;;  %v3068_v0 = vmul.f32 %v10871_v17, %v10871_v17  ;;  %v10879_v38 = vadd.f32 %v10775_v5, %v2849_v15  ;;  %v3030_v23 = vadd.f32 %v10871_v17, %v3029_v18 }
 0x6ac   : > { %v3099_v63 = vadd.f32 %v3098_v42, %v3068_v0  ;;  %v3069_v52 = vmul.f32 %v10879_v38, %v10879_v38  ;;  %v3031_v20 = vadd.f32 %v10879_v38, %v3030_v23 }
 0x6ae   : > { %v3100_v60 = vadd.f32 %v3099_v63, %v3069_v52 }
 0x6af   : > { %v2854_v51 = vpop.f32.mrb[40].mxu1 }
 0x6b0   : > { %v2856_v14 = vpop.f32.mrb[41].mxu1  ;;  %v10883_v59 = vadd.f32 %v10775_v5, %v2854_v51 }
 0x6b1   : > { %v2857_v9 = vpop.f32.mrb[42].mxu1 }
 0x6b2   : > { %v2859_v16 = vpop.f32.mrb[43].mxu1  ;;  %v3070_v22 = vmul.f32 %v10883_v59, %v10883_v59  ;;  %v10891_v30 = vadd.f32 %v10775_v5, %v2857_v9  ;;  %v3032_v62 = vadd.f32 %v10883_v59, %v3031_v20 }
 0x6b4   : > { %v3101_v47 = vadd.f32 %v3100_v60, %v3070_v22  ;;  %v3071_v56 = vmul.f32 %v10891_v30, %v10891_v30  ;;  %v3033_v48 = vadd.f32 %v10891_v30, %v3032_v62 }
 0x6b6   : > { %v3102_v15 = vadd.f32 %v3101_v47, %v3071_v56 }
 0x6b7   : > { %v2862_v41 = vpop.f32.mrb[44].mxu1 }
 0x6b8   : > { %v2864_v46 = vpop.f32.mrb[45].mxu1  ;;  %v10895_v34 = vadd.f32 %v10775_v5, %v2862_v41 }
 0x6b9   : > { %v2865_v32 = vpop.f32.mrb[46].mxu1 }
 0x6ba   : > { %v2867_v19 = vpop.f32.mrb[47].mxu1  ;;  %v3072_v37 = vmul.f32 %v10895_v34, %v10895_v34  ;;  %v10903_v10 = vadd.f32 %v10775_v5, %v2865_v32  ;;  %v3034_v53 = vadd.f32 %v10895_v34, %v3033_v48 }
 0x6bc   : > { %v3103_v29 = vadd.f32 %v3102_v15, %v3072_v37  ;;  %v3073_v11 = vmul.f32 %v10903_v10, %v10903_v10  ;;  %v3035_v12 = vadd.f32 %v10903_v10, %v3034_v53 }
 0x6be   : > { %v3104_v8 = vadd.f32 %v3103_v29, %v3073_v11  ;;  %v10950_v11 = vadd.f32 %v10775_v5, %v10765_v44 }
 0x6bf   : > { %v2870_v54 = vpop.f32.mrb[48].mxu1 }
 0x6c0   : > { %v2872_v4 = vpop.f32.mrb[49].mxu1  ;;  %v10907_v26 = vadd.f32 %v10775_v5, %v2870_v54 }
 0x6c1   : > { %v2873_v33 = vpop.f32.mrb[50].mxu1 }
 0x6c2   : > { %v2875_v13 = vpop.f32.mrb[51].mxu1  ;;  %v3074_v27 = vmul.f32 %v10907_v26, %v10907_v26  ;;  %v10915_v51 = vadd.f32 %v10775_v5, %v2873_v33  ;;  %v3036_v14 = vadd.f32 %v10907_v26, %v3035_v12 }
 0x6c4   : > { %v3105_v16 = vadd.f32 %v3104_v8, %v3074_v27  ;;  %v3075_v18 = vmul.f32 %v10915_v51, %v10915_v51  ;;  %v3037_v42 = vadd.f32 %v10915_v51, %v3036_v14 }
 0x6c6   : > { %v3106_v63 = vadd.f32 %v3105_v16, %v3075_v18 }
 0x6c7   : > { %v2878_v58 = vpop.f32.mrb[52].mxu1 }
 0x6c8   : > { %v10919_v9 = vadd.f32 %v10775_v5, %v2878_v58  ;;  %v2880_v45 = vpop.f32.mrb[53].mxu1 }
 0x6c9   : > { %v2881_v35 = vpop.f32.mrb[54].mxu1 }
 0x6ca   : > { %v2883_v0 = vpop.f32.mrb[55].mxu1  ;;  %v3076_v23 = vmul.f32 %v10919_v9, %v10919_v9  ;;  %v10927_v41 = vadd.f32 %v10775_v5, %v2881_v35  ;;  %v3038_v52 = vadd.f32 %v10919_v9, %v3037_v42  ;;  %v10960_v35 = vadd.f32 %v10775_v5, %v10767_v1 }
 0x6cb   : > { %v3082_v0 = vmul.f32 %v10950_v11, %v10950_v11 }
 0x6cc   : > { %v3107_v32 = vadd.f32 %v3106_v63, %v3076_v23  ;;  %v3077_v20 = vmul.f32 %v10927_v41, %v10927_v41  ;;  %v3039_v62 = vadd.f32 %v10927_v41, %v3038_v52  ;;  %v3083_v63 = vmul.f32 %v10960_v35, %v10960_v35 }
 0x6ce   : > { %v3108_v48 = vadd.f32 %v3107_v32, %v3077_v20 }
 0x6cf   : > { %v2886_v46 = vpop.f32.mrb[56].mxu1 }
 0x6d0   : > { %v10933_v22 = vadd.f32 %v10775_v5, %v2886_v46  ;;  %v2888_v19 = vpop.f32.mrb[57].mxu1 }
 0x6d1   : > { %v2889_v60 = vpop.f32.mrb[58].mxu1 }
 0x6d2   : > { %v3078_v47 = vmul.f32 %v10933_v22, %v10933_v22  ;;  %v10939_v56 = vadd.f32 %v10775_v5, %v2889_v60  ;;  %v2891_v54 = vpop.f32.mrb[59].mxu1  ;;  %v3040_v37 = vadd.f32 %v10933_v22, %v3039_v62 }
 0x6d4   : > { %v3109_v4 = vadd.f32 %v3108_v48, %v3078_v47  ;;  %v3079_v33 = vmul.f32 %v10939_v56, %v10939_v56  ;;  %v3041_v53 = vadd.f32 %v10939_v56, %v3040_v37 }
 0x6d6   : > { %v3110_v27 = vadd.f32 %v3109_v4, %v3079_v33 }
 0x6d7   : > { %v2894_v15 = vpop.f32.mrb[60].mxu1 }
 0x6d8   : > { %v10946_v13 = vadd.f32 %v10775_v5, %v2894_v15  ;;  %v2896_v29 = vpop.f32.mrb[61].mxu1 }
 0x6d9   : > { %v2897_v12 = vpop.f32.mrb[62].mxu1  ;;  %v3011_v29 = vld [vmem:[#allocation23] sm:$0xff] }
 0x6da   : > { %v3042_v58 = vadd.f32 %v10946_v13, %v3041_v53  ;;  %v3080_v8 = vmul.f32 %v10946_v13, %v10946_v13  ;;  %v10956_v14 = vadd.f32 %v10775_v5, %v2897_v12  ;;  %v2899_v45 = vpop.f32.mrb[63].mxu1  ;;  %v12749_v53 = vmov 0.0   ;;  %v3012_v12 = vld [vmem:[#allocation23 + $0x8] sm:$0xff] }
 0x6dc   : > { %v3111_v16 = vadd.f32 %v3110_v27, %v3080_v8  ;;  %v3043_v18 = vadd.f32 %v10956_v14, %v3042_v58  ;;  %v3081_v44 = vmul.f32 %v10956_v14, %v10956_v14  ;;  %v3013_v27 = vld [vmem:[#allocation23 + $0x10] sm:$0xff]  ;;  %v7761_v58 = vpack.c.bf16 %v3012_v12, %v3011_v29  ;;  %v3014_v8 = vld [vmem:[#allocation23 + $0x18] sm:$0xff] }
 0x6dd   : > { %v7764_v45 = vpack.c.bf16 %v3014_v8, %v3013_v27  ;;  %v8166_v29 = vld [vmem:[#allocation15 + $0x198] sm:$0xff]   ;;  %v8167_v12 = vld [vmem:[#allocation15 + $0x120] sm:$0xff]  }
 0x6de   : > { %v3044_v42 = vadd.f32 %v10950_v11, %v3043_v18  ;;  %v3112_v23 = vadd.f32 %v3111_v16, %v3081_v44  ;;  %v8169_v27 = vld [vmem:[#allocation15 + $0x1e0] sm:$0xff]  }
 0x6df   : > { %v8170_v8 = vld [vmem:[#allocation15 + $0x1a0] sm:$0xff]  }
 0x6e0   : > { %v3045_v52 = vadd.f32 %v10960_v35, %v3044_v42  ;;  %v3113_v46 = vadd.f32 %v3112_v23, %v3082_v0 }
 0x6e2   : > { %v3046_v1 = vrot.slane %v3045_v52, 4  ;;  %v3114_v5 = vadd.f32 %v3113_v46, %v3083_v63 }
 0x6e4   : > { %v3047_v32 = vadd.f32 %v3046_v1, %v3045_v52  ;;  %v3115_v20 = vrot.slane %v3114_v5, 4  ;;  %v8151_v1 = vld [vmem:[#allocation15 + $0x100] sm:$0xff]  }
 0x6e6   : > { %v3048_v19 = vrot.slane %v3047_v32, 2  ;;  %v3116_v60 = vadd.f32 %v3115_v20, %v3114_v5  ;;  %v8152_v5 = vld [vmem:[#allocation15 + $0xc0] sm:$0xff]  }
 0x6e7   : > { %v8154_v20 = vld [vmem:[#allocation15 + $0x180] sm:$0xff]  }
 0x6e8   : > { %v3049_v62 = vadd.f32 %v3048_v19, %v3047_v32  ;;  %v3117_v47 = vrot.slane %v3116_v60, 2  ;;  %v8153_v32 = vld [vmem:[#allocation15 + $0x1c0] sm:$0xff]   ;;  %v8155_v19 = vld [vmem:[#allocation15 + $0x108] sm:$0xff]  }
 0x6e9   : > { %7253 = vmatprep.subr.bf16.mxu1 %v8153_v32  ;;  %v8178_v32 = vld [vmem:[#allocation15 + $0x1b0] sm:$0xff]  }
 0x6ea   : > { %v3050_v54 = vrot.slane %v3049_v62, 1  ;;  %v3118_v48 = vadd.f32 %v3117_v47, %v3116_v60  ;;  %7254 = vmatpush3.bf16.msra.mxu1 %v8154_v20  ;;  %v8156_v60 = vld [vmem:[#allocation15 + $0xc8] sm:$0xff]   ;;  %v8159_v47 = vld [vmem:[#allocation15 + $0x110] sm:$0xff]  }
 0x6ec   : > { %v3119_v37 = vrot.slane %v3118_v48, 1  ;;  %v3051_v4 = vadd.f32 %v3050_v54, %v3049_v62  ;;  %v8158_v62 = vld [vmem:[#allocation15 + $0x188] sm:$0xff]   ;;  %v8161_v54 = vld [vmem:[#allocation15 + $0x1d0] sm:$0xff]  }
 0x6ee   : > { %v3120_v33 = vadd.f32 %v3119_v37, %v3118_v48  ;;  %v8160_v48 = vld [vmem:[#allocation15 + $0xd0] sm:$0xff]  }
 0x6ef   : > { %v8162_v37 = vld [vmem:[#allocation15 + $0x190] sm:$0xff]  }
 0x6f0   : > { %v3121_v15 = vsel %vm952_vm2, %v3051_v4, %v3120_v33  ;;  %v8163_v4 = vld [vmem:[#allocation15 + $0x118] sm:$0xff]  }
 0x6f1   : > { %7465 = vmatmul.mubr.f32.vlgmr.msra.gmra.mrb[0].mxu0 %v3121_v15  ;;  %v8165_v33 = vld [vmem:[#allocation15 + $0x1d8] sm:$0xff]  }
 0x6f2   : > { %7475 = vmatprep.mubr.msk.f32.mxu0 %vm9073_vm0, %v12749_v53  ;;  %7762 = vmatpush3.bf16.msra.mxu0 %v7761_v58  ;;  %v8164_v15 = vld [vmem:[#allocation15 + $0xd8] sm:$0xff]   ;;  %v8168_v58 = vld [vmem:[#allocation15 + $0xe0] sm:$0xff]  }
 0x6f3   : > { %7763 = vmatprep.subr.bf16.mxu0 %v12748_v55  ;;  %v8157_v55 = vld [vmem:[#allocation15 + $0x1c8] sm:$0xff]  }
 0x6f4   : > { %7255 = vmatprep.subr.bf16.mxu1 %v8157_v55  ;;  %v2994_v55 = vld [vmem:[#allocation14] sm:$0x1] }
 0x6f5   : > { %7256 = vmatpush3.bf16.msra.mxu1 %v8158_v62  ;;  %v8180_v62 = vld [vmem:[#allocation15 + $0xf8] sm:$0xff]  }
 0x6f6   : > { %7765 = vmatpush3.bf16.msra.mxu0 %v7764_v45  ;;  %7257 = vmatprep.subr.bf16.mxu1 %v8161_v54  ;;  %v8171_v45 = vld [vmem:[#allocation15 + $0x128] sm:$0xff]  }
 0x6f7   : > { %6988 = vmatprep.subr.bf16.mxu0 %v8151_v1 }
 0x6f9   : > { %7258 = vmatpush3.bf16.msra.mxu1 %v8162_v37  ;;  %v8182_v37 = vld [vmem:[#allocation15 + $0x1b8] sm:$0xff]  }
 0x6fa   : > { %7259 = vmatprep.subr.bf16.mxu1 %v8165_v33  ;;  %v10981_v33 = vld [vmem:[#allocation15 + $0x140] sm:$0xff]  }
 0x6fd   : > { %7260 = vmatpush3.bf16.msra.mxu1 %v8166_v29 }
 0x6fe   : > { %7261 = vmatprep.subr.bf16.mxu1 %v8169_v27 }
 0x701   : > { %7262 = vmatpush3.bf16.msra.mxu1 %v8170_v8 }
 0x7c4   : > { %v3188_v16 = vpop.f32.mrb[0].mxu0 }
 0x7c5   : > { %v3192_v18 = vmul.f32 0.0009765625, %v3188_v16  ;;  %v7466_v44 = vpop.f32.mrb[1].mxu0  ;;  %v8173_v16 = vld [vmem:[#allocation15 + $0x1e8] sm:$0xff]  }
 0x7c6   : > { %7263 = vmatprep.subr.bf16.mxu1 %v8173_v16 }
 0x7c7   : > { %v3193_v0 = vmul.f32 %v3192_v18, %v3192_v18 }
 0x7c9   : > { %v3195_v42 = vrot.slane %v3193_v0, 7  ;;  %v8172_v0 = vld [vmem:[#allocation15 + $0xe8] sm:$0xff]  }
 0x7cb   : > { %v3197_v23 = vsub.f32 %v3192_v18, %v3195_v42  ;;  %v8174_v42 = vld [vmem:[#allocation15 + $0x1a8] sm:$0xff]  }
 0x7cc   : > { %7264 = vmatpush3.bf16.msra.mxu1 %v8174_v42 }
 0x7cd   : > { %v3198_v63 = vadd.f32 1e-05, %v3197_v23 }
 0x7cf   : > { %8389 = vrsqrt.f32 %v3198_v63 }
 0x7d9   : > { %v8390_v52 = vpop.eup %8389 }
 0x7da   : > { %v3200_v46 = vsel %vm952_vm2, %v3192_v18, %v8390_v52  ;;  %v6675_v18 = vld [vmem:[#allocation12] ss:$0 sm:$0xff]  ;;  %v8175_v52 = vld [vmem:[#allocation15 + $0x130] sm:$0xff]  }
 0x7db   : > { %7476 = vmatmul.mubr.msk.f32.vlgmr.msra.gmra.mrb[2].mxu0 %vm1036_vm3, %v3200_v46  ;;  %v8177_v46 = vld [vmem:[#allocation15 + $0x1f0] sm:$0xff]  }
 0x7dc   : > { %6989 = vmatpush3.bf16.msra.mxu0 %v8152_v5  ;;  %v8176_v5 = vld [vmem:[#allocation15 + $0xf0] sm:$0xff]   ;;  %7265 = vmatprep.subr.bf16.mxu1 %v8177_v46 }
 0x7dd   : > { %6990 = vmatprep.subr.bf16.mxu0 %v8155_v19  ;;  %v8179_v19 = vld [vmem:[#allocation15 + $0x138] sm:$0xff]   ;;  %7266 = vmatpush3.bf16.msra.mxu1 %v8178_v32 }
 0x7e0   : > { %6991 = vmatpush3.bf16.msra.mxu0 %v8156_v60  ;;  %v8181_v60 = vld [vmem:[#allocation15 + $0x1f8] sm:$0xff]  }
 0x7e1   : > { %6992 = vmatprep.subr.bf16.mxu0 %v8159_v47  ;;  %v12750_v47 = vld [vmem:[#allocation67_spill] sm:$0xff]  ;;  %7267 = vmatprep.subr.bf16.mxu1 %v8181_v60 }
 0x7e2   : > { %v12751_v54 = vsub.s32 1, %v12750_v47  ;;  %7268 = vmatpush3.bf16.msra.mxu1 %v8182_v37 }
 0x7e4   : > { %6993 = vmatpush3.bf16.msra.mxu0 %v8160_v48 }
 0x7e5   : > { %6994 = vmatprep.subr.bf16.mxu0 %v8163_v4 }
 0x7e8   : > { %6995 = vmatpush3.bf16.msra.mxu0 %v8164_v15 }
 0x7e9   : > { %6996 = vmatprep.subr.bf16.mxu0 %v8167_v12  ;;  %v12752_v12 = vsub.s32 0, %v12750_v47 }
 0x7ec   : > { %6997 = vmatpush3.bf16.msra.mxu0 %v8168_v58 }
 0x7ed   : > { %6998 = vmatprep.subr.bf16.mxu0 %v8171_v45 }
 0x7f0   : > { %6999 = vmatpush3.bf16.msra.mxu0 %v8172_v0 }
 0x7f1   : > { %7000 = vmatprep.subr.bf16.mxu0 %v8175_v52 }
 0x7f4   : > { %7001 = vmatpush3.bf16.msra.mxu0 %v8176_v5 }
 0x7f5   : > { %7002 = vmatprep.subr.bf16.mxu0 %v8179_v19 }
 0x7f8   : > { %7003 = vmatpush3.bf16.msra.mxu0 %v8180_v62 }
 0x7f9   : > { %7478 = vmatprep.subr.bf16.mxu0 %v10981_v33 }
 0x8ae   : > { %v3270_v44 = vpop.f32.mrb[2].mxu0 }
 0x8af   : > { %v3280_v23 = vmul.f32 %v6675_v18, %v3270_v44  ;;  %v7477_v63 = vpop.f32.mrb[3].mxu0 }
 0x8b1   : > { %v3282_v1 = vrot.slane %v3280_v23, 1  ;;  %v10979_v48 = vrot.slane %v3280_v23, %v12751_v54 }
 0x8b3   : > { %v3284_v20 = vmul.f32 %v3282_v1, %v3270_v44  ;;  %v3290_v15 = vmul.f32 %v10781_v43, %v10979_v48  ;;  %v3291_v29 = vmul.f32 %v10778_v2, %v10979_v48  ;;  %v3292_v58 = vmul.f32 %v10784_v57, %v10979_v48 }
 0x8b4   : > { %v3293_v8 = vmul.f32 %v10795_v7, %v10979_v48  ;;  %v3308_v45 = vmul.f32 %v10883_v59, %v10979_v48  ;;  %v3309_v43 = vmul.f32 %v10891_v30, %v10979_v48  ;;  %v3310_v2 = vmul.f32 %v10895_v34, %v10979_v48 }
 0x8b5   : > { %v3285_v4 = vsub.f32 %v2994_v55, %v3284_v20  ;;  %v3311_v16 = vmul.f32 %v10903_v10, %v10979_v48  ;;  %v3312_v57 = vmul.f32 %v10907_v26, %v10979_v48  ;;  %v3313_v7 = vmul.f32 %v10915_v51, %v10979_v48 }
 0x8b6   : > { %v3314_v59 = vmul.f32 %v10919_v9, %v10979_v48  ;;  %v3315_v18 = vmul.f32 %v10927_v41, %v10979_v48  ;;  %v3316_v30 = vmul.f32 %v10933_v22, %v10979_v48  ;;  %v3317_v34 = vmul.f32 %v10939_v56, %v10979_v48 }
 0x8b7   : > { %v10989_v27 = vrot.slane %v3285_v4, %v12752_v12  ;;  %v3318_v10 = vmul.f32 %v10946_v13, %v10979_v48  ;;  %v3319_v26 = vmul.f32 %v10956_v14, %v10979_v48  ;;  %v3320_v51 = vmul.f32 %v10950_v11, %v10979_v48 }
 0x8b8   : > { %v3321_v9 = vmul.f32 %v10960_v35, %v10979_v48  ;;  %v3294_v5 = vmul.f32 %v10799_v36, %v10979_v48  ;;  %v3295_v19 = vmul.f32 %v10807_v49, %v10979_v48  ;;  %v3296_v60 = vmul.f32 %v10811_v40, %v10979_v48 }
 0x8b9   : > { %v11025_v41 = vadd.f32 %v10989_v27, %v3308_v45  ;;  %v11028_v22 = vadd.f32 %v10989_v27, %v3309_v43  ;;  %v11031_v56 = vadd.f32 %v10989_v27, %v3310_v2  ;;  %v11034_v13 = vadd.f32 %v10989_v27, %v3311_v16 }
 0x8ba   : > { %v11037_v14 = vadd.f32 %v10989_v27, %v3312_v57  ;;  %v11040_v11 = vadd.f32 %v10989_v27, %v3313_v7  ;;  %v11043_v35 = vadd.f32 %v10989_v27, %v3314_v59  ;;  %v11046_v44 = vadd.f32 %v10989_v27, %v3315_v18 }
 0x8bb   : > { %v11049_v0 = vadd.f32 %v10989_v27, %v3316_v30  ;;  %v11052_v42 = vadd.f32 %v10989_v27, %v3317_v34  ;;  %v11055_v23 = vadd.f32 %v10989_v27, %v3318_v10  ;;  %v11058_v63 = vadd.f32 %v10989_v27, %v3290_v15 }
 0x8bc   : > { %v11061_v52 = vadd.f32 %v10989_v27, %v3319_v26  ;;  %v11064_v46 = vadd.f32 %v10989_v27, %v3320_v51  ;;  %v11067_v1 = vadd.f32 %v10989_v27, %v3321_v9  ;;  %v11072_v32 = vadd.f32 %v10989_v27, %v3291_v29 }
 0x8bd   : > { %v11075_v20 = vadd.f32 %v10989_v27, %v3292_v58  ;;  %v11080_v55 = vadd.f32 %v10989_v27, %v3293_v8  ;;  %v3297_v62 = vmul.f32 %v10819_v61, %v10979_v48  ;;  %v3298_v36 = vmul.f32 %v10823_v31, %v10979_v48 }
 0x8be   : > { %12753 = vst [vmem:[#allocation47_spill] sm:$0xff] %v11064_v46  ;;  %12754 = vst [vmem:[#allocation43_spill] sm:$0xff] %v11067_v1  ;;  %v11089_v47 = vadd.f32 %v10989_v27, %v3294_v5  ;;  %v3299_v54 = vmul.f32 %v10831_v3, %v10979_v48  ;;  %v3300_v49 = vmul.f32 %v10835_v6, %v10979_v48  ;;  %v3360_v40 = vsub.f32 0.0, %v11058_v63 }
 0x8bf   : > { %v11096_v37 = vadd.f32 %v10989_v27, %v3295_v19  ;;  %v3301_v61 = vmul.f32 %v10843_v21, %v10979_v48  ;;  %v11102_v4 = vadd.f32 %v10989_v27, %v3296_v60  ;;  %v3361_v31 = vsub.f32 0.0, %v11072_v32 }
 0x8c0   : > { %v3362_v15 = vsub.f32 0.0, %v11075_v20  ;;  %v3302_v3 = vmul.f32 %v10847_v24, %v10979_v48  ;;  %v3303_v6 = vmul.f32 %v10855_v50, %v10979_v48  ;;  %v11111_v29 = vadd.f32 %v10989_v27, %v3297_v62 }
 0x8c1   : > { %v3363_v12 = vsub.f32 0.0, %v11080_v55  ;;  %v3304_v21 = vmul.f32 %v10859_v28, %v10979_v48  ;;  %v3305_v58 = vmul.f32 %v10867_v25, %v10979_v48  ;;  %v11119_v8 = vadd.f32 %v10989_v27, %v3298_v36 }
 0x8c2   : > { %v3364_v45 = vsub.f32 0.0, %v11089_v47  ;;  %v3306_v24 = vmul.f32 %v10871_v17, %v10979_v48  ;;  %v11125_v50 = vadd.f32 %v10989_v27, %v3299_v54  ;;  %v3365_v43 = vsub.f32 0.0, %v11096_v37 }
 0x8c3   : > { %v3392_v2 = vmul.f32 1.442695, %v3360_v40  ;;  %v11129_v16 = vadd.f32 %v10989_v27, %v3300_v49  ;;  %v3366_v28 = vsub.f32 0.0, %v11102_v4  ;;  %v3394_v25 = vmul.f32 1.442695, %v3361_v31 }
 0x8c4   : > { %v3396_v57 = vmul.f32 1.442695, %v3362_v15  ;;  %v3307_v7 = vmul.f32 %v10879_v38, %v10979_v48  ;;  %v11135_v59 = vadd.f32 %v10989_v27, %v3301_v61  ;;  %v3367_v17 = vsub.f32 0.0, %v11111_v29 }
 0x8c5   : > { %v3398_v18 = vmul.f32 1.442695, %v3363_v12  ;;  %v11139_v30 = vadd.f32 %v10989_v27, %v3302_v3  ;;  %v3368_v34 = vsub.f32 0.0, %v11119_v8  ;;  %8391 = vpow2.f32 %v3392_v2 }
 0x8c6   : > { %v3400_v10 = vmul.f32 1.442695, %v3364_v45  ;;  %v11143_v26 = vadd.f32 %v10989_v27, %v3303_v6  ;;  %v3369_v51 = vsub.f32 0.0, %v11125_v50  ;;  %8393 = vpow2.f32 %v3394_v25 }
 0x8c7   : > { %v3402_v38 = vmul.f32 1.442695, %v3365_v43  ;;  %v11147_v48 = vadd.f32 %v10989_v27, %v3304_v21  ;;  %v3370_v9 = vsub.f32 0.0, %v11129_v16  ;;  %8395 = vpow2.f32 %v3396_v57 }
 0x8c8   : > { %v3404_v5 = vmul.f32 1.442695, %v3366_v28  ;;  %v11151_v19 = vadd.f32 %v10989_v27, %v3305_v58  ;;  %v3371_v60 = vsub.f32 0.0, %v11135_v59  ;;  %8397 = vpow2.f32 %v3398_v18 }
 0x8c9   : > { %12755 = vst [vmem:[#allocation44_spill] sm:$0xff] %v11147_v48  ;;  %v3406_v62 = vmul.f32 1.442695, %v3367_v17  ;;  %v11155_v36 = vadd.f32 %v10989_v27, %v3306_v24  ;;  %v3372_v54 = vsub.f32 0.0, %v11139_v30  ;;  %8399 = vpow2.f32 %v3400_v10 }
 0x8ca   : > { %12756 = vst [vmem:[#allocation50_spill] sm:$0xff] %v11151_v19  ;;  %v3408_v49 = vmul.f32 1.442695, %v3368_v34  ;;  %v11159_v40 = vadd.f32 %v10989_v27, %v3307_v7  ;;  %v3373_v61 = vsub.f32 0.0, %v11143_v26  ;;  %8401 = vpow2.f32 %v3402_v38 }
 0x8cb   : > { %12757 = vst [vmem:[#allocation51_spill] sm:$0xff] %v11155_v36  ;;  %v3410_v31 = vmul.f32 1.442695, %v3369_v51  ;;  %v3374_v15 = vsub.f32 0.0, %v11147_v48  ;;  %8403 = vpow2.f32 %v3404_v5  ;;  %v3412_v3 = vmul.f32 1.442695, %v3370_v9 }
 0x8cc   : > { %12758 = vst [vmem:[#allocation48_spill] sm:$0xff] %v11159_v40  ;;  %v3375_v6 = vsub.f32 0.0, %v11151_v19  ;;  %8405 = vpow2.f32 %v3406_v62  ;;  %v3414_v12 = vmul.f32 1.442695, %v3371_v60  ;;  %v3376_v21 = vsub.f32 0.0, %v11155_v36 }
 0x8cd   : > { %8407 = vpow2.f32 %v3408_v49  ;;  %v3416_v58 = vmul.f32 1.442695, %v3372_v54  ;;  %v3377_v45 = vsub.f32 0.0, %v11159_v40  ;;  %v3418_v27 = vmul.f32 1.442695, %v3373_v61 }
 0x8ce   : > { %8409 = vpow2.f32 %v3410_v31  ;;  %v3378_v43 = vsub.f32 0.0, %v11025_v41  ;;  %v3420_v2 = vmul.f32 1.442695, %v3374_v15  ;;  %v3379_v25 = vsub.f32 0.0, %v11028_v22 }
 0x8cf   : > { %v11166_v24 = vpop.eup %8391  ;;  %8411 = vpow2.f32 %v3412_v3  ;;  %v3422_v57 = vmul.f32 1.442695, %v3375_v6  ;;  %v3380_v17 = vsub.f32 0.0, %v11031_v56  ;;  %v3424_v18 = vmul.f32 1.442695, %v3376_v21 }
 0x8d0   : > { %v11169_v28 = vpop.eup %8393  ;;  %8413 = vpow2.f32 %v3414_v12  ;;  %v3381_v10 = vsub.f32 0.0, %v11034_v13  ;;  %v3426_v51 = vmul.f32 1.442695, %v3377_v45  ;;  %v3382_v9 = vsub.f32 0.0, %v11037_v14 }
 0x8d1   : > { %v11172_v7 = vpop.eup %8395  ;;  %8415 = vpow2.f32 %v3416_v58  ;;  %v3428_v5 = vmul.f32 1.442695, %v3378_v43  ;;  %v3383_v62 = vsub.f32 0.0, %v11040_v11  ;;  %v3430_v54 = vmul.f32 1.442695, %v3379_v25 }
 0x8d2   : > { %v11175_v34 = vpop.eup %8397  ;;  %8417 = vpow2.f32 %v3418_v27  ;;  %v3384_v61 = vsub.f32 0.0, %v11043_v35  ;;  %v3432_v31 = vmul.f32 1.442695, %v3380_v17  ;;  %v3385_v3 = vsub.f32 0.0, %v11046_v44 }
 0x8d3   : > { %v11178_v38 = vpop.eup %8399  ;;  %8419 = vpow2.f32 %v3420_v2  ;;  %v3434_v6 = vmul.f32 1.442695, %v3381_v10  ;;  %v3386_v21 = vsub.f32 0.0, %v11049_v0  ;;  %v3436_v58 = vmul.f32 1.442695, %v3382_v9 }
 0x8d4   : > { %v11181_v60 = vpop.eup %8401  ;;  %8421 = vpow2.f32 %v3422_v57  ;;  %v3387_v27 = vsub.f32 0.0, %v11052_v42  ;;  %v3438_v43 = vmul.f32 1.442695, %v3383_v62  ;;  %v3388_v25 = vsub.f32 0.0, %v11055_v23 }
 0x8d5   : > { %v8404_v49 = vpop.eup %8403  ;;  %8423 = vpow2.f32 %v3424_v18  ;;  %v3440_v57 = vmul.f32 1.442695, %v3384_v61  ;;  %v3389_v18 = vsub.f32 0.0, %v11061_v52  ;;  %v3442_v10 = vmul.f32 1.442695, %v3385_v3 }
 0x8d6   : > { %v8406_v15 = vpop.eup %8405  ;;  %8425 = vpow2.f32 %v3426_v51  ;;  %v3390_v53 = vsub.f32 0.0, %v11064_v46  ;;  %v3444_v9 = vmul.f32 1.442695, %v3386_v21  ;;  %v3446_v40 = vmul.f32 1.442695, %v3387_v27 }
 0x8d7   : > { %v8408_v12 = vpop.eup %8407  ;;  %8427 = vpow2.f32 %v3428_v5  ;;  %v3448_v62 = vmul.f32 1.442695, %v3388_v25  ;;  %v3450_v61 = vmul.f32 1.442695, %v3389_v18  ;;  %v3457_v27 = vadd.f32 1.0, %v11169_v28 }
 0x8d8   : > { %v8410_v45 = vpop.eup %8409  ;;  %8429 = vpow2.f32 %v3430_v54  ;;  %v3462_v48 = vadd.f32 1.0, %v8404_v49 }
 0x8d9   : > { %v8412_v2 = vpop.eup %8411  ;;  %8431 = vpow2.f32 %v3432_v31  ;;  %v3391_v31 = vsub.f32 0.0, %v11067_v1 }
 0x8da   : > { %v8414_v17 = vpop.eup %8413  ;;  %8433 = vpow2.f32 %v3434_v6  ;;  %v3452_v6 = vmul.f32 1.442695, %v3390_v53 }
 0x8db   : > { %v8416_v51 = vpop.eup %8415  ;;  %8435 = vpow2.f32 %v3436_v58  ;;  %v3456_v58 = vadd.f32 1.0, %v11166_v24  ;;  %v3454_v25 = vmul.f32 1.442695, %v3391_v31 }
 0x8dc   : > { %v8418_v5 = vpop.eup %8417  ;;  %8437 = vpow2.f32 %v3438_v43 }
 0x8dd   : > { %v8420_v54 = vpop.eup %8419  ;;  %8439 = vpow2.f32 %v3440_v57 }
 0x8de   : > { %v8422_v36 = vpop.eup %8421  ;;  %8441 = vpow2.f32 %v3442_v10  ;;  %v3458_v10 = vadd.f32 1.0, %v11172_v7  ;;  %v3464_v7 = vadd.f32 1.0, %v8408_v12 }
 0x8df   : > { %v8424_v19 = vpop.eup %8423  ;;  %8443 = vpow2.f32 %v3444_v9  ;;  %v3459_v9 = vadd.f32 1.0, %v11175_v34  ;;  %v3471_v1 = vadd.f32 1.0, %v8422_v36 }
 0x8e0   : > { %v11192_v3 = vpop.eup %8425  ;;  %8445 = vpow2.f32 %v3446_v40  ;;  %v3460_v40 = vadd.f32 1.0, %v11178_v38  ;;  %v3472_v46 = vadd.f32 1.0, %v8424_v19 }
 0x8e1   : > { %v8428_v21 = vpop.eup %8427  ;;  %8447 = vpow2.f32 %v3448_v62  ;;  %v3461_v62 = vadd.f32 1.0, %v11181_v60  ;;  %v3467_v60 = vadd.f32 1.0, %v8414_v17 }
 0x8e2   : > { %v8430_v43 = vpop.eup %8429  ;;  %8449 = vpow2.f32 %v3450_v61  ;;  %v3463_v61 = vadd.f32 1.0, %v8406_v15 }
 0x8e3   : > { %v8432_v57 = vpop.eup %8431  ;;  %8451 = vpow2.f32 %v3452_v6 }
 0x8e4   : > { %v8434_v18 = vpop.eup %8433  ;;  %8453 = vrcp.f32 %v3456_v58  ;;  %v3465_v58 = vadd.f32 1.0, %v8410_v45 }
 0x8e5   : > { %v8436_v53 = vpop.eup %8435  ;;  %8455 = vrcp.f32 %v3457_v27  ;;  %v3466_v27 = vadd.f32 1.0, %v8412_v2 }
 0x8e6   : > { %v8438_v24 = vpop.eup %8437  ;;  %8457 = vpow2.f32 %v3454_v25 }
 0x8e7   : > { %v8440_v28 = vpop.eup %8439  ;;  %8459 = vrcp.f32 %v3458_v10  ;;  %v3468_v10 = vadd.f32 1.0, %v8416_v51 }
 0x8e8   : > { %v8442_v31 = vpop.eup %8441  ;;  %8461 = vrcp.f32 %v3459_v9  ;;  %v3469_v9 = vadd.f32 1.0, %v8418_v5  ;;  %v3475_v5 = vadd.f32 1.0, %v8430_v43 }
 0x8e9   : > { %v11200_v6 = vpop.eup %8443  ;;  %8463 = vrcp.f32 %v3460_v40  ;;  %v3470_v40 = vadd.f32 1.0, %v8420_v54  ;;  %v3476_v54 = vadd.f32 1.0, %v8432_v57  ;;  %v11213_v57 = vadd.f32 1.0, %v11192_v3 }
 0x8ea   : > { %v11202_v34 = vpop.eup %8445  ;;  %8465 = vrcp.f32 %v3461_v62 }
 0x8eb   : > { %v11204_v38 = vpop.eup %8447  ;;  %8467 = vrcp.f32 %v3462_v48 }
 0x8ec   : > { %v11206_v25 = vpop.eup %8449  ;;  %8469 = vrcp.f32 %v3463_v61  ;;  %v3474_v61 = vadd.f32 1.0, %v8428_v21 }
 0x8ed   : > { %v8452_v49 = vpop.eup %8451  ;;  %8471 = vrcp.f32 %v3464_v7 }
 0x8ee   : > { %v8454_v15 = vpop.eup %8453  ;;  %8473 = vrcp.f32 %v3465_v58 }
 0x8ef   : > { %v8456_v12 = vpop.eup %8455  ;;  %8475 = vrcp.f32 %v3466_v27  ;;  %v3520_v45 = vmul.f32 %v8454_v15, %v11058_v63  ;;  %v3477_v27 = vadd.f32 1.0, %v8434_v18  ;;  %v3479_v15 = vadd.f32 1.0, %v8438_v24 }
 0x8f0   : > { %v8458_v62 = vpop.eup %8457  ;;  %8477 = vrcp.f32 %v3467_v60  ;;  %v3521_v48 = vmul.f32 %v8456_v12, %v11072_v32  ;;  %v3481_v18 = vadd.f32 1.0, %v8442_v31  ;;  %v3482_v24 = vadd.f32 1.0, %v11200_v6 }
 0x8f1   : > { %v8460_v2 = vpop.eup %8459  ;;  %8479 = vrcp.f32 %v3468_v10  ;;  %v3478_v10 = vadd.f32 1.0, %v8436_v53  ;;  %v3484_v31 = vadd.f32 1.0, %v11204_v38  ;;  %v3486_v6 = vadd.f32 1.0, %v8452_v49 }
 0x8f2   : > { %v8462_v17 = vpop.eup %8461  ;;  %8481 = vrcp.f32 %v3469_v9  ;;  %v3552_v51 = vpack.c.bf16 %v3521_v48, %v3520_v45  ;;  %v3522_v36 = vmul.f32 %v8460_v2, %v11075_v20 }
 0x8f3   : > { %v8464_v7 = vpop.eup %8463  ;;  %8483 = vrcp.f32 %v3470_v40  ;;  %v3523_v32 = vmul.f32 %v8462_v17, %v11080_v55 }
 0x8f4   : > { %v8466_v58 = vpop.eup %8465  ;;  %8485 = vrcp.f32 %v3471_v1  ;;  %v3570_v60 = vshrl.u32 %v3552_v51, 16  ;;  %v3573_v9 = vshll.u32 %v3552_v51, 16  ;;  %v3480_v1 = vadd.f32 1.0, %v8440_v28 }
 0x8f5   : > { %v8468_v63 = vpop.eup %8467  ;;  %8487 = vrcp.f32 %v3472_v46  ;;  %v3553_v20 = vpack.c.bf16 %v3523_v32, %v3522_v36  ;;  %v3524_v45 = vmul.f32 %v8464_v7, %v11089_v47  ;;  %v3525_v3 = vmul.f32 %v8466_v58, %v11096_v37 }
 0x8f6   : > { %v8470_v19 = vpop.eup %8469  ;;  %8489 = vrcp.f32 %v3474_v61  ;;  %v3572_v43 = vrot.slane %v3570_v60, 7  ;;  %v3483_v28 = vadd.f32 1.0, %v11202_v34  ;;  %v3485_v61 = vadd.f32 1.0, %v11206_v25 }
 0x8f7   : > { %v8472_v21 = vpop.eup %8471  ;;  %8491 = vrcp.f32 %v3475_v5  ;;  %v3487_v37 = vadd.f32 1.0, %v8458_v62  ;;  %v3577_v38 = vshrl.u32 %v3553_v20, 16  ;;  %v3526_v5 = vmul.f32 %v8468_v63, %v11102_v4 }
 0x8f8   : > { %v8474_v12 = vpop.eup %8473  ;;  %8493 = vrcp.f32 %v3476_v54  ;;  %v3575_v55 = vor.u32 %v3573_v9, %v3572_v43  ;;  %v11217_v53 = vsel %vm10150_vm6, %v3572_v43, 0  ;;  %v3527_v58 = vmul.f32 %v8470_v19, %v11111_v29 }
 0x8f9   : > { %v8476_v46 = vpop.eup %8475  ;;  %8495 = vrcp.f32 %v3477_v27  ;;  %v3753_v47 = vshll.u32 %v11217_v53, 16  ;;  %v11239_v54 = vpack.c.bf16 %v3525_v3, %v3524_v45  ;;  %v3580_v49 = vshll.u32 %v3553_v20, 16 }
 0x8fa   : > { %v8478_v40 = vpop.eup %8477  ;;  %8497 = vrcp.f32 %v3478_v10  ;;  %v11226_v2 = vsel %vm10150_vm6, 0, %v3575_v55  ;;  %v3528_v32 = vmul.f32 %v8472_v21, %v11119_v8  ;;  %v3529_v60 = vmul.f32 %v8474_v12, %v11125_v50  ;;  %v8184_v12 = vld [vmem:[#allocation15 + $0x148] sm:$0xff]  }
 0x8fb   : > { %v8480_v48 = vpop.eup %8479  ;;  %8499 = vrcp.f32 %v3479_v15  ;;  %v3748_v34 = vshll.u32 %v11226_v2, 16  ;;  %v3746_v27 = vshrl.u32 %v11226_v2, 16  ;;  %v3755_v10 = vrot.slane %v3753_v47, 1 }
 0x8fc   : > { %v11228_v17 = vpop.eup %8481  ;;  %8501 = vrcp.f32 %v3480_v1  ;;  %v3579_v63 = vrot.slane %v3577_v38, 7  ;;  %v11248_v43 = vpack.c.bf16 %v3527_v58, %v3526_v5  ;;  %v3587_v1 = vshll.u32 %v11239_v54, 16 }
 0x8fd   : > { %v11232_v51 = vpop.eup %8483  ;;  %8503 = vrcp.f32 %v3481_v18  ;;  %v3750_v62 = vrot.slane %v3748_v34, 1  ;;  %v3530_v20 = vmul.f32 %v8476_v46, %v11129_v16  ;;  %v3532_v46 = vmul.f32 %v8480_v48, %v11139_v30  ;;  %v8185_v34 = vld [vmem:[#allocation15 + $0x150] sm:$0xff]  }
 0x8fe   : > { %v11235_v7 = vpop.eup %8485  ;;  %8505 = vrcp.f32 %v3482_v24  ;;  %v3582_v21 = vor.u32 %v3580_v49, %v3579_v63 }
 0x8ff   : > { %v11241_v25 = vpop.eup %8487  ;;  %8507 = vrcp.f32 %v3483_v28  ;;  %v3751_v29 = vor.u32 %v3750_v62, %v3746_v27  ;;  %v11266_v28 = vpack.c.bf16 %v3529_v60, %v3528_v32 }
 0x900   : > { %v8490_v36 = vpop.eup %8489  ;;  %8509 = vrcp.f32 %v3484_v31  ;;  %v11270_v16 = vsel %vm10150_vm6, 0, %v3582_v21 }
 0x901   : > { %v8492_v15 = vpop.eup %8491  ;;  %8511 = vrcp.f32 %v3485_v61  ;;  %v3538_v4 = vmul.f32 %v8490_v36, %v11025_v41  ;;  %v11253_v50 = vsel %vm1584_vm7, %v3751_v29, %v3755_v10  ;;  %v3758_v58 = vshrl.u32 %v11270_v16, 16 }
 0x902   : > { %v8494_v19 = vpop.eup %8493  ;;  %8513 = vrcp.f32 %v3486_v6  ;;  %v3539_v9 = vmul.f32 %v8492_v15, %v11028_v22  ;;  %4280 = vmatprep.mubr.bf16.mxu0 %v11253_v50  ;;  %v11262_v22 = vsel %vm10150_vm6, %v3579_v63, 0  ;;  %v3594_v6 = vshll.u32 %v11248_v43, 16 }
 0x903   : > { %v8496_v18 = vpop.eup %8495  ;;  %8515 = vrcp.f32 %v3487_v37  ;;  %v3540_v8 = vmul.f32 %v8494_v19, %v11031_v56  ;;  %v3531_v56 = vmul.f32 %v8478_v40, %v11135_v59  ;;  %4281 = vmatmul.mubr.bf16.vlgmr.msra.gmra.mrb[4].mxu0 %v11226_v2  ;;  %v3760_v40 = vshll.u32 %v11270_v16, 16 }
 0x904   : > { %v8498_v41 = vpop.eup %8497  ;;  %v3541_v55 = vmul.f32 %v8496_v18, %v11034_v13  ;;  %v11257_v24 = vpack.c.bf16 %v3539_v9, %v3538_v4  ;;  %7479 = vmatpush3.bf16.msra.mxu0 %v10981_v33  ;;  %v3765_v47 = vshll.u32 %v11262_v22, 16  ;;  %v3584_v37 = vshrl.u32 %v11239_v54, 16  ;;  %v12759_v9 = vld [vmem:[#allocation47_spill] sm:$0xff] }
 0x905   : > { %v8500_v45 = vpop.eup %8499  ;;  %v3542_v3 = vmul.f32 %v8498_v41, %v11037_v14  ;;  %7480 = vmatprep.subr.bf16.mxu0 %v8184_v12  ;;  %v3591_v33 = vshrl.u32 %v11248_v43, 16  ;;  %v3762_v49 = vrot.slane %v3760_v40, 1  ;;  %v11292_v36 = vpack.c.bf16 %v3531_v56, %v3530_v20  ;;  %v8187_v40 = vld [vmem:[#allocation15 + $0x160] sm:$0xff]  }
 0x906   : > { %v8502_v13 = vpop.eup %8501  ;;  %v3543_v31 = vmul.f32 %v8500_v45, %v11040_v11  ;;  %v11275_v61 = vpack.c.bf16 %v3541_v55, %v3540_v8  ;;  %v3533_v11 = vmul.f32 %v11228_v17, %v11143_v26  ;;  %v3586_v27 = vrot.slane %v3584_v37, 7  ;;  %v12760_v8 = vld [vmem:[#allocation43_spill] sm:$0xff] }
 0x907   : > { %v8504_v14 = vpop.eup %8503  ;;  %v3544_v59 = vmul.f32 %v8502_v13, %v11043_v35  ;;  %v3593_v26 = vrot.slane %v3591_v33, 7  ;;  %v3763_v60 = vor.u32 %v3762_v49, %v3758_v58  ;;  %v3767_v10 = vrot.slane %v3765_v47, 1 }
 0x908   : > { %v8506_v30 = vpop.eup %8505  ;;  %v3545_v48 = vmul.f32 %v8504_v14, %v11046_v44  ;;  %v11286_v38 = vpack.c.bf16 %v3543_v31, %v3542_v3  ;;  %7481 = vmatpush3.bf16.msra.mxu0 %v8184_v12  ;;  %v3589_v15 = vor.u32 %v3587_v1, %v3586_v27  ;;  %v3598_v63 = vshrl.u32 %v11266_v28, 16 }
 0x909   : > { %v8508_v5 = vpop.eup %8507  ;;  %v3546_v35 = vmul.f32 %v8506_v30, %v11049_v0  ;;  %7482 = vmatprep.subr.bf16.mxu0 %v8185_v34  ;;  %v3596_v18 = vor.u32 %v3594_v6, %v3593_v26  ;;  %8517 = vrcp.f32 %v11213_v57  ;;  %v3601_v41 = vshll.u32 %v11266_v28, 16  ;;  %v12761_v30 = vld [vmem:[#allocation44_spill] sm:$0xff] }
 0x90a   : > { %v8510_v54 = vpop.eup %8509  ;;  %v3547_v62 = vmul.f32 %v8508_v5, %v11052_v42  ;;  %v11294_v32 = vpack.c.bf16 %v3545_v48, %v3544_v59  ;;  %v11302_v42 = vsel %vm10150_vm6, %v3586_v27, 0  ;;  %v11311_v1 = vsel %vm10150_vm6, 0, %v3589_v15  ;;  %v12762_v5 = vld [vmem:[#allocation50_spill] sm:$0xff] }
 0x90b   : > { %v8512_v44 = vpop.eup %8511  ;;  %v3548_v17 = vmul.f32 %v8510_v54, %v11055_v23  ;;  %v11307_v23 = vsel %vm1584_vm7, %v3763_v60, %v3767_v10  ;;  %v3772_v20 = vshll.u32 %v11311_v1, 16  ;;  %v3777_v55 = vshll.u32 %v11302_v42, 16 }
 0x90c   : > { %v8514_v0 = vpop.eup %8513  ;;  %v3549_v4 = vmul.f32 %v8512_v44, %v11061_v52  ;;  %v11298_v29 = vpack.c.bf16 %v3547_v62, %v3546_v35  ;;  %v8186_v52 = vld [vmem:[#allocation15 + $0x158] sm:$0xff]   ;;  %5445 = vmatprep.mubr.bf16.mxu1 %v11307_v23  ;;  %4288 = vmatprep.mubr.bf16.mxu0 %v11307_v23  ;;  %v11326_v57 = vsel %vm10150_vm6, 0, %v3596_v18  ;;  %v11330_v45 = vsel %vm10150_vm6, %v3593_v26, 0 }
 0x90d   : > { %v8516_v19 = vpop.eup %8515  ;;  %v3550_v43 = vmul.f32 %v8514_v0, %v12759_v9  ;;  %5446 = vmatmul.mubr.bf16.vlgmr.msra.gmra.mrb[68].mxu1 %v11270_v16  ;;  %4289 = vmatmul.mubr.bf16.gmra.mrb[8].mxu0 %v11270_v16  ;;  %v3558_v56 = vpack.c.bf16 %v3533_v11, %v3532_v46  ;;  %v3770_v28 = vshrl.u32 %v11311_v1, 16  ;;  %v3784_v13 = vshll.u32 %v11326_v57, 16 }
 0x90e   : > { %v3551_v21 = vmul.f32 %v8516_v19, %v12760_v8  ;;  %v11315_v12 = vpack.c.bf16 %v3549_v4, %v3548_v17  ;;  %7483 = vmatpush3.bf16.msra.mxu0 %v8185_v34  ;;  %v3774_v31 = vrot.slane %v3772_v20, 1  ;;  %v3789_v6 = vshll.u32 %v11330_v45, 16  ;;  %v12763_v8 = vld [vmem:[#allocation51_spill] sm:$0xff] }
 0x90f   : > { %v3600_v14 = vrot.slane %v3598_v63, 7  ;;  %v3605_v59 = vshrl.u32 %v11292_v36, 16  ;;  %7484 = vmatprep.subr.bf16.mxu0 %v8186_v52  ;;  %v3782_v47 = vshrl.u32 %v11326_v57, 16  ;;  %v3786_v37 = vrot.slane %v3784_v13, 1 }
 0x910   : > { %v11332_v3 = vpack.c.bf16 %v3551_v21, %v3550_v43  ;;  %v3534_v46 = vmul.f32 %v11232_v51, %v12761_v30  ;;  %v3775_v11 = vor.u32 %v3774_v31, %v3770_v28  ;;  %v3779_v48 = vrot.slane %v3777_v55, 1  ;;  %v8189_v43 = vld [vmem:[#allocation15 + $0x170] sm:$0xff]  }
 0x911   : > { %v3603_v33 = vor.u32 %v3601_v41, %v3600_v14  ;;  %v3535_v34 = vmul.f32 %v11235_v7, %v12762_v5  ;;  %v3787_v35 = vor.u32 %v3786_v37, %v3782_v47  ;;  %v3607_v58 = vrot.slane %v3605_v59, 7  ;;  %v12764_v41 = vld [vmem:[#allocation48_spill] sm:$0xff] }
 0x912   : > { %v3612_v49 = vshrl.u32 %v3558_v56, 16  ;;  %7485 = vmatpush3.bf16.msra.mxu0 %v8186_v52  ;;  %v3608_v27 = vshll.u32 %v11292_v36, 16  ;;  %v11345_v54 = vsel %vm1584_vm7, %v3775_v11, %v3779_v48  ;;  %v3791_v62 = vrot.slane %v3789_v6, 1  ;;  %v8188_v36 = vld [vmem:[#allocation15 + $0x168] sm:$0xff]  }
 0x913   : > { %v11349_v26 = vsel %vm10150_vm6, 0, %v3603_v33  ;;  %7486 = vmatprep.subr.bf16.mxu0 %v8187_v40  ;;  %5453 = vmatprep.mubr.bf16.mxu1 %v11345_v54  ;;  %v11355_v51 = vsel %vm10150_vm6, %v3600_v14, 0  ;;  %v8518_v60 = vpop.eup %8517  ;;  %v3559_v10 = vpack.c.bf16 %v3535_v34, %v3534_v46  ;;  %v3615_v9 = vshll.u32 %v3558_v56, 16  ;;  %v8190_v56 = vld [vmem:[#allocation15 + $0x178] sm:$0xff]   ;;  %v8191_v46 = vld [vmem:[#allocation15 + $0x40] sm:$0xff]  }
 0x914   : > { %4296 = vmatprep.mubr.bf16.mxu0 %v11345_v54  ;;  %v3796_v7 = vshll.u32 %v11349_v26, 16  ;;  %v11360_v44 = vsel %vm1584_vm7, %v3787_v35, %v3791_v62  ;;  %v3610_v17 = vor.u32 %v3608_v27, %v3607_v58  ;;  %v3614_v0 = vrot.slane %v3612_v49, 7 }
 0x915   : > { %5454 = vmatmul.mubr.bf16.gmra.mrb[72].mxu1 %v11311_v1  ;;  %4297 = vmatmul.mubr.bf16.gmra.mrb[12].mxu0 %v11311_v1  ;;  %v3794_v4 = vshrl.u32 %v11349_v26, 16  ;;  %v3801_v63 = vshll.u32 %v11355_v51, 16  ;;  %v3536_v21 = vmul.f32 %v11241_v25, %v12763_v8  ;;  %v3537_v20 = vmul.f32 %v8518_v60, %v12764_v41 }
 0x916   : > { %5461 = vmatprep.mubr.bf16.mxu1 %v11360_v44  ;;  %4304 = vmatprep.mubr.bf16.mxu0 %v11360_v44  ;;  %v3798_v15 = vrot.slane %v3796_v7, 1  ;;  %v11369_v19 = vsel %vm10150_vm6, 0, %v3610_v17  ;;  %v3617_v55 = vor.u32 %v3615_v9, %v3614_v0  ;;  %v3619_v28 = vshrl.u32 %v3559_v10, 16 }
 0x917   : > { %7487 = vmatpush3.bf16.msra.mxu0 %v8187_v40  ;;  %v3808_v52 = vshll.u32 %v11369_v19, 16  ;;  %v3803_v13 = vrot.slane %v3801_v63, 1  ;;  %v11377_v31 = vsel %vm10150_vm6, %v3607_v58, 0  ;;  %v3560_v14 = vpack.c.bf16 %v3537_v20, %v3536_v21 }
 0x918   : > { %7488 = vmatprep.subr.bf16.mxu0 %v8188_v36  ;;  %v3799_v18 = vor.u32 %v3798_v15, %v3794_v4  ;;  %v11388_v59 = vsel %vm10150_vm6, 0, %v3617_v55  ;;  %v3621_v40 = vrot.slane %v3619_v28, 7  ;;  %v3806_v47 = vshrl.u32 %v11369_v19, 16 }
 0x919   : > { %v3810_v25 = vrot.slane %v3808_v52, 1  ;;  %v3813_v37 = vshll.u32 %v11377_v31, 16  ;;  %v3622_v30 = vshll.u32 %v3559_v10, 16  ;;  %v3820_v48 = vshll.u32 %v11388_v59, 16 }
 0x91a   : > { %v11381_v6 = vsel %vm1584_vm7, %v3799_v18, %v3803_v13  ;;  %v3626_v5 = vshrl.u32 %v3560_v14, 16  ;;  %v11395_v35 = vsel %vm10150_vm6, %v3614_v0, 0  ;;  %v3818_v7 = vshrl.u32 %v11388_v59, 16 }
 0x91b   : > { %7489 = vmatpush3.bf16.msra.mxu0 %v8188_v36  ;;  %v3811_v11 = vor.u32 %v3810_v25, %v3806_v47  ;;  %v3624_v33 = vor.u32 %v3622_v30, %v3621_v40  ;;  %v3815_v34 = vrot.slane %v3813_v37, 1  ;;  %v3822_v49 = vrot.slane %v3820_v48, 1 }
 0x91c   : > { %7490 = vmatprep.subr.bf16.mxu0 %v8189_v43  ;;  %v3628_v62 = vrot.slane %v3626_v5, 7  ;;  %v3825_v36 = vshll.u32 %v11395_v35, 16  ;;  %v3629_v17 = vshll.u32 %v3560_v14, 16  ;;  %v3633_v0 = vshrl.u32 %v11257_v24, 16 }
 0x91d   : > { %5462 = vmatmul.mubr.bf16.gmra.mrb[76].mxu1 %v11326_v57  ;;  %4305 = vmatmul.mubr.bf16.gmra.mrb[16].mxu0 %v11326_v57  ;;  %v11399_v58 = vsel %vm1584_vm7, %v3811_v11, %v3815_v34  ;;  %v11406_v27 = vsel %vm10150_vm6, 0, %v3624_v33  ;;  %v3823_v60 = vor.u32 %v3822_v49, %v3818_v7  ;;  %v11414_v63 = vsel %vm10150_vm6, %v3621_v40, 0 }
 0x91e   : > { %5469 = vmatprep.mubr.bf16.mxu1 %v11381_v6  ;;  %4312 = vmatprep.mubr.bf16.mxu0 %v11381_v6  ;;  %v3832_v10 = vshll.u32 %v11406_v27, 16  ;;  %v3631_v15 = vor.u32 %v3629_v17, %v3628_v62  ;;  %v3827_v4 = vrot.slane %v3825_v36, 1  ;;  %v3635_v52 = vrot.slane %v3633_v0, 7 }
 0x91f   : > { %7491 = vmatpush3.bf16.msra.mxu0 %v8189_v43  ;;  %v3830_v8 = vshrl.u32 %v11406_v27, 16  ;;  %v3837_v21 = vshll.u32 %v11414_v63, 16  ;;  %v3636_v41 = vshll.u32 %v11257_v24, 16  ;;  %v3640_v13 = vshrl.u32 %v11275_v61, 16 }
 0x920   : > { %7492 = vmatprep.subr.bf16.mxu0 %v8190_v56  ;;  %v11418_v9 = vsel %vm1584_vm7, %v3823_v60, %v3827_v4  ;;  %v3834_v43 = vrot.slane %v3832_v10, 1  ;;  %v11425_v18 = vsel %vm10150_vm6, 0, %v3631_v15  ;;  %v11434_v25 = vsel %vm10150_vm6, %v3628_v62, 0 }
 0x921   : > { %v3844_v55 = vshll.u32 %v11425_v18, 16  ;;  %v3638_v28 = vor.u32 %v3636_v41, %v3635_v52  ;;  %v3642_v47 = vrot.slane %v3640_v13, 7  ;;  %v3842_v37 = vshrl.u32 %v11425_v18, 16 }
 0x922   : > { %v3835_v20 = vor.u32 %v3834_v43, %v3830_v8  ;;  %v3849_v30 = vshll.u32 %v11434_v25, 16  ;;  %v3647_v5 = vshrl.u32 %v11286_v38, 16  ;;  %v11454_v49 = vsel %vm10150_vm6, %v3635_v52, 0 }
 0x923   : > { %7493 = vmatpush3.bf16.msra.mxu0 %v8190_v56  ;;  %v3839_v56 = vrot.slane %v3837_v21, 1  ;;  %v3846_v40 = vrot.slane %v3844_v55, 1  ;;  %v11445_v24 = vsel %vm10150_vm6, 0, %v3638_v28  ;;  %v3861_v60 = vshll.u32 %v11454_v49, 16 }
 0x924   : > { %7124 = vmatprep.subr.bf16.mxu0 %v8191_v46  ;;  %v3643_v46 = vshll.u32 %v11275_v61, 16  ;;  %v3856_v48 = vshll.u32 %v11445_v24, 16  ;;  %v3851_v34 = vrot.slane %v3849_v30, 1  ;;  %v3649_v36 = vrot.slane %v3647_v5, 7 }
 0x925   : > { %5470 = vmatmul.mubr.bf16.gmra.mrb[80].mxu1 %v11349_v26  ;;  %4313 = vmatmul.mubr.bf16.gmra.mrb[20].mxu0 %v11349_v26  ;;  %v11438_v14 = vsel %vm1584_vm7, %v3835_v20, %v3839_v56  ;;  %v3847_v11 = vor.u32 %v3846_v40, %v3842_v37  ;;  %v3854_v17 = vshrl.u32 %v11445_v24, 16  ;;  %v3650_v10 = vshll.u32 %v11286_v38, 16 }
 0x926   : > { %5477 = vmatprep.mubr.bf16.mxu1 %v11399_v58  ;;  %4320 = vmatprep.mubr.bf16.mxu0 %v11399_v58  ;;  %v3645_v33 = vor.u32 %v3643_v46, %v3642_v47  ;;  %v3858_v7 = vrot.slane %v3856_v48, 1  ;;  %v3654_v43 = vshrl.u32 %v11294_v32, 16  ;;  %v3863_v52 = vrot.slane %v3861_v60, 1 }
 0x927   : > { %v11458_v62 = vsel %vm1584_vm7, %v3847_v11, %v3851_v34  ;;  %v3652_v4 = vor.u32 %v3650_v10, %v3649_v36  ;;  %v11474_v8 = vsel %vm10150_vm6, %v3642_v47, 0  ;;  %v3657_v13 = vshll.u32 %v11294_v32, 16 }
 0x928   : > { %v11465_v61 = vsel %vm10150_vm6, 0, %v3645_v33  ;;  %v3859_v15 = vor.u32 %v3858_v7, %v3854_v17  ;;  %v3656_v20 = vrot.slane %v3654_v43, 7  ;;  %v3873_v28 = vshll.u32 %v11474_v8, 16 }
 0x929   : > { %v3868_v0 = vshll.u32 %v11465_v61, 16  ;;  %v11485_v38 = vsel %vm10150_vm6, 0, %v3652_v4  ;;  %v3866_v55 = vshrl.u32 %v11465_v61, 16  ;;  %v3661_v37 = vshrl.u32 %v11298_v29, 16 }
 0x92a   : > { %v11478_v21 = vsel %vm1584_vm7, %v3859_v15, %v3863_v52  ;;  %v3880_v40 = vshll.u32 %v11485_v38, 16  ;;  %v3659_v47 = vor.u32 %v3657_v13, %v3656_v20  ;;  %v3875_v30 = vrot.slane %v3873_v28, 1 }
 0x92b   : > { %v3870_v41 = vrot.slane %v3868_v0, 1  ;;  %v11494_v46 = vsel %vm10150_vm6, %v3649_v36, 0  ;;  %v3663_v33 = vrot.slane %v3661_v37, 7  ;;  %v3878_v5 = vshrl.u32 %v11485_v38, 16 }
 0x92c   : > { %v3882_v48 = vrot.slane %v3880_v40, 1  ;;  %v11505_v32 = vsel %vm10150_vm6, 0, %v3659_v47  ;;  %v3885_v34 = vshll.u32 %v11494_v46, 16  ;;  %v3664_v7 = vshll.u32 %v11298_v29, 16 }
 0x92d   : > { %5478 = vmatmul.mubr.bf16.gmra.mrb[84].mxu1 %v11369_v19  ;;  %4321 = vmatmul.mubr.bf16.gmra.mrb[24].mxu0 %v11369_v19  ;;  %v3871_v56 = vor.u32 %v3870_v41, %v3866_v55  ;;  %v3892_v17 = vshll.u32 %v11505_v32, 16  ;;  %v3668_v10 = vshrl.u32 %v11315_v12, 16  ;;  %v11514_v0 = vsel %vm10150_vm6, %v3656_v20, 0 }
 0x92e   : > { %5485 = vmatprep.mubr.bf16.mxu1 %v11418_v9  ;;  %4328 = vmatprep.mubr.bf16.mxu0 %v11418_v9  ;;  %v3883_v36 = vor.u32 %v3882_v48, %v3878_v5  ;;  %v3666_v60 = vor.u32 %v3664_v7, %v3663_v33  ;;  %v3887_v15 = vrot.slane %v3885_v34, 1  ;;  %v3890_v41 = vshrl.u32 %v11505_v32, 16 }
 0x92f   : > { %v11498_v11 = vsel %vm1584_vm7, %v3871_v56, %v3875_v30  ;;  %v3894_v43 = vrot.slane %v3892_v17, 1  ;;  %v3670_v52 = vrot.slane %v3668_v10, 7  ;;  %v3897_v20 = vshll.u32 %v11514_v0, 16 }
 0x930   : > { %v11518_v4 = vsel %vm1584_vm7, %v3883_v36, %v3887_v15  ;;  %v11525_v29 = vsel %vm10150_vm6, 0, %v3666_v60  ;;  %v3671_v55 = vshll.u32 %v11315_v12, 16  ;;  %v3675_v40 = vshrl.u32 %v11332_v3, 16 }
 0x931   : > { %v3895_v28 = vor.u32 %v3894_v43, %v3890_v41  ;;  %v3904_v13 = vshll.u32 %v11525_v29, 16  ;;  %v3899_v47 = vrot.slane %v3897_v20, 1  ;;  %v11534_v37 = vsel %vm10150_vm6, %v3663_v33, 0 }
 0x932   : > { %v3673_v56 = vor.u32 %v3671_v55, %v3670_v52  ;;  %v3677_v5 = vrot.slane %v3675_v40, 7  ;;  %v3902_v33 = vshrl.u32 %v11525_v29, 16  ;;  %v3909_v34 = vshll.u32 %v11534_v37, 16 }
 0x933   : > { %v11538_v30 = vsel %vm1584_vm7, %v3895_v28, %v3899_v47  ;;  %v3906_v48 = vrot.slane %v3904_v13, 1  ;;  %v3678_v7 = vshll.u32 %v11332_v3, 16  ;;  %v11553_v15 = vsel %vm10150_vm6, %v3670_v52, 0 }
 0x934   : > { %v11545_v12 = vsel %vm10150_vm6, 0, %v3673_v56  ;;  %v3911_v10 = vrot.slane %v3909_v34, 1  ;;  %v3921_v52 = vshll.u32 %v11553_v15, 16  ;;  %v11571_v56 = vsel %vm10150_vm6, %v3677_v5, 0 }
 0x935   : > { %5486 = vmatmul.mubr.bf16.gmra.mrb[88].mxu1 %v11388_v59  ;;  %4329 = vmatmul.mubr.bf16.gmra.mrb[28].mxu0 %v11388_v59  ;;  %v3907_v36 = vor.u32 %v3906_v48, %v3902_v33  ;;  %v3916_v17 = vshll.u32 %v11545_v12, 16  ;;  %v3680_v60 = vor.u32 %v3678_v7, %v3677_v5  ;;  %v3914_v20 = vshrl.u32 %v11545_v12, 16 }
 0x936   : > { %5493 = vmatprep.mubr.bf16.mxu1 %v11438_v14  ;;  %4336 = vmatprep.mubr.bf16.mxu0 %v11438_v14  ;;  %v3923_v13 = vrot.slane %v3921_v52, 1  ;;  %v3933_v33 = vshll.u32 %v11571_v56, 16  ;;  %v3985_v7 = vrot.slane %v11226_v2, 1  ;;  %v3992_v52 = vrot.slane %v11302_v42, 1 }
 0x937   : > { %v11557_v43 = vsel %vm1584_vm7, %v3907_v36, %v3911_v10  ;;  %v3918_v41 = vrot.slane %v3916_v17, 1  ;;  %v11564_v3 = vsel %vm10150_vm6, 0, %v3680_v60  ;;  %v3986_v36 = vrot.slane %v11217_v53, 1 }
 0x938   : > { %v3928_v28 = vshll.u32 %v11564_v3, 16  ;;  %v3926_v48 = vshrl.u32 %v11564_v3, 16  ;;  %v3935_v39 = vrot.slane %v3933_v33, 1  ;;  %v3988_v60 = vrot.slane %v11270_v16, 1  ;;  %v8196_v33 = vld [vmem:[#allocation15 + $0x10] sm:$0xff]  }
 0x939   : > { %v3919_v55 = vor.u32 %v3918_v41, %v3914_v20  ;;  %v11590_v17 = vsel %vm1841_vm5, %v3985_v7, %v3986_v36  ;;  %v3991_v10 = vrot.slane %v11311_v1, 1  ;;  %v3989_v41 = vrot.slane %v11262_v22, 1  ;;  %v8192_v20 = vld [vmem:[#allocation15] sm:$0xff]   ;;  %v8198_v36 = vld [vmem:[#allocation15 + $0x18] sm:$0xff]  }
 0x93a   : > { %v3930_v47 = vrot.slane %v3928_v28, 1  ;;  %v3994_v22 = vrot.slane %v11326_v57, 1  ;;  %v3995_v42 = vrot.slane %v11330_v45, 1  ;;  %v8199_v45 = vld [vmem:[#allocation15 + $0x60] sm:$0xff]  }
 0x93b   : > { %v11575_v40 = vsel %vm1584_vm7, %v3919_v55, %v3923_v13  ;;  %v8193_v55 = vld [vmem:[#allocation15 + $0x48] sm:$0xff]   ;;  %v11598_v53 = vsel %vm1841_vm5, %v3988_v60, %v3989_v41  ;;  %v11602_v28 = vsel %vm1841_vm5, %v3991_v10, %v3992_v52  ;;  %v4000_v60 = vrot.slane %v11369_v19, 1  ;;  %v8200_v41 = vld [vmem:[#allocation15 + $0x20] sm:$0xff]  }
 0x93c   : > { %v3931_v34 = vor.u32 %v3930_v47, %v3926_v48  ;;  %v8194_v13 = vld [vmem:[#allocation15 + $0x8] sm:$0xff]   ;;  %v8195_v47 = vld [vmem:[#allocation15 + $0x50] sm:$0xff]   ;;  %v3997_v48 = vrot.slane %v11349_v26, 1  ;;  %v4001_v10 = vrot.slane %v11377_v31, 1 }
 0x93d   : > { %5494 = vmatmul.mubr.bf16.gmra.mrb[92].mxu1 %v11406_v27  ;;  %4337 = vmatmul.mubr.bf16.gmra.mrb[32].mxu0 %v11406_v27  ;;  %v8201_v52 = vld [vmem:[#allocation15 + $0x68] sm:$0xff]   ;;  %v8203_v31 = vld [vmem:[#allocation15 + $0x70] sm:$0xff]  }
 0x93e   : > { %5501 = vmatprep.mubr.bf16.mxu1 %v11458_v62  ;;  %4344 = vmatprep.mubr.bf16.mxu0 %v11458_v62  ;;  %v3936_v5 = vsel %vm1584_vm7, %v3931_v34, %v3935_v39  ;;  %v3998_v34 = vrot.slane %v11355_v51, 1  ;;  %v8197_v39 = vld [vmem:[#allocation15 + $0x58] sm:$0xff]   ;;  %v4003_v51 = vrot.slane %v11388_v59, 1 }
 0x940   : > { %v11614_v7 = vsel %vm1841_vm5, %v3997_v48, %v3998_v34  ;;  %v4007_v48 = vrot.slane %v11414_v63, 1  ;;  %v8205_v34 = vld [vmem:[#allocation15 + $0x78] sm:$0xff]   ;;  %v4012_v63 = vrot.slane %v11445_v24, 1 }
 0x945   : > { %5502 = vmatmul.mubr.bf16.gmra.mrb[96].mxu1 %v11425_v18  ;;  %4345 = vmatmul.mubr.bf16.gmra.mrb[36].mxu0 %v11425_v18 }
 0x946   : > { %5509 = vmatprep.mubr.bf16.mxu1 %v11478_v21  ;;  %4352 = vmatprep.mubr.bf16.mxu0 %v11478_v21 }
 0x94d   : > { %5510 = vmatmul.mubr.bf16.gmra.mrb[100].mxu1 %v11445_v24  ;;  %4353 = vmatmul.mubr.bf16.gmra.mrb[40].mxu0 %v11445_v24 }
 0x94e   : > { %5517 = vmatprep.mubr.bf16.mxu1 %v11498_v11  ;;  %4360 = vmatprep.mubr.bf16.mxu0 %v11498_v11 }
 0x955   : > { %5518 = vmatmul.mubr.bf16.gmra.mrb[104].mxu1 %v11465_v61  ;;  %4361 = vmatmul.mubr.bf16.gmra.mrb[44].mxu0 %v11465_v61 }
 0x956   : > { %5525 = vmatprep.mubr.bf16.mxu1 %v11518_v4  ;;  %4368 = vmatprep.mubr.bf16.mxu0 %v11518_v4 }
 0x95d   : > { %5526 = vmatmul.mubr.bf16.gmra.mrb[108].mxu1 %v11485_v38  ;;  %4369 = vmatmul.mubr.bf16.gmra.mrb[48].mxu0 %v11485_v38 }
 0x95e   : > { %5533 = vmatprep.mubr.bf16.mxu1 %v11538_v30  ;;  %4376 = vmatprep.mubr.bf16.mxu0 %v11538_v30 }
 0x965   : > { %5534 = vmatmul.mubr.bf16.gmra.mrb[112].mxu1 %v11505_v32  ;;  %4377 = vmatmul.mubr.bf16.gmra.mrb[52].mxu0 %v11505_v32 }
 0x966   : > { %5541 = vmatprep.mubr.bf16.mxu1 %v11557_v43  ;;  %4384 = vmatprep.mubr.bf16.mxu0 %v11557_v43 }
 0x96d   : > { %5542 = vmatmul.mubr.bf16.gmra.mrb[116].mxu1 %v11525_v29  ;;  %4385 = vmatmul.mubr.bf16.gmra.mrb[56].mxu0 %v11525_v29 }
 0x96e   : > { %5549 = vmatprep.mubr.bf16.mxu1 %v11575_v40  ;;  %4392 = vmatprep.mubr.bf16.mxu0 %v11575_v40 }
 0x975   : > { %5550 = vmatmul.mubr.bf16.gmra.mrb[120].mxu1 %v11545_v12  ;;  %4393 = vmatmul.mubr.bf16.gmra.mrb[60].mxu0 %v11545_v12 }
 0x976   : > { %5557 = vmatprep.mubr.bf16.mxu1 %v3936_v5  ;;  %4400 = vmatprep.mubr.bf16.mxu0 %v3936_v5  ;;  %v11610_v5 = vsel %vm1841_vm5, %v3994_v22, %v3995_v42  ;;  %v4006_v22 = vrot.slane %v11406_v27, 1  ;;  %v8204_v42 = vld [vmem:[#allocation15 + $0x30] sm:$0xff]  }
 0x97d   : > { %5558 = vmatmul.mubr.bf16.gmra.mrb[124].mxu1 %v11564_v3  ;;  %4401 = vmatmul.mubr.bf16.gmra.mrb[64].mxu0 %v11564_v3 }
 0x97e   : > { %7494 = vmatprep.mubr.bf16.mxu0 %v11590_v17 }
 0x985   : > { %7495 = vmatmul.mubr.bf16.vlgmr.msra.gmra.mrb[68].mxu0 %v11598_v53 }
 0x986   : > { %7125 = vmatpush3.bf16.msra.mxu0 %v8192_v20  ;;  %7498 = vmatprep.mubr.bf16.mxu0 %v11602_v28  ;;  %v4004_v20 = vrot.slane %v11395_v35, 1  ;;  %v4009_v35 = vrot.slane %v11425_v18, 1 }
 0x987   : > { %7126 = vmatprep.subr.bf16.mxu0 %v8193_v55  ;;  %v11622_v55 = vsel %vm1841_vm5, %v4000_v60, %v4001_v10  ;;  %v4015_v60 = vrot.slane %v11465_v61, 1  ;;  %v12765_v10 = vmov 0.0  }
 0x98a   : > { %7127 = vmatpush3.bf16.msra.mxu0 %v8194_v13  ;;  %v11626_v13 = vsel %vm1841_vm5, %v4003_v51, %v4004_v20  ;;  %v4016_v51 = vrot.slane %v11474_v8, 1  ;;  %v4022_v8 = vrot.slane %v11514_v0, 1 }
 0x98b   : > { %7128 = vmatprep.subr.bf16.mxu0 %v8195_v47  ;;  %v8202_v47 = vld [vmem:[#allocation15 + $0x28] sm:$0xff]  }
 0x98c   : > { %v11651_v20 = vsel %vm1841_vm5, %v4015_v60, %v4016_v51 }
 0x98d   : > { %7499 = vmatmul.mubr.bf16.gmra.mrb[72].mxu0 %v11610_v5 }
 0x98e   : > { %7502 = vmatprep.mubr.bf16.mxu0 %v11614_v7  ;;  %7129 = vmatpush3.bf16.msra.mxu0 %v8196_v33  ;;  %v4010_v33 = vrot.slane %v11434_v25, 1  ;;  %v4013_v25 = vrot.slane %v11454_v49, 1  ;;  %v4019_v49 = vrot.slane %v11494_v46, 1  ;;  %v4028_v46 = vrot.slane %v11553_v15, 1  ;;  %v8208_v15 = vld [vmem:[#allocation15 + $0x88] sm:$0xff]  }
 0x98f   : > { %7130 = vmatprep.subr.bf16.mxu0 %v8197_v39  ;;  %v11634_v39 = vsel %vm1841_vm5, %v4006_v22, %v4007_v48  ;;  %v4027_v48 = vrot.slane %v11545_v12, 1 }
 0x992   : > { %7131 = vmatpush3.bf16.msra.mxu0 %v8198_v36  ;;  %v11638_v36 = vsel %vm1841_vm5, %v4009_v35, %v4010_v33  ;;  %v4024_v35 = vrot.slane %v11525_v29, 1  ;;  %v11675_v33 = vsel %vm1841_vm5, %v4027_v48, %v4028_v46 }
 0x993   : > { %7132 = vmatprep.subr.bf16.mxu0 %v8199_v45  ;;  %v8206_v45 = vld [vmem:[#allocation15 + $0x38] sm:$0xff]  }
 0x995   : > { %7503 = vmatmul.mubr.bf16.gmra.mrb[76].mxu0 %v11622_v55 }
 0x996   : > { %7506 = vmatprep.mubr.bf16.mxu0 %v11626_v13  ;;  %7133 = vmatpush3.bf16.msra.mxu0 %v8200_v41  ;;  %v11647_v41 = vsel %vm1841_vm5, %v4012_v63, %v4013_v25 }
 0x997   : > { %7134 = vmatprep.subr.bf16.mxu0 %v8201_v52  ;;  %v4018_v52 = vrot.slane %v11485_v38, 1 }
 0x99a   : > { %7135 = vmatpush3.bf16.msra.mxu0 %v8202_v47  ;;  %v4021_v47 = vrot.slane %v11505_v32, 1 }
 0x99b   : > { %7136 = vmatprep.subr.bf16.mxu0 %v8203_v31  ;;  %v11659_v31 = vsel %vm1841_vm5, %v4018_v52, %v4019_v49  ;;  %v8213_v52 = vld [vmem:[#allocation15 + $0xb0] sm:$0xff]  }
 0x99c   : > { %v11663_v22 = vsel %vm1841_vm5, %v4021_v47, %v4022_v8 }
 0x99d   : > { %7507 = vmatmul.mubr.bf16.gmra.mrb[80].mxu0 %v11634_v39 }
 0x99e   : > { %7510 = vmatprep.mubr.bf16.mxu0 %v11638_v36  ;;  %7137 = vmatpush3.bf16.msra.mxu0 %v8204_v42  ;;  %v4025_v42 = vrot.slane %v11534_v37, 1  ;;  %v8207_v37 = vld [vmem:[#allocation15 + $0x80] sm:$0xff]  }
 0x99f   : > { %7138 = vmatprep.subr.bf16.mxu0 %v8205_v34  ;;  %v4030_v34 = vrot.slane %v11564_v3, 1  ;;  %v8209_v3 = vld [vmem:[#allocation15 + $0x90] sm:$0xff]  }
 0x9a0   : > { %v11671_v0 = vsel %vm1841_vm5, %v4024_v35, %v4025_v42 }
 0x9a2   : > { %7139 = vmatpush3.bf16.msra.mxu0 %v8206_v45  ;;  %v4031_v45 = vrot.slane %v11571_v56, 1  ;;  %v8210_v56 = vld [vmem:[#allocation15 + $0x98] sm:$0xff]  }
 0x9a3   : > { %7526 = vmatprep.subr.bf16.mxu0 %v12765_v10 }
 0x9a4   : > { %v11681_v63 = vsel %vm1841_vm5, %v4030_v34, %v4031_v45 }
 0x9a5   : > { %7511 = vmatmul.mubr.bf16.gmra.mrb[84].mxu0 %v11647_v41 }
 0x9a6   : > { %7514 = vmatprep.mubr.bf16.mxu0 %v11651_v20 }
 0x9ad   : > { %7515 = vmatmul.mubr.bf16.gmra.mrb[88].mxu0 %v11659_v31 }
 0x9ae   : > { %7518 = vmatprep.mubr.bf16.mxu0 %v11663_v22 }
 0x9b5   : > { %7519 = vmatmul.mubr.bf16.gmra.mrb[92].mxu0 %v11671_v0 }
 0x9b6   : > { %7522 = vmatprep.mubr.bf16.mxu0 %v11675_v33 }
 0x9bd   : > { %7523 = vmatmul.mubr.bf16.gmra.mrb[96].mxu0 %v11681_v63 }
 0x9be   : > { %4856 = vmatprep.mubr.bf16.mxu0 %v11253_v50 }
 0x9c5   : > { %4857 = vmatmul.mubr.bf16.vlgmr.msra.gmra.mrb[100].mxu0 %v11226_v2  ;;  %v8211_v2 = vld [vmem:[#allocation15 + $0xa0] sm:$0xff]  }
 0x9c6   : > { %7527 = vmatpush3.bf16.msra.mxu0 %v8207_v37  ;;  %4864 = vmatprep.mubr.bf16.mxu0 %v11307_v23  ;;  %v8212_v23 = vld [vmem:[#allocation15 + $0xa8] sm:$0xff]  }
 0x9c7   : > { %7528 = vmatprep.subr.bf16.mxu0 %v12765_v10  ;;  %v8218_v37 = vld [vmem:[#allocation24] sm:$0xff]  }
 0x9c8   : > { %7678 = vmatprep.subr.bf16.mxu1 %v8218_v37 }
 0x9c9   : > { %7679 = vmatpush3.bf16.msra.mxu1 %v8218_v37 }
 0x9ca   : > { %7529 = vmatpush3.bf16.msra.mxu0 %v8208_v15 }
 0x9cb   : > { %7530 = vmatprep.subr.bf16.mxu0 %v12765_v10 }
 0x9cd   : > { %4865 = vmatmul.mubr.bf16.gmra.mrb[104].mxu0 %v11270_v16 }
 0x9ce   : > { %4872 = vmatprep.mubr.bf16.mxu0 %v11345_v54  ;;  %7531 = vmatpush3.bf16.msra.mxu0 %v8209_v3 }
 0x9cf   : > { %7532 = vmatprep.subr.bf16.mxu0 %v12765_v10 }
 0x9d2   : > { %7533 = vmatpush3.bf16.msra.mxu0 %v8210_v56 }
 0x9d3   : > { %7534 = vmatprep.subr.bf16.mxu0 %v12765_v10 }
 0x9d5   : > { %4873 = vmatmul.mubr.bf16.gmra.mrb[108].mxu0 %v11311_v1  ;;  %v8214_v1 = vld [vmem:[#allocation15 + $0xb8] sm:$0xff]  }
 0x9d6   : > { %4880 = vmatprep.mubr.bf16.mxu0 %v11360_v44  ;;  %v7004_v50 = vpop.f32.mrb[4].mxu0  ;;  %7535 = vmatpush3.bf16.msra.mxu0 %v8211_v2 }
 0x9d7   : > { %v7005_v60 = vpop.f32.mrb[5].mxu0  ;;  %7536 = vmatprep.subr.bf16.mxu0 %v12765_v10 }
 0x9d8   : > { %v11696_v16 = vadd.f32 %v7005_v60, %v7004_v50  ;;  %v7007_v54 = vpop.f32.mrb[6].mxu0 }
 0x9d9   : > { %v7008_v25 = vpop.f32.mrb[7].mxu0 }
 0x9da   : > { %v11698_v51 = vadd.f32 %v7008_v25, %v7007_v54  ;;  %7537 = vmatpush3.bf16.msra.mxu0 %v8212_v23 }
 0x9db   : > { %7538 = vmatprep.subr.bf16.mxu0 %v12765_v10 }
 0x9dd   : > { %4881 = vmatmul.mubr.bf16.gmra.mrb[112].mxu0 %v11326_v57 }
 0x9de   : > { %4888 = vmatprep.mubr.bf16.mxu0 %v11381_v6  ;;  %7539 = vmatpush3.bf16.msra.mxu0 %v8213_v52 }
 0x9df   : > { %7540 = vmatprep.subr.bf16.mxu0 %v12765_v10 }
 0x9e0   : > { %v7269_v44 = vpop.f32.mrb[68].mxu1  ;;  %v7010_v47 = vpop.f32.mrb[8].mxu0 }
 0x9e1   : > { %v7270_v49 = vpop.f32.mrb[69].mxu1  ;;  %v7011_v8 = vpop.f32.mrb[9].mxu0 }
 0x9e2   : > { %v11704_v35 = vadd.f32 %v7270_v49, %v7269_v44  ;;  %v7272_v48 = vpop.f32.mrb[70].mxu1  ;;  %v11706_v42 = vadd.f32 %v7011_v8, %v7010_v47  ;;  %v7013_v46 = vpop.f32.mrb[10].mxu0  ;;  %7541 = vmatpush3.bf16.msra.mxu0 %v8214_v1  ;;  %v8220_v44 = vld [vmem:[#allocation24 + $0x8] sm:$0xff]  }
 0x9e3   : > { %v7273_v34 = vpop.f32.mrb[71].mxu1  ;;  %v7014_v45 = vpop.f32.mrb[11].mxu0  ;;  %7602 = vmatprep.subr.bf16.mxu0 %v12765_v10  ;;  %7680 = vmatprep.subr.bf16.mxu1 %v8220_v44 }
 0x9e4   : > { %12766 = vst [vmem:[#allocation49_spill] sm:$0xff] %v11704_v35  ;;  %v11709_v57 = vadd.f32 %v7273_v34, %v7272_v48  ;;  %v11711_v6 = vadd.f32 %v7014_v45, %v7013_v46  ;;  %7681 = vmatpush3.bf16.msra.mxu1 %v8220_v44 }
 0x9e5   : > { %4889 = vmatmul.mubr.bf16.gmra.mrb[116].mxu0 %v11349_v26 }
 0x9e6   : > { %12767 = vst [vmem:[#allocation54_spill] sm:$0xff] %v11709_v57  ;;  %4896 = vmatprep.mubr.bf16.mxu0 %v11399_v58  ;;  %v8221_v58 = vld [vmem:[#allocation24 + $0x10] sm:$0xff]  }
 0x9e7   : > { %7682 = vmatprep.subr.bf16.mxu1 %v8221_v58 }
 0x9e8   : > { %v7275_v15 = vpop.f32.mrb[72].mxu1  ;;  %v7016_v3 = vpop.f32.mrb[12].mxu0  ;;  %7683 = vmatpush3.bf16.msra.mxu1 %v8221_v58 }
 0x9e9   : > { %v7276_v56 = vpop.f32.mrb[73].mxu1  ;;  %v7017_v2 = vpop.f32.mrb[13].mxu0 }
 0x9ea   : > { %v11715_v50 = vadd.f32 %v7276_v56, %v7275_v15  ;;  %v7278_v23 = vpop.f32.mrb[74].mxu1  ;;  %v11717_v60 = vadd.f32 %v7017_v2, %v7016_v3  ;;  %v7019_v54 = vpop.f32.mrb[14].mxu0  ;;  %v8222_v56 = vld [vmem:[#allocation24 + $0x18] sm:$0xff]  }
 0x9eb   : > { %v7279_v25 = vpop.f32.mrb[75].mxu1  ;;  %v7020_v52 = vpop.f32.mrb[15].mxu0  ;;  %v8519_v2 = vld [vmem:[%s9590_s19] sm:$0xff]   ;;  %7684 = vmatprep.subr.bf16.mxu1 %v8222_v56 }
 0x9ec   : > { %12768 = vst [vmem:[#allocation55_spill] sm:$0xff] %v11715_v50  ;;  %v11719_v1 = vadd.f32 %v7279_v25, %v7278_v23  ;;  %v11721_v26 = vadd.f32 %v7020_v52, %v7019_v54  ;;  %v8520_v23 = vld [vmem:[%s9590_s19 + $0x8] sm:$0xff]   ;;  %7685 = vmatpush3.bf16.msra.mxu1 %v8222_v56  ;;  %7686 = vmatprep.mubr.msk.bf16.mxu1 %vm781_vm1, %v8519_v2 }
 0x9ed   : > { %4897 = vmatmul.mubr.bf16.gmra.mrb[120].mxu0 %v11369_v19 }
 0x9ee   : > { %12769 = vst [vmem:[#allocation52_spill] sm:$0xff] %v11719_v1  ;;  %4904 = vmatprep.mubr.bf16.mxu0 %v11418_v9  ;;  %v11896_v1 = vld [vmem:[#allocation17] ss:$0 sm:$0xff] }
 0x9ef   : > { %7687 = vmatmul.mubr.msk.bf16.vlgmr.msra.gmra.mrb[128].mxu1 %vm781_vm1, %v8520_v23 }
 0x9f0   : > { %v7281_v47 = vpop.f32.mrb[76].mxu1  ;;  %v7022_v49 = vpop.f32.mrb[16].mxu0 }
 0x9f1   : > { %v7282_v8 = vpop.f32.mrb[77].mxu1  ;;  %v7023_v48 = vpop.f32.mrb[17].mxu0 }
 0x9f2   : > { %v11725_v46 = vadd.f32 %v7282_v8, %v7281_v47  ;;  %v7284_v34 = vpop.f32.mrb[78].mxu1  ;;  %v11727_v45 = vadd.f32 %v7023_v48, %v7022_v49  ;;  %v7025_v37 = vpop.f32.mrb[18].mxu0 }
 0x9f3   : > { %v7285_v15 = vpop.f32.mrb[79].mxu1  ;;  %v7026_v19 = vpop.f32.mrb[19].mxu0 }
 0x9f4   : > { %12770 = vst [vmem:[#allocation53_spill] sm:$0xff] %v11725_v46  ;;  %v11729_v3 = vadd.f32 %v7285_v15, %v7284_v34  ;;  %v11731_v9 = vadd.f32 %v7026_v19, %v7025_v37  ;;  %v8521_v37 = vld [vmem:[%s9590_s19 + $0x10] sm:$0xff]   ;;  %v8522_v15 = vld [vmem:[%s9590_s19 + $0x18] sm:$0xff]  }
 0x9f5   : > { %4905 = vmatmul.mubr.bf16.gmra.mrb[124].mxu0 %v11388_v59  ;;  %7690 = vmatprep.mubr.msk.bf16.mxu1 %vm781_vm1, %v8521_v37 }
 0x9f6   : > { %12771 = vst [vmem:[#allocation58_spill] sm:$0xff] %v11729_v3  ;;  %4912 = vmatprep.mubr.bf16.mxu0 %v11438_v14 }
 0x9f7   : > { %7691 = vmatmul.mubr.msk.bf16.gmra.mrb[132].mxu1 %vm781_vm1, %v8522_v15 }
 0x9f8   : > { %v7287_v54 = vpop.f32.mrb[80].mxu1  ;;  %v7028_v25 = vpop.f32.mrb[20].mxu0 }
 0x9f9   : > { %v7288_v52 = vpop.f32.mrb[81].mxu1  ;;  %v7029_v44 = vpop.f32.mrb[21].mxu0 }
 0x9fa   : > { %v11738_v58 = vadd.f32 %v7288_v52, %v7287_v54  ;;  %v7290_v47 = vpop.f32.mrb[82].mxu1  ;;  %v11740_v49 = vadd.f32 %v7029_v44, %v7028_v25  ;;  %v7031_v59 = vpop.f32.mrb[22].mxu0 }
 0x9fb   : > { %v7291_v14 = vpop.f32.mrb[83].mxu1  ;;  %v7032_v8 = vpop.f32.mrb[23].mxu0 }
 0x9fc   : > { %12772 = vst [vmem:[#allocation59_spill] sm:$0xff] %v11738_v58  ;;  %v11743_v48 = vadd.f32 %v7291_v14, %v7290_v47  ;;  %v11745_v34 = vadd.f32 %v7032_v8, %v7031_v59  ;;  %v8523_v14 = vld [vmem:[%s9590_s19 + $0x20] sm:$0xff]   ;;  %v8524_v8 = vld [vmem:[%s9590_s19 + $0x28] sm:$0xff]  }
 0x9fd   : > { %4913 = vmatmul.mubr.bf16.gmra.mrb[128].mxu0 %v11406_v27  ;;  %7694 = vmatprep.mubr.msk.bf16.mxu1 %vm781_vm1, %v8523_v14  ;;  %v8525_v14 = vld [vmem:[%s9590_s19 + $0x30] sm:$0xff]  }
 0x9fe   : > { %12773 = vst [vmem:[#allocation56_spill] sm:$0xff] %v11743_v48  ;;  %4920 = vmatprep.mubr.bf16.mxu0 %v11458_v62 }
 0x9ff   : > { %7695 = vmatmul.mubr.msk.bf16.gmra.mrb[136].mxu1 %vm781_vm1, %v8524_v8 }
 0xa00   : > { %v7293_v19 = vpop.f32.mrb[84].mxu1  ;;  %v7034_v56 = vpop.f32.mrb[24].mxu0  ;;  %7698 = vmatprep.mubr.msk.bf16.mxu1 %vm781_vm1, %v8525_v14  ;;  %v8527_v14 = vld [vmem:[%s9590_s19 + $0x40] sm:$0xff]  }
 0xa01   : > { %v7294_v2 = vpop.f32.mrb[85].mxu1  ;;  %v7035_v23 = vpop.f32.mrb[25].mxu0 }
 0xa02   : > { %v11752_v54 = vadd.f32 %v7294_v2, %v7293_v19  ;;  %v7296_v25 = vpop.f32.mrb[86].mxu1  ;;  %v11754_v52 = vadd.f32 %v7035_v23, %v7034_v56  ;;  %v7037_v44 = vpop.f32.mrb[26].mxu0 }
 0xa03   : > { %v7297_v27 = vpop.f32.mrb[87].mxu1  ;;  %v7038_v47 = vpop.f32.mrb[27].mxu0 }
 0xa04   : > { %12774 = vst [vmem:[#allocation57_spill] sm:$0xff] %v11752_v54  ;;  %v11757_v62 = vadd.f32 %v7297_v27, %v7296_v25  ;;  %v11759_v59 = vadd.f32 %v7038_v47, %v7037_v44 }
 0xa05   : > { %4921 = vmatmul.mubr.bf16.gmra.mrb[132].mxu0 %v11425_v18 }
 0xa06   : > { %12775 = vst [vmem:[#allocation62_spill] sm:$0xff] %v11757_v62  ;;  %4928 = vmatprep.mubr.bf16.mxu0 %v11478_v21  ;;  %v8526_v62 = vld [vmem:[%s9590_s19 + $0x38] sm:$0xff]  }
 0xa07   : > { %7699 = vmatmul.mubr.msk.bf16.gmra.mrb[140].mxu1 %vm781_vm1, %v8526_v62 }
 0xa08   : > { %v7299_v37 = vpop.f32.mrb[88].mxu1  ;;  %v7040_v19 = vpop.f32.mrb[28].mxu0  ;;  %7702 = vmatprep.mubr.msk.bf16.mxu1 %vm781_vm1, %v8527_v14  ;;  %v8529_v14 = vld [vmem:[%s9590_s19 + $0x50] sm:$0xff]  }
 0xa09   : > { %v7300_v56 = vpop.f32.mrb[89].mxu1  ;;  %v7041_v15 = vpop.f32.mrb[29].mxu0 }
 0xa0a   : > { %v11766_v2 = vadd.f32 %v7300_v56, %v7299_v37  ;;  %v7302_v23 = vpop.f32.mrb[90].mxu1  ;;  %v11768_v25 = vadd.f32 %v7041_v15, %v7040_v19  ;;  %v7043_v44 = vpop.f32.mrb[30].mxu0 }
 0xa0b   : > { %v7303_v18 = vpop.f32.mrb[91].mxu1  ;;  %v7044_v27 = vpop.f32.mrb[31].mxu0 }
 0xa0c   : > { %12776 = vst [vmem:[#allocation63_spill] sm:$0xff] %v11766_v2  ;;  %v11771_v21 = vadd.f32 %v7303_v18, %v7302_v23  ;;  %v11773_v47 = vadd.f32 %v7044_v27, %v7043_v44  ;;  %v8528_v2 = vld [vmem:[%s9590_s19 + $0x48] sm:$0xff]  }
 0xa0d   : > { %4929 = vmatmul.mubr.bf16.gmra.mrb[136].mxu0 %v11445_v24 }
 0xa0e   : > { %12777 = vst [vmem:[#allocation60_spill] sm:$0xff] %v11771_v21  ;;  %4936 = vmatprep.mubr.bf16.mxu0 %v11498_v11 }
 0xa0f   : > { %7703 = vmatmul.mubr.msk.bf16.gmra.mrb[144].mxu1 %vm781_vm1, %v8528_v2 }
 0xa10   : > { %v7305_v37 = vpop.f32.mrb[92].mxu1  ;;  %v7046_v19 = vpop.f32.mrb[32].mxu0  ;;  %7706 = vmatprep.mubr.msk.bf16.mxu1 %vm781_vm1, %v8529_v14  ;;  %v8531_v14 = vld [vmem:[%s9590_s19 + $0x60] sm:$0xff]  }
 0xa11   : > { %v7306_v56 = vpop.f32.mrb[93].mxu1  ;;  %v7047_v8 = vpop.f32.mrb[33].mxu0 }
 0xa12   : > { %v11780_v15 = vadd.f32 %v7306_v56, %v7305_v37  ;;  %v7308_v23 = vpop.f32.mrb[94].mxu1  ;;  %v11782_v18 = vadd.f32 %v7047_v8, %v7046_v19  ;;  %v7049_v44 = vpop.f32.mrb[34].mxu0 }
 0xa13   : > { %v7309_v24 = vpop.f32.mrb[95].mxu1  ;;  %v7050_v27 = vpop.f32.mrb[35].mxu0 }
 0xa14   : > { %12778 = vst [vmem:[#allocation61_spill] sm:$0xff] %v11780_v15  ;;  %v11785_v11 = vadd.f32 %v7309_v24, %v7308_v23  ;;  %v11787_v21 = vadd.f32 %v7050_v27, %v7049_v44  ;;  %v8530_v15 = vld [vmem:[%s9590_s19 + $0x58] sm:$0xff]  }
 0xa15   : > { %4937 = vmatmul.mubr.bf16.gmra.mrb[140].mxu0 %v11465_v61 }
 0xa16   : > { %12779 = vst [vmem:[#allocation66_spill] sm:$0xff] %v11785_v11  ;;  %4944 = vmatprep.mubr.bf16.mxu0 %v11518_v4 }
 0xa17   : > { %7707 = vmatmul.mubr.msk.bf16.gmra.mrb[148].mxu1 %vm781_vm1, %v8530_v15 }
 0xa18   : > { %v7311_v37 = vpop.f32.mrb[96].mxu1  ;;  %v7052_v19 = vpop.f32.mrb[36].mxu0  ;;  %7710 = vmatprep.mubr.msk.bf16.mxu1 %vm781_vm1, %v8531_v14  ;;  %v8533_v14 = vld [vmem:[%s9590_s19 + $0x70] sm:$0xff]  }
 0xa19   : > { %v7312_v56 = vpop.f32.mrb[97].mxu1  ;;  %v7053_v62 = vpop.f32.mrb[37].mxu0 }
 0xa1a   : > { %v11794_v8 = vadd.f32 %v7312_v56, %v7311_v37  ;;  %v7314_v23 = vpop.f32.mrb[98].mxu1  ;;  %v11796_v24 = vadd.f32 %v7053_v62, %v7052_v19  ;;  %v7055_v44 = vpop.f32.mrb[38].mxu0 }
 0xa1b   : > { %v7315_v61 = vpop.f32.mrb[99].mxu1  ;;  %v7056_v27 = vpop.f32.mrb[39].mxu0 }
 0xa1c   : > { %12780 = vst [vmem:[#allocation64_spill] sm:$0xff] %v11794_v8  ;;  %v11799_v4 = vadd.f32 %v7315_v61, %v7314_v23  ;;  %v11801_v11 = vadd.f32 %v7056_v27, %v7055_v44  ;;  %v8532_v8 = vld [vmem:[%s9590_s19 + $0x68] sm:$0xff]  }
 0xa1d   : > { %4945 = vmatmul.mubr.bf16.gmra.mrb[144].mxu0 %v11485_v38 }
 0xa1e   : > { %12781 = vst [vmem:[#allocation65_spill] sm:$0xff] %v11799_v4  ;;  %4952 = vmatprep.mubr.bf16.mxu0 %v11538_v30 }
 0xa1f   : > { %7711 = vmatmul.mubr.msk.bf16.gmra.mrb[152].mxu1 %vm781_vm1, %v8532_v8 }
 0xa20   : > { %v7317_v37 = vpop.f32.mrb[100].mxu1  ;;  %v7058_v19 = vpop.f32.mrb[40].mxu0  ;;  %7714 = vmatprep.mubr.msk.bf16.mxu1 %vm781_vm1, %v8533_v14 }
 0xa21   : > { %v7318_v56 = vpop.f32.mrb[101].mxu1  ;;  %v7059_v2 = vpop.f32.mrb[41].mxu0 }
 0xa22   : > { %v11808_v62 = vadd.f32 %v7318_v56, %v7317_v37  ;;  %v7320_v23 = vpop.f32.mrb[102].mxu1  ;;  %v11810_v61 = vadd.f32 %v7059_v2, %v7058_v19  ;;  %v7061_v44 = vpop.f32.mrb[42].mxu0 }
 0xa23   : > { %v7321_v38 = vpop.f32.mrb[103].mxu1  ;;  %v7062_v27 = vpop.f32.mrb[43].mxu0 }
 0xa24   : > { %12782 = vst [vmem:[#allocation68_spill] sm:$0xff] %v11808_v62  ;;  %v11813_v30 = vadd.f32 %v7321_v38, %v7320_v23  ;;  %v11815_v4 = vadd.f32 %v7062_v27, %v7061_v44  ;;  %v8534_v62 = vld [vmem:[%s9590_s19 + $0x78] sm:$0xff]   ;;  %s8963_s19 = scalar_lea.vmem %s8962_s25, 4096 }
 0xa25   : > { %4953 = vmatmul.mubr.bf16.gmra.mrb[148].mxu0 %v11505_v32  ;;  %p8965_p7 = scmp.lt.s32.totalorder %s8963_s19, %s8957_s29 }
 0xa26   : > { %12783 = vst [vmem:[#allocation42_spill] sm:$0xff] %v11813_v30  ;;  %4960 = vmatprep.mubr.bf16.mxu0 %v11557_v43 }
 0xa27   : > { %7715 = vmatmul.mubr.msk.bf16.gmra.mrb[156].mxu1 %vm781_vm1, %v8534_v62  ;;  %p8966_p6 = por %p8965_p7, %p8964_p5 }
 0xa28   : > { %v7323_v37 = vpop.f32.mrb[104].mxu1  ;;  %v7064_v19 = vpop.f32.mrb[44].mxu0 }
 0xa29   : > { %v7324_v56 = vpop.f32.mrb[105].mxu1  ;;  %v7065_v15 = vpop.f32.mrb[45].mxu0  ;;  %p8967_p9 = pnand %p8966_p6, %p8960_p3 }
 0xa2a   : > { %v11822_v2 = vadd.f32 %v7324_v56, %v7323_v37  ;;  %v7326_v23 = vpop.f32.mrb[106].mxu1  ;;  %v11824_v38 = vadd.f32 %v7065_v15, %v7064_v19  ;;  %v7067_v44 = vpop.f32.mrb[46].mxu0 }
 0xa2b   : > { %v7327_v32 = vpop.f32.mrb[107].mxu1  ;;  %v7068_v27 = vpop.f32.mrb[47].mxu0 }
 0xa2c   : > { %12784 = vst [vmem:[#allocation69_spill] sm:$0xff] %v11822_v2  ;;  %v11827_v43 = vadd.f32 %v7327_v32, %v7326_v23  ;;  %v11829_v30 = vadd.f32 %v7068_v27, %v7067_v44 }
 0xa2d   : > { %4961 = vmatmul.mubr.bf16.gmra.mrb[152].mxu0 %v11525_v29 }
 0xa2e   : > { %12785 = vst [vmem:[#allocation46_spill] sm:$0xff] %v11827_v43  ;;  %4968 = vmatprep.mubr.bf16.mxu0 %v11575_v40  ;;  %v8215_v43 = vld [vmem:[#allocation15 + $0x200] sm:$0xff]  }
 0xa30   : > { %v7329_v37 = vpop.f32.mrb[108].mxu1  ;;  %v7070_v19 = vpop.f32.mrb[48].mxu0 }
 0xa31   : > { %v7330_v56 = vpop.f32.mrb[109].mxu1  ;;  %v7071_v15 = vpop.f32.mrb[49].mxu0 }
 0xa32   : > { %v11836_v2 = vadd.f32 %v7330_v56, %v7329_v37  ;;  %v7332_v8 = vpop.f32.mrb[110].mxu1  ;;  %v11838_v54 = vadd.f32 %v7071_v15, %v7070_v19  ;;  %v7073_v23 = vpop.f32.mrb[50].mxu0 }
 0xa33   : > { %v7333_v44 = vpop.f32.mrb[111].mxu1  ;;  %v7074_v29 = vpop.f32.mrb[51].mxu0 }
 0xa34   : > { %12786 = vst [vmem:[#allocation45_spill] sm:$0xff] %v11836_v2  ;;  %v11841_v32 = vadd.f32 %v7333_v44, %v7332_v8  ;;  %v11843_v40 = vadd.f32 %v7074_v29, %v7073_v23 }
 0xa35   : > { %4969 = vmatmul.mubr.bf16.gmra.mrb[156].mxu0 %v11545_v12  ;;  %v8216_v12 = vld [vmem:[#allocation15 + $0x208] sm:$0xff]  }
 0xa36   : > { %12787 = vst [vmem:[#allocation67_spill] sm:$0xff] %v11841_v32  ;;  %7542 = vmatprep.mubr.msk.bf16.mxu0 %vm9073_vm0, %v12765_v10 }
 0xa38   : > { %v7335_v27 = vpop.f32.mrb[112].mxu1  ;;  %v7076_v14 = vpop.f32.mrb[52].mxu0 }
 0xa39   : > { %v7336_v37 = vpop.f32.mrb[113].mxu1  ;;  %v7077_v56 = vpop.f32.mrb[53].mxu0 }
 0xa3a   : > { %v11848_v19 = vadd.f32 %v7336_v37, %v7335_v27  ;;  %v7338_v15 = vpop.f32.mrb[114].mxu1  ;;  %v11850_v2 = vadd.f32 %v7077_v56, %v7076_v14  ;;  %v7079_v62 = vpop.f32.mrb[54].mxu0 }
 0xa3b   : > { %v7339_v8 = vpop.f32.mrb[115].mxu1  ;;  %v7080_v44 = vpop.f32.mrb[55].mxu0 }
 0xa3c   : > { %12788 = vst [vmem:[#allocation47_spill] sm:$0xff] %v11848_v19  ;;  %v11852_v23 = vadd.f32 %v7339_v8, %v7338_v15  ;;  %v11854_v29 = vadd.f32 %v7080_v44, %v7079_v62  ;;  %v8217_v8 = vld [vmem:[#allocation15 + $0x210] sm:$0xff]  }
 0xa3d   : > { %7543 = vmatmul.mubr.bf16.vlgmr.msra.gmra.mrb[160].mxu0 %v11590_v17 }
 0xa3e   : > { %12789 = vst [vmem:[#allocation43_spill] sm:$0xff] %v11852_v23  ;;  %7603 = vmatpush3.bf16.msra.mxu0 %v8215_v43  ;;  %7546 = vmatprep.mubr.msk.bf16.mxu0 %vm9073_vm0, %v12765_v10 }
 0xa3f   : > { %7604 = vmatprep.subr.bf16.mxu0 %v12765_v10 }
 0xa40   : > { %v7341_v27 = vpop.f32.mrb[116].mxu1  ;;  %v7082_v14 = vpop.f32.mrb[56].mxu0 }
 0xa41   : > { %v7342_v37 = vpop.f32.mrb[117].mxu1  ;;  %v7083_v56 = vpop.f32.mrb[57].mxu0 }
 0xa42   : > { %v11860_v19 = vadd.f32 %v7342_v37, %v7341_v27  ;;  %v7344_v32 = vpop.f32.mrb[118].mxu1  ;;  %v11862_v15 = vadd.f32 %v7083_v56, %v7082_v14  ;;  %v7085_v62 = vpop.f32.mrb[58].mxu0  ;;  %7605 = vmatpush3.bf16.msra.mxu0 %v8216_v12  ;;  %v8219_v27 = vld [vmem:[#allocation15 + $0x218] sm:$0xff]  }
 0xa43   : > { %v7345_v17 = vpop.f32.mrb[119].mxu1  ;;  %v7086_v43 = vpop.f32.mrb[59].mxu0  ;;  %7606 = vmatprep.subr.bf16.mxu0 %v12765_v10 }
 0xa44   : > { %12790 = vst [vmem:[#allocation44_spill] sm:$0xff] %v11860_v19  ;;  %v11865_v44 = vadd.f32 %v7345_v17, %v7344_v32  ;;  %v11867_v23 = vadd.f32 %v7086_v43, %v7085_v62  ;;  %v8225_v17 = vld [vmem:[#allocation15 + $0x220] sm:$0xff]  }
 0xa45   : > { %7547 = vmatmul.mubr.bf16.gmra.mrb[164].mxu0 %v11598_v53 }
 0xa46   : > { %12791 = vst [vmem:[#allocation50_spill] sm:$0xff] %v11865_v44  ;;  %7550 = vmatprep.mubr.msk.bf16.mxu0 %vm9073_vm0, %v12765_v10  ;;  %7607 = vmatpush3.bf16.msra.mxu0 %v8217_v8 }
 0xa47   : > { %7608 = vmatprep.subr.bf16.mxu0 %v12765_v10 }
 0xa48   : > { %v7347_v14 = vpop.f32.mrb[120].mxu1  ;;  %v7088_v12 = vpop.f32.mrb[60].mxu0 }
 0xa49   : > { %v7348_v37 = vpop.f32.mrb[121].mxu1  ;;  %v7089_v56 = vpop.f32.mrb[61].mxu0 }
 0xa4a   : > { %v11873_v19 = vadd.f32 %v7348_v37, %v7347_v14  ;;  %v7350_v48 = vpop.f32.mrb[122].mxu1  ;;  %v11875_v32 = vadd.f32 %v7089_v56, %v7088_v12  ;;  %v7091_v62 = vpop.f32.mrb[62].mxu0  ;;  %7609 = vmatpush3.bf16.msra.mxu0 %v8219_v27  ;;  %v8230_v14 = vld [vmem:[#allocation15 + $0x228] sm:$0xff]  }
 0xa4b   : > { %v7351_v43 = vpop.f32.mrb[123].mxu1  ;;  %v7092_v44 = vpop.f32.mrb[63].mxu0  ;;  %7610 = vmatprep.subr.bf16.mxu0 %v12765_v10 }
 0xa4c   : > { %12792 = vst [vmem:[#allocation51_spill] sm:$0xff] %v11873_v19  ;;  %v11878_v8 = vadd.f32 %v7351_v43, %v7350_v48  ;;  %v11880_v58 = vadd.f32 %v7092_v44, %v7091_v62  ;;  %v8234_v62 = vld [vmem:[#allocation15 + $0x230] sm:$0xff]  }
 0xa4d   : > { %7551 = vmatmul.mubr.bf16.gmra.mrb[168].mxu0 %v11602_v28 }
 0xa4e   : > { %12793 = vst [vmem:[#allocation48_spill] sm:$0xff] %v11878_v8  ;;  %7554 = vmatprep.mubr.msk.bf16.mxu0 %vm9073_vm0, %v12765_v10  ;;  %7611 = vmatpush3.bf16.msra.mxu0 %v8225_v17 }
 0xa4f   : > { %7612 = vmatprep.subr.bf16.mxu0 %v12765_v10 }
 0xa50   : > { %v7353_v12 = vpop.f32.mrb[124].mxu1  ;;  %v7094_v27 = vpop.f32.mrb[64].mxu0 }
 0xa51   : > { %v7354_v37 = vpop.f32.mrb[125].mxu1  ;;  %v7095_v56 = vpop.f32.mrb[65].mxu0 }
 0xa52   : > { %v11886_v19 = vadd.f32 %v7354_v37, %v7353_v12  ;;  %v7356_v3 = vpop.f32.mrb[126].mxu1  ;;  %v11888_v48 = vadd.f32 %v7095_v56, %v7094_v27  ;;  %v7097_v44 = vpop.f32.mrb[66].mxu0  ;;  %7613 = vmatpush3.bf16.msra.mxu0 %v8230_v14  ;;  %v8238_v12 = vld [vmem:[#allocation15 + $0x238] sm:$0xff]   ;;  %v4291_v14 = vadd.f32 %v11706_v42, %v11896_v1  ;;  %v4294_v56 = vadd.f32 %v11711_v6, %v11896_v1 }
 0xa53   : > { %v7357_v43 = vpop.f32.mrb[127].mxu1  ;;  %v7098_v8 = vpop.f32.mrb[67].mxu0  ;;  %7614 = vmatprep.subr.bf16.mxu0 %v12765_v10 }
 0xa54   : > { %12794 = vst [vmem:[#allocation70_spill] sm:$0xff] %v11886_v19  ;;  %v11891_v17 = vadd.f32 %v7357_v43, %v7356_v3  ;;  %v11893_v46 = vadd.f32 %v7098_v8, %v7097_v44  ;;  %v4283_v3 = vadd.f32 %v11696_v16, %v11896_v1  ;;  %v4307_v16 = vadd.f32 %v11727_v45, %v11896_v1 }
 0xa55   : > { %7555 = vmatmul.mubr.bf16.gmra.mrb[172].mxu0 %v11610_v5 }
 0xa56   : > { %12795 = vst [vmem:[#allocation71_spill] sm:$0xff] %v11891_v17  ;;  %7558 = vmatprep.mubr.msk.bf16.mxu0 %vm9073_vm0, %v12765_v10  ;;  %7615 = vmatpush3.bf16.msra.mxu0 %v8234_v62  ;;  %v4286_v62 = vadd.f32 %v11698_v51, %v11896_v1 }
 0xa57   : > { %7616 = vmatprep.subr.bf16.mxu0 %v12765_v10 }
 0xa58   : > { %v7496_v27 = vpop.f32.mrb[68].mxu0 }
 0xa59   : > { %v11905_v8 = vadd.f32 %v7496_v27, %v4291_v14  ;;  %v4443_v37 = vpop.f32.mrb[69].mxu0  ;;  %v4299_v14 = vadd.f32 %v11717_v60, %v11896_v1  ;;  %v4323_v60 = vadd.f32 %v11754_v52, %v11896_v1 }
 0xa5a   : > { %v11909_v44 = vadd.f32 %v4443_v37, %v4283_v3  ;;  %v7497_v43 = vpop.f32.mrb[70].mxu0  ;;  %7617 = vmatpush3.bf16.msra.mxu0 %v8238_v12  ;;  %v4310_v12 = vadd.f32 %v11731_v9, %v11896_v1  ;;  %v4302_v37 = vadd.f32 %v11721_v26, %v11896_v1 }
 0xa5b   : > { %v11913_v42 = vadd.f32 %v7497_v43, %v4294_v56  ;;  %v4446_v17 = vpop.f32.mrb[71].mxu0 }
 0xa5c   : > { %12796 = vst [vmem:[#allocation72_spill] sm:$0xff] %v11909_v44  ;;  %v11915_v19 = vadd.f32 %v4446_v17, %v4286_v62  ;;  %v4315_v62 = vadd.f32 %v11740_v49, %v11896_v1  ;;  %v4339_v49 = vadd.f32 %v11782_v18, %v11896_v1 }
 0xa5d   : > { %7559 = vmatmul.mubr.bf16.gmra.mrb[176].mxu0 %v11614_v7 }
 0xa5e   : > { %12797 = vst [vmem:[#allocation73_spill] sm:$0xff] %v11915_v19  ;;  %7562 = vmatprep.mubr.msk.bf16.mxu0 %vm9073_vm0, %v12765_v10 }
 0xa60   : > { %v7500_v6 = vpop.f32.mrb[72].mxu0 }
 0xa61   : > { %v11924_v27 = vadd.f32 %v7500_v6, %v4307_v16  ;;  %v4459_v51 = vpop.f32.mrb[73].mxu0  ;;  %v4326_v6 = vadd.f32 %v11759_v59, %v11896_v1 }
 0xa62   : > { %v11928_v17 = vadd.f32 %v4459_v51, %v4299_v14  ;;  %v7501_v3 = vpop.f32.mrb[74].mxu0 }
 0xa63   : > { %v11932_v56 = vadd.f32 %v7501_v3, %v4310_v12  ;;  %v4462_v43 = vpop.f32.mrb[75].mxu0  ;;  %v4318_v12 = vadd.f32 %v11745_v34, %v11896_v1 }
 0xa64   : > { %v11934_v45 = vadd.f32 %v4462_v43, %v4302_v37  ;;  %v4331_v43 = vadd.f32 %v11768_v25, %v11896_v1  ;;  %v4355_v25 = vadd.f32 %v11810_v61, %v11896_v1 }
 0xa65   : > { %7563 = vmatmul.mubr.bf16.gmra.mrb[180].mxu0 %v11622_v55 }
 0xa66   : > { %7566 = vmatprep.mubr.msk.bf16.mxu0 %vm9073_vm0, %v12765_v10 }
 0xa68   : > { %v7504_v9 = vpop.f32.mrb[76].mxu0 }
 0xa69   : > { %v11943_v16 = vadd.f32 %v7504_v9, %v4323_v60  ;;  %v4475_v26 = vpop.f32.mrb[77].mxu0  ;;  %v4342_v9 = vadd.f32 %v11787_v21, %v11896_v1 }
 0xa6a   : > { %v11947_v14 = vadd.f32 %v4475_v26, %v4315_v62  ;;  %v7505_v51 = vpop.f32.mrb[78].mxu0 }
 0xa6b   : > { %v11951_v3 = vadd.f32 %v7505_v51, %v4326_v6  ;;  %v4478_v37 = vpop.f32.mrb[79].mxu0  ;;  %v4334_v6 = vadd.f32 %v11773_v47, %v11896_v1 }
 0xa6c   : > { %v11953_v52 = vadd.f32 %v4478_v37, %v4318_v12  ;;  %v4347_v37 = vadd.f32 %v11796_v24, %v11896_v1  ;;  %v4371_v24 = vadd.f32 %v11838_v54, %v11896_v1 }
 0xa6d   : > { %7567 = vmatmul.mubr.bf16.gmra.mrb[184].mxu0 %v11626_v13 }
 0xa6e   : > { %7570 = vmatprep.mubr.msk.bf16.mxu0 %vm9073_vm0, %v12765_v10 }
 0xa70   : > { %v7508_v59 = vpop.f32.mrb[80].mxu0 }
 0xa71   : > { %v11962_v60 = vadd.f32 %v7508_v59, %v4339_v49  ;;  %v4491_v34 = vpop.f32.mrb[81].mxu0  ;;  %v4358_v59 = vadd.f32 %v11815_v4, %v11896_v1 }
 0xa72   : > { %v11966_v62 = vadd.f32 %v4491_v34, %v4331_v43  ;;  %v7509_v26 = vpop.f32.mrb[82].mxu0 }
 0xa73   : > { %v11970_v51 = vadd.f32 %v7509_v26, %v4342_v9  ;;  %v4494_v12 = vpop.f32.mrb[83].mxu0  ;;  %v4350_v9 = vadd.f32 %v11801_v11, %v11896_v1 }
 0xa74   : > { %v11972_v18 = vadd.f32 %v4494_v12, %v4334_v6  ;;  %v4363_v12 = vadd.f32 %v11824_v38, %v11896_v1  ;;  %v4387_v38 = vadd.f32 %v11862_v15, %v11896_v1 }
 0xa75   : > { %7571 = vmatmul.mubr.bf16.gmra.mrb[188].mxu0 %v11634_v39 }
 0xa76   : > { %7574 = vmatprep.mubr.msk.bf16.mxu0 %vm9073_vm0, %v12765_v10 }
 0xa78   : > { %v7512_v21 = vpop.f32.mrb[84].mxu0 }
 0xa79   : > { %v11981_v49 = vadd.f32 %v7512_v21, %v4355_v25  ;;  %v4507_v47 = vpop.f32.mrb[85].mxu0  ;;  %v4374_v21 = vadd.f32 %v11843_v40, %v11896_v1 }
 0xa7a   : > { %v11985_v43 = vadd.f32 %v4507_v47, %v4347_v37  ;;  %v7513_v34 = vpop.f32.mrb[86].mxu0 }
 0xa7b   : > { %v11989_v26 = vadd.f32 %v7513_v34, %v4358_v59  ;;  %v4510_v6 = vpop.f32.mrb[87].mxu0  ;;  %v4366_v59 = vadd.f32 %v11829_v30, %v11896_v1 }
 0xa7c   : > { %v11991_v61 = vadd.f32 %v4510_v6, %v4350_v9  ;;  %v4379_v6 = vadd.f32 %v11850_v2, %v11896_v1  ;;  %v4403_v2 = vadd.f32 %v11888_v48, %v11896_v1 }
 0xa7d   : > { %7575 = vmatmul.mubr.bf16.gmra.mrb[192].mxu0 %v11638_v36 }
 0xa7e   : > { %7578 = vmatprep.mubr.msk.bf16.mxu0 %vm9073_vm0, %v12765_v10 }
 0xa80   : > { %v7516_v4 = vpop.f32.mrb[88].mxu0 }
 0xa81   : > { %v12000_v25 = vadd.f32 %v7516_v4, %v4371_v24  ;;  %v4523_v11 = vpop.f32.mrb[89].mxu0  ;;  %v4390_v4 = vadd.f32 %v11867_v23, %v11896_v1 }
 0xa82   : > { %v12004_v37 = vadd.f32 %v4523_v11, %v4363_v12  ;;  %v7517_v47 = vpop.f32.mrb[90].mxu0 }
 0xa83   : > { %v12008_v34 = vadd.f32 %v7517_v47, %v4374_v21  ;;  %v4526_v9 = vpop.f32.mrb[91].mxu0  ;;  %v4382_v21 = vadd.f32 %v11854_v29, %v11896_v1 }
 0xa84   : > { %v12010_v54 = vadd.f32 %v4526_v9, %v4366_v59  ;;  %v4395_v9 = vadd.f32 %v11875_v32, %v11896_v1 }
 0xa85   : > { %12798 = vst [vmem:[#allocation74_spill] sm:$0xff] %v12008_v34  ;;  %7579 = vmatmul.mubr.bf16.gmra.mrb[196].mxu0 %v11647_v41 }
 0xa86   : > { %7582 = vmatprep.mubr.msk.bf16.mxu0 %vm9073_vm0, %v12765_v10 }
 0xa88   : > { %v7520_v40 = vpop.f32.mrb[92].mxu0 }
 0xa89   : > { %v12019_v24 = vadd.f32 %v7520_v40, %v4387_v38  ;;  %v4539_v30 = vpop.f32.mrb[93].mxu0  ;;  %v4406_v40 = vadd.f32 %v11893_v46, %v11896_v1 }
 0xa8a   : > { %v12023_v12 = vadd.f32 %v4539_v30, %v4379_v6  ;;  %v7521_v11 = vpop.f32.mrb[94].mxu0 }
 0xa8b   : > { %12799 = vst [vmem:[#allocation75_spill] sm:$0xff] %v12019_v24  ;;  %v12027_v47 = vadd.f32 %v7521_v11, %v4390_v4  ;;  %v4542_v59 = vpop.f32.mrb[95].mxu0  ;;  %v4398_v4 = vadd.f32 %v11880_v58, %v11896_v1 }
 0xa8c   : > { %12800 = vst [vmem:[#allocation76_spill] sm:$0xff] %v12023_v12  ;;  %v12029_v15 = vadd.f32 %v4542_v59, %v4382_v21 }
 0xa8d   : > { %12801 = vst [vmem:[#allocation77_spill] sm:$0xff] %v12027_v47  ;;  %7583 = vmatmul.mubr.bf16.gmra.mrb[200].mxu0 %v11651_v20 }
 0xa8e   : > { %12802 = vst [vmem:[#allocation78_spill] sm:$0xff] %v12029_v15  ;;  %7586 = vmatprep.mubr.msk.bf16.mxu0 %vm9073_vm0, %v12765_v10 }
 0xa90   : > { %v7524_v23 = vpop.f32.mrb[96].mxu0 }
 0xa91   : > { %v12038_v38 = vadd.f32 %v7524_v23, %v4403_v2  ;;  %v4555_v29 = vpop.f32.mrb[97].mxu0 }
 0xa92   : > { %v12042_v6 = vadd.f32 %v4555_v29, %v4395_v9  ;;  %v7525_v30 = vpop.f32.mrb[98].mxu0 }
 0xa93   : > { %12803 = vst [vmem:[#allocation79_spill] sm:$0xff] %v12038_v38  ;;  %v12046_v11 = vadd.f32 %v7525_v30, %v4406_v40  ;;  %v4558_v21 = vpop.f32.mrb[99].mxu0 }
 0xa94   : > { %12804 = vst [vmem:[#allocation80_spill] sm:$0xff] %v12042_v6  ;;  %v12048_v48 = vadd.f32 %v4558_v21, %v4398_v4 }
 0xa95   : > { %12805 = vst [vmem:[#allocation81_spill] sm:$0xff] %v12046_v11  ;;  %7587 = vmatmul.mubr.bf16.gmra.mrb[204].mxu0 %v11659_v31 }
 0xa96   : > { %12806 = vst [vmem:[#allocation82_spill] sm:$0xff] %v12048_v48  ;;  %7590 = vmatprep.mubr.msk.bf16.mxu0 %vm9073_vm0, %v12765_v10 }
 0xa98   : > { %v7140_v32 = vpop.f32.mrb[100].mxu0 }
 0xa99   : > { %v7141_v59 = vpop.f32.mrb[101].mxu0 }
 0xa9a   : > { %v12053_v2 = vadd.f32 %v7141_v59, %v7140_v32  ;;  %v7143_v46 = vpop.f32.mrb[102].mxu0 }
 0xa9b   : > { %v7144_v23 = vpop.f32.mrb[103].mxu0 }
 0xa9c   : > { %v12055_v9 = vadd.f32 %v7144_v23, %v7143_v46 }
 0xa9d   : > { %7591 = vmatmul.mubr.bf16.gmra.mrb[208].mxu0 %v11663_v22 }
 0xa9e   : > { %7594 = vmatprep.mubr.msk.bf16.mxu0 %vm9073_vm0, %v12765_v10 }
 0xaa0   : > { %v7146_v1 = vpop.f32.mrb[104].mxu0 }
 0xaa1   : > { %v7147_v58 = vpop.f32.mrb[105].mxu0 }
 0xaa2   : > { %v12060_v29 = vadd.f32 %v7147_v58, %v7146_v1  ;;  %v7149_v40 = vpop.f32.mrb[106].mxu0 }
 0xaa3   : > { %v7150_v30 = vpop.f32.mrb[107].mxu0 }
 0xaa4   : > { %v12062_v4 = vadd.f32 %v7150_v30, %v7149_v40 }
 0xaa5   : > { %7595 = vmatmul.mubr.bf16.gmra.mrb[212].mxu0 %v11671_v0 }
 0xaa6   : > { %7598 = vmatprep.mubr.msk.bf16.mxu0 %vm9073_vm0, %v12765_v10 }
 0xaa8   : > { %v7152_v21 = vpop.f32.mrb[108].mxu0 }
 0xaa9   : > { %v7153_v32 = vpop.f32.mrb[109].mxu0 }
 0xaaa   : > { %v12067_v59 = vadd.f32 %v7153_v32, %v7152_v21  ;;  %v7155_v46 = vpop.f32.mrb[110].mxu0 }
 0xaab   : > { %v7156_v23 = vpop.f32.mrb[111].mxu0 }
 0xaac   : > { %v12069_v50 = vadd.f32 %v7156_v23, %v7155_v46 }
 0xaad   : > { %7599 = vmatmul.mubr.bf16.gmra.mrb[216].mxu0 %v11675_v33 }
 0xaae   : > { %7618 = vmatprep.mubr.msk.bf16.mxu0 %vm9073_vm0, %v12765_v10 }
 0xab0   : > { %v7158_v1 = vpop.f32.mrb[112].mxu0 }
 0xab1   : > { %v7159_v58 = vpop.f32.mrb[113].mxu0 }
 0xab2   : > { %v12074_v40 = vadd.f32 %v7159_v58, %v7158_v1  ;;  %v7161_v30 = vpop.f32.mrb[114].mxu0 }
 0xab3   : > { %v7162_v19 = vpop.f32.mrb[115].mxu0 }
 0xab4   : > { %v12076_v57 = vadd.f32 %v7162_v19, %v7161_v30 }
 0xab5   : > { %7619 = vmatmul.mubr.bf16.vlgmr.msra.gmra.mrb[220].mxu0 %v11598_v53 }
 0xab6   : > { %7622 = vmatprep.mubr.msk.bf16.mxu0 %vm9073_vm0, %v12765_v10 }
 0xab8   : > { %v7164_v21 = vpop.f32.mrb[116].mxu0 }
 0xab9   : > { %v7165_v32 = vpop.f32.mrb[117].mxu0 }
 0xaba   : > { %v12081_v46 = vadd.f32 %v7165_v32, %v7164_v21  ;;  %v7167_v23 = vpop.f32.mrb[118].mxu0 }
 0xabb   : > { %v7168_v44 = vpop.f32.mrb[119].mxu0 }
 0xabc   : > { %v12083_v35 = vadd.f32 %v7168_v44, %v7167_v23 }
 0xabd   : > { %7623 = vmatmul.mubr.bf16.gmra.mrb[224].mxu0 %v11602_v28 }
 0xabe   : > { %7626 = vmatprep.mubr.msk.bf16.mxu0 %vm9073_vm0, %v12765_v10 }
 0xac0   : > { %v7170_v19 = vpop.f32.mrb[120].mxu0 }
 0xac1   : > { %v7171_v1 = vpop.f32.mrb[121].mxu0 }
 0xac2   : > { %v12088_v58 = vadd.f32 %v7171_v1, %v7170_v19  ;;  %v7173_v53 = vpop.f32.mrb[122].mxu0 }
 0xac3   : > { %v7174_v30 = vpop.f32.mrb[123].mxu0 }
 0xac4   : > { %v12090_v11 = vadd.f32 %v7174_v30, %v7173_v53 }
 0xac5   : > { %7627 = vmatmul.mubr.bf16.gmra.mrb[228].mxu0 %v11610_v5 }
 0xac6   : > { %7630 = vmatprep.mubr.msk.bf16.mxu0 %vm9073_vm0, %v12765_v10 }
 0xac8   : > { %v7176_v44 = vpop.f32.mrb[124].mxu0 }
 0xac9   : > { %v7177_v21 = vpop.f32.mrb[125].mxu0 }
 0xaca   : > { %v12095_v32 = vadd.f32 %v7177_v21, %v7176_v44  ;;  %v7179_v28 = vpop.f32.mrb[126].mxu0 }
 0xacb   : > { %v7180_v23 = vpop.f32.mrb[127].mxu0 }
 0xacc   : > { %v12097_v38 = vadd.f32 %v7180_v23, %v7179_v28 }
 0xacd   : > { %7631 = vmatmul.mubr.bf16.gmra.mrb[232].mxu0 %v11614_v7 }
 0xace   : > { %7634 = vmatprep.mubr.msk.bf16.mxu0 %vm9073_vm0, %v12765_v10 }
 0xad0   : > { %v7182_v19 = vpop.f32.mrb[128].mxu0 }
 0xad1   : > { %v7183_v1 = vpop.f32.mrb[129].mxu0 }
 0xad2   : > { %v12102_v53 = vadd.f32 %v7183_v1, %v7182_v19  ;;  %v7185_v5 = vpop.f32.mrb[130].mxu0 }
 0xad3   : > { %v7186_v30 = vpop.f32.mrb[131].mxu0 }
 0xad4   : > { %v12104_v48 = vadd.f32 %v7186_v30, %v7185_v5 }
 0xad5   : > { %7635 = vmatmul.mubr.bf16.gmra.mrb[236].mxu0 %v11622_v55 }
 0xad6   : > { %7638 = vmatprep.mubr.msk.bf16.mxu0 %vm9073_vm0, %v12765_v10 }
 0xad8   : > { %v7188_v44 = vpop.f32.mrb[132].mxu0 }
 0xad9   : > { %v7189_v21 = vpop.f32.mrb[133].mxu0 }
 0xada   : > { %v12109_v28 = vadd.f32 %v7189_v21, %v7188_v44  ;;  %v7191_v7 = vpop.f32.mrb[134].mxu0  ;;  %v12121_v44 = vpop.f32.mrb[128].mxu1 }
 0xadb   : > { %v7192_v23 = vpop.f32.mrb[135].mxu0  ;;  %12807 = vst [vmem:[#allocation83_spill] sm:$0xff] %v12121_v44  ;;  %v12125_v21 = vpop.f32.mrb[129].mxu1 }
 0xadc   : > { %v12111_v6 = vadd.f32 %v7192_v23, %v7191_v7  ;;  %12808 = vst [vmem:[#allocation84_spill] sm:$0xff] %v12125_v21 }
 0xadd   : > { %7639 = vmatmul.mubr.bf16.gmra.mrb[240].mxu0 %v11626_v13 }
 0xade   : > { %7642 = vmatprep.mubr.msk.bf16.mxu0 %vm9073_vm0, %v12765_v10 }
 0xae0   : > { %v7194_v19 = vpop.f32.mrb[136].mxu0 }
 0xae1   : > { %v7195_v1 = vpop.f32.mrb[137].mxu0 }
 0xae2   : > { %v12116_v5 = vadd.f32 %v7195_v1, %v7194_v19  ;;  %v7197_v55 = vpop.f32.mrb[138].mxu0  ;;  %v12129_v1 = vpop.f32.mrb[130].mxu1 }
 0xae3   : > { %v7198_v30 = vpop.f32.mrb[139].mxu0  ;;  %12809 = vst [vmem:[#allocation85_spill] sm:$0xff] %v12129_v1 }
 0xae4   : > { %v12118_v47 = vadd.f32 %v7198_v30, %v7197_v55  ;;  %v12133_v55 = vpop.f32.mrb[131].mxu1 }
 0xae5   : > { %7643 = vmatmul.mubr.bf16.gmra.mrb[244].mxu0 %v11634_v39  ;;  %12810 = vst [vmem:[#allocation86_spill] sm:$0xff] %v12133_v55  ;;  %v12136_v39 = vpop.f32.mrb[132].mxu1 }
 0xae6   : > { %7646 = vmatprep.mubr.msk.bf16.mxu0 %vm9073_vm0, %v12765_v10  ;;  %12811 = vst [vmem:[#allocation87_spill] sm:$0xff] %v12136_v39  ;;  %v12140_v30 = vpop.f32.mrb[133].mxu1 }
 0xae7   : > { %12812 = vst [vmem:[#allocation88_spill] sm:$0xff] %v12140_v30  ;;  %v12142_v44 = vpop.f32.mrb[134].mxu1 }
 0xae8   : > { %v7200_v13 = vpop.f32.mrb[140].mxu0  ;;  %12813 = vst [vmem:[#allocation89_spill] sm:$0xff] %v12142_v44 }
 0xae9   : > { %v7201_v7 = vpop.f32.mrb[141].mxu0 }
 0xaea   : > { %v12127_v23 = vadd.f32 %v7201_v7, %v7200_v13  ;;  %v7203_v24 = vpop.f32.mrb[142].mxu0  ;;  %v12144_v7 = vpop.f32.mrb[135].mxu1 }
 0xaeb   : > { %v7204_v19 = vpop.f32.mrb[143].mxu0  ;;  %12814 = vst [vmem:[#allocation90_spill] sm:$0xff] %v12144_v7  ;;  %v12146_v1 = vpop.f32.mrb[136].mxu1 }
 0xaec   : > { %v12131_v15 = vadd.f32 %v7204_v19, %v7203_v24  ;;  %12815 = vst [vmem:[#allocation91_spill] sm:$0xff] %v12146_v1  ;;  %v12150_v55 = vpop.f32.mrb[137].mxu1 }
 0xaed   : > { %7647 = vmatmul.mubr.bf16.gmra.mrb[248].mxu0 %v11638_v36  ;;  %12816 = vst [vmem:[#allocation92_spill] sm:$0xff] %v12150_v55  ;;  %v12152_v39 = vpop.f32.mrb[138].mxu1 }
 0xaee   : > { %7650 = vmatprep.mubr.msk.bf16.mxu0 %vm9073_vm0, %v12765_v10  ;;  %12817 = vst [vmem:[#allocation93_spill] sm:$0xff] %v12152_v39  ;;  %v12156_v34 = vpop.f32.mrb[139].mxu1 }
 0xaef   : > { %12819 = vst [vmem:[#allocation95_spill] sm:$0xff] %v12156_v34  ;;  %v12159_v44 = vpop.f32.mrb[140].mxu1 }
 0xaf0   : > { %v7206_v13 = vpop.f32.mrb[144].mxu0  ;;  %12820 = vst [vmem:[#allocation96_spill] sm:$0xff] %v12159_v44  ;;  %v12163_v1 = vpop.f32.mrb[141].mxu1 }
 0xaf1   : > { %v7207_v21 = vpop.f32.mrb[145].mxu0  ;;  %12821 = vst [vmem:[#allocation97_spill] sm:$0xff] %v12163_v1 }
 0xaf2   : > { %v12148_v24 = vadd.f32 %v7207_v21, %v7206_v13  ;;  %v7209_v19 = vpop.f32.mrb[146].mxu0  ;;  %v12165_v21 = vpop.f32.mrb[142].mxu1 }
 0xaf3   : > { %v7210_v36 = vpop.f32.mrb[147].mxu0  ;;  %12822 = vst [vmem:[#allocation98_spill] sm:$0xff] %v12165_v21  ;;  %v12167_v55 = vpop.f32.mrb[143].mxu1 }
 0xaf4   : > { %v12154_v12 = vadd.f32 %v7210_v36, %v7209_v19  ;;  %12823 = vst [vmem:[#allocation99_spill] sm:$0xff] %v12167_v55  ;;  %v12169_v39 = vpop.f32.mrb[144].mxu1 }
 0xaf5   : > { %7651 = vmatmul.mubr.bf16.gmra.mrb[252].mxu0 %v11647_v41  ;;  %12824 = vst [vmem:[#allocation100_spill] sm:$0xff] %v12169_v39  ;;  %v12173_v34 = vpop.f32.mrb[145].mxu1 }
 0xaf6   : > { %12818 = vst [vmem:[#allocation94_spill] sm:$0xff] %v12154_v12  ;;  %7654 = vmatprep.mubr.msk.bf16.mxu0 %vm9073_vm0, %v12765_v10  ;;  %12825 = vst [vmem:[#allocation101_spill] sm:$0xff] %v12173_v34  ;;  %v12175_v44 = vpop.f32.mrb[146].mxu1 }
 0xaf7   : > { %12826 = vst [vmem:[#allocation102_spill] sm:$0xff] %v12175_v44  ;;  %v12179_v12 = vpop.f32.mrb[147].mxu1 }
 0xaf8   : > { %v7212_v13 = vpop.f32.mrb[148].mxu0  ;;  %12828 = vst [vmem:[#allocation104_spill] sm:$0xff] %v12179_v12  ;;  %v12182_v21 = vpop.f32.mrb[148].mxu1 }
 0xaf9   : > { %v7213_v7 = vpop.f32.mrb[149].mxu0  ;;  %12829 = vst [vmem:[#allocation105_spill] sm:$0xff] %v12182_v21  ;;  %v12186_v39 = vpop.f32.mrb[149].mxu1 }
 0xafa   : > { %v12171_v19 = vadd.f32 %v7213_v7, %v7212_v13  ;;  %v7215_v36 = vpop.f32.mrb[150].mxu0  ;;  %12830 = vst [vmem:[#allocation106_spill] sm:$0xff] %v12186_v39  ;;  %v12188_v7 = vpop.f32.mrb[150].mxu1 }
 0xafb   : > { %v7216_v41 = vpop.f32.mrb[151].mxu0  ;;  %12831 = vst [vmem:[#allocation107_spill] sm:$0xff] %v12188_v7  ;;  %v12190_v34 = vpop.f32.mrb[151].mxu1 }
 0xafc   : > { %v12177_v30 = vadd.f32 %v7216_v41, %v7215_v36  ;;  %12832 = vst [vmem:[#allocation108_spill] sm:$0xff] %v12190_v34  ;;  %v12192_v44 = vpop.f32.mrb[152].mxu1 }
 0xafd   : > { %7655 = vmatmul.mubr.bf16.gmra.mrb[0].mxu0 %v11651_v20  ;;  %12833 = vst [vmem:[#allocation109_spill] sm:$0xff] %v12192_v44  ;;  %v12196_v12 = vpop.f32.mrb[153].mxu1 }
 0xafe   : > { %12827 = vst [vmem:[#allocation103_spill] sm:$0xff] %v12177_v30  ;;  %7658 = vmatprep.mubr.msk.bf16.mxu0 %vm9073_vm0, %v12765_v10  ;;  %12834 = vst [vmem:[#allocation110_spill] sm:$0xff] %v12196_v12  ;;  %v12198_v21 = vpop.f32.mrb[154].mxu1 }
 0xaff   : > { %12835 = vst [vmem:[#allocation111_spill] sm:$0xff] %v12198_v21  ;;  %v12202_v30 = vpop.f32.mrb[155].mxu1 }
 0xb00   : > { %v7218_v13 = vpop.f32.mrb[152].mxu0  ;;  %12836 = vst [vmem:[#allocation112_spill] sm:$0xff] %v12202_v30  ;;  %v12205_v7 = vpop.f32.mrb[156].mxu1 }
 0xb01   : > { %v7219_v55 = vpop.f32.mrb[153].mxu0  ;;  %12837 = vst [vmem:[#allocation113_spill] sm:$0xff] %v12205_v7  ;;  %v12209_v44 = vpop.f32.mrb[157].mxu1 }
 0xb02   : > { %v12194_v36 = vadd.f32 %v7219_v55, %v7218_v13  ;;  %v7221_v41 = vpop.f32.mrb[154].mxu0  ;;  %12838 = vst [vmem:[#allocation114_spill] sm:$0xff] %v12209_v44  ;;  %v12211_v55 = vpop.f32.mrb[158].mxu1 }
 0xb03   : > { %v7222_v20 = vpop.f32.mrb[155].mxu0  ;;  %12839 = vst [vmem:[#allocation115_spill] sm:$0xff] %v12211_v55 }
 0xb04   : > { %v12200_v1 = vadd.f32 %v7222_v20, %v7221_v41 }
 0xb05   : > { %7659 = vmatmul.mubr.bf16.gmra.mrb[4].mxu0 %v11659_v31 }
 0xb06   : > { %7662 = vmatprep.mubr.msk.bf16.mxu0 %vm9073_vm0, %v12765_v10 }
 0xb08   : > { %v7224_v13 = vpop.f32.mrb[156].mxu0 }
 0xb09   : > { %v7225_v12 = vpop.f32.mrb[157].mxu0 }
 0xb0a   : > { %v12213_v34 = vadd.f32 %v7225_v12, %v7224_v13  ;;  %v7227_v21 = vpop.f32.mrb[158].mxu0 }
 0xb0b   : > { %v7228_v41 = vpop.f32.mrb[159].mxu0 }
 0xb0c   : > { %v12215_v20 = vadd.f32 %v7228_v41, %v7227_v21 }
 0xb0d   : > { %7663 = vmatmul.mubr.bf16.gmra.mrb[8].mxu0 %v11663_v22 }
 0xb0e   : > { %7666 = vmatprep.mubr.msk.bf16.mxu0 %vm9073_vm0, %v12765_v10 }
 0xb10   : > { %v5011_v31 = vpop.f32.mrb[160].mxu0 }
 0xb11   : > { %v5012_v30 = vadd.f32 %v12053_v2, %v5011_v31  ;;  %v7544_v39 = vpop.f32.mrb[161].mxu0 }
 0xb12   : > { %v5014_v44 = vpop.f32.mrb[162].mxu0 }
 0xb13   : > { %v12222_v55 = vadd.f32 %v5012_v30, %v11905_v8  ;;  %v5015_v12 = vadd.f32 %v12055_v9, %v5014_v44  ;;  %v7545_v13 = vpop.f32.mrb[163].mxu0 }
 0xb15   : > { %v12226_v7 = vadd.f32 %v5015_v12, %v11913_v42  ;;  %7667 = vmatmul.mubr.bf16.gmra.mrb[12].mxu0 %v11671_v0 }
 0xb16   : > { %7670 = vmatprep.mubr.msk.bf16.mxu0 %vm9073_vm0, %v12765_v10 }
 0xb18   : > { %v5019_v22 = vpop.f32.mrb[164].mxu0 }
 0xb19   : > { %v5020_v21 = vadd.f32 %v12060_v29, %v5019_v22  ;;  %v7548_v2 = vpop.f32.mrb[165].mxu0 }
 0xb1a   : > { %v5022_v39 = vpop.f32.mrb[166].mxu0 }
 0xb1b   : > { %v12233_v41 = vadd.f32 %v5020_v21, %v11928_v17  ;;  %v5023_v8 = vadd.f32 %v12062_v4, %v5022_v39  ;;  %v7549_v9 = vpop.f32.mrb[167].mxu0 }
 0xb1d   : > { %v12237_v44 = vadd.f32 %v5023_v8, %v11934_v45  ;;  %7671 = vmatmul.mubr.bf16.gmra.mrb[16].mxu0 %v11675_v33 }
 0xb1e   : > { %7674 = vmatprep.mubr.msk.bf16.mxu0 %vm9073_vm0, %v12765_v10 }
 0xb20   : > { %v5027_v0 = vpop.f32.mrb[168].mxu0 }
 0xb21   : > { %v5028_v42 = vadd.f32 %v12067_v59, %v5027_v0  ;;  %v7552_v29 = vpop.f32.mrb[169].mxu0 }
 0xb22   : > { %v5030_v30 = vpop.f32.mrb[170].mxu0 }
 0xb23   : > { %v12244_v31 = vadd.f32 %v5028_v42, %v11924_v27  ;;  %v5031_v17 = vadd.f32 %v12069_v50, %v5030_v30  ;;  %v7553_v4 = vpop.f32.mrb[171].mxu0 }
 0xb25   : > { %v12248_v12 = vadd.f32 %v5031_v17, %v11932_v56  ;;  %7675 = vmatmul.mubr.bf16.gmra.mrb[20].mxu0 %v11681_v63 }
 0xb28   : > { %v5035_v33 = vpop.f32.mrb[172].mxu0 }
 0xb29   : > { %v5036_v45 = vadd.f32 %v12074_v40, %v5035_v33  ;;  %v7556_v10 = vpop.f32.mrb[173].mxu0 }
 0xb2a   : > { %v5038_v13 = vpop.f32.mrb[174].mxu0 }
 0xb2b   : > { %v12253_v59 = vadd.f32 %v5036_v45, %v11947_v14  ;;  %v5039_v22 = vadd.f32 %v12076_v57, %v5038_v13  ;;  %v7557_v27 = vpop.f32.mrb[175].mxu0 }
 0xb2d   : > { %v12257_v21 = vadd.f32 %v5039_v22, %v11953_v52 }
 0xb30   : > { %v5043_v50 = vpop.f32.mrb[176].mxu0 }
 0xb31   : > { %v5044_v56 = vadd.f32 %v12081_v46, %v5043_v50  ;;  %v7560_v2 = vpop.f32.mrb[177].mxu0 }
 0xb32   : > { %v5046_v39 = vpop.f32.mrb[178].mxu0 }
 0xb33   : > { %v12261_v63 = vadd.f32 %v5044_v56, %v11943_v16  ;;  %v5047_v40 = vadd.f32 %v12083_v35, %v5046_v39  ;;  %v7561_v8 = vpop.f32.mrb[179].mxu0 }
 0xb35   : > { %v12265_v14 = vadd.f32 %v5047_v40, %v11951_v3 }
 0xb38   : > { %v5051_v9 = vpop.f32.mrb[180].mxu0 }
 0xb39   : > { %v5052_v57 = vadd.f32 %v12088_v58, %v5051_v9  ;;  %v7564_v0 = vpop.f32.mrb[181].mxu0 }
 0xb3a   : > { %v5054_v52 = vpop.f32.mrb[182].mxu0 }
 0xb3b   : > { %v12269_v42 = vadd.f32 %v5052_v57, %v11966_v62  ;;  %v5055_v46 = vadd.f32 %v12090_v11, %v5054_v52  ;;  %v7565_v29 = vpop.f32.mrb[183].mxu0 }
 0xb3c   : > { %v12840_v29 = vld [vmem:[#allocation74_spill] sm:$0xff] }
 0xb3d   : > { %v12273_v16 = vadd.f32 %v5055_v46, %v11972_v18 }
 0xb40   : > { %v5059_v30 = vpop.f32.mrb[184].mxu0 }
 0xb41   : > { %v5060_v35 = vadd.f32 %v12095_v32, %v5059_v30  ;;  %v7568_v17 = vpop.f32.mrb[185].mxu0 }
 0xb42   : > { %v5062_v3 = vpop.f32.mrb[186].mxu0  ;;  %v12841_v17 = vld [vmem:[#allocation76_spill] sm:$0xff] }
 0xb43   : > { %v12277_v4 = vadd.f32 %v5060_v35, %v11962_v60  ;;  %v5063_v58 = vadd.f32 %v12097_v38, %v5062_v3  ;;  %v7569_v33 = vpop.f32.mrb[187].mxu0 }
 0xb45   : > { %v12281_v62 = vadd.f32 %v5063_v58, %v11970_v51 }
 0xb48   : > { %v5067_v45 = vpop.f32.mrb[188].mxu0 }
 0xb49   : > { %v5068_v11 = vadd.f32 %v12102_v53, %v5067_v45  ;;  %v7572_v10 = vpop.f32.mrb[189].mxu0  ;;  %v12843_v45 = vld [vmem:[#allocation78_spill] sm:$0xff] }
 0xb4a   : > { %v5070_v18 = vpop.f32.mrb[190].mxu0 }
 0xb4b   : > { %v12285_v13 = vadd.f32 %v5068_v11, %v11985_v43  ;;  %v5071_v32 = vadd.f32 %v12104_v48, %v5070_v18  ;;  %v7573_v22 = vpop.f32.mrb[191].mxu0 }
 0xb4d   : > { %v12289_v60 = vadd.f32 %v5071_v32, %v11991_v61  ;;  %v12844_v32 = vld [vmem:[#allocation75_spill] sm:$0xff] }
 0xb50   : > { %v5075_v27 = vpop.f32.mrb[192].mxu0 }
 0xb51   : > { %v5076_v38 = vadd.f32 %v12109_v28, %v5075_v27  ;;  %v7576_v50 = vpop.f32.mrb[193].mxu0 }
 0xb52   : > { %v5078_v51 = vpop.f32.mrb[194].mxu0  ;;  %v12846_v50 = vld [vmem:[#allocation77_spill] sm:$0xff] }
 0xb53   : > { %v12293_v56 = vadd.f32 %v5076_v38, %v11981_v49  ;;  %v5079_v53 = vadd.f32 %v12111_v6, %v5078_v51  ;;  %v7577_v2 = vpop.f32.mrb[195].mxu0 }
 0xb55   : > { %v12297_v43 = vadd.f32 %v5079_v53, %v11989_v26 }
 0xb58   : > { %v5083_v39 = vpop.f32.mrb[196].mxu0 }
 0xb59   : > { %v5084_v48 = vadd.f32 %v12116_v5, %v5083_v39  ;;  %v7580_v40 = vpop.f32.mrb[197].mxu0 }
 0xb5a   : > { %v5086_v61 = vpop.f32.mrb[198].mxu0  ;;  %v12847_v40 = vld [vmem:[#allocation80_spill] sm:$0xff] }
 0xb5b   : > { %v12301_v8 = vadd.f32 %v5084_v48, %v12004_v37  ;;  %v5087_v28 = vadd.f32 %v12118_v47, %v5086_v61  ;;  %v7581_v9 = vpop.f32.mrb[199].mxu0 }
 0xb5c   : > { %v12848_v9 = vld [vmem:[#allocation82_spill] sm:$0xff] }
 0xb5d   : > { %v12305_v49 = vadd.f32 %v5087_v28, %v12010_v54 }
 0xb60   : > { %v5091_v57 = vpop.f32.mrb[200].mxu0 }
 0xb61   : > { %v5092_v6 = vadd.f32 %v12127_v23, %v5091_v57  ;;  %v7584_v0 = vpop.f32.mrb[201].mxu0  ;;  %v12842_v23 = vld [vmem:[#allocation94_spill] sm:$0xff] }
 0xb62   : > { %v5094_v26 = vpop.f32.mrb[202].mxu0  ;;  %v12341_v0 = vld [vmem:[#allocation26] ss:$0 sm:$0xff] }
 0xb63   : > { %v12309_v52 = vadd.f32 %v5092_v6, %v12000_v25  ;;  %v5095_v5 = vadd.f32 %v12131_v15, %v5094_v26  ;;  %v7585_v46 = vpop.f32.mrb[203].mxu0  ;;  %v12339_v6 = vpop.f32.mrb[159].mxu1 }
 0xb65   : > { %v12313_v37 = vadd.f32 %v5095_v5, %v12840_v29 }
 0xb68   : > { %v5099_v30 = vpop.f32.mrb[204].mxu0 }
 0xb69   : > { %v5100_v47 = vadd.f32 %v12148_v24, %v5099_v30  ;;  %v7588_v35 = vpop.f32.mrb[205].mxu0  ;;  %v12845_v24 = vld [vmem:[#allocation103_spill] sm:$0xff] }
 0xb6a   : > { %v5102_v54 = vpop.f32.mrb[206].mxu0 }
 0xb6b   : > { %v12317_v3 = vadd.f32 %v5100_v47, %v12841_v17  ;;  %v5103_v58 = vadd.f32 %v12842_v23, %v5102_v54  ;;  %v7589_v33 = vpop.f32.mrb[207].mxu0  ;;  %v12850_v47 = vld [vmem:[#allocation79_spill] sm:$0xff] }
 0xb6c   : > { %v12851_v17 = vld [vmem:[#allocation115_spill] sm:$0xff] }
 0xb6d   : > { %v12321_v25 = vadd.f32 %v5103_v58, %v12843_v45  ;;  %v6104_v23 = vadd.f32 %v12851_v17, %v12341_v0  ;;  %v12852_v58 = vld [vmem:[#allocation81_spill] sm:$0xff] }
 0xb70   : > { %v5107_v11 = vpop.f32.mrb[208].mxu0 }
 0xb71   : > { %v5108_v15 = vadd.f32 %v12171_v19, %v5107_v11  ;;  %v7592_v10 = vpop.f32.mrb[209].mxu0 }
 0xb72   : > { %v5110_v18 = vpop.f32.mrb[210].mxu0 }
 0xb73   : > { %v12325_v22 = vadd.f32 %v5108_v15, %v12844_v32  ;;  %v5111_v27 = vadd.f32 %v12845_v24, %v5110_v18  ;;  %v7593_v38 = vpop.f32.mrb[211].mxu0  ;;  %v12854_v32 = vld [vmem:[#allocation49_spill] sm:$0xff] }
 0xb75   : > { %v12329_v51 = vadd.f32 %v5111_v27, %v12846_v50  ;;  %v12855_v50 = vld [vmem:[#allocation86_spill] sm:$0xff] }
 0xb78   : > { %v5115_v53 = vpop.f32.mrb[212].mxu0 }
 0xb79   : > { %v5116_v2 = vadd.f32 %v12194_v36, %v5115_v53  ;;  %v7596_v39 = vpop.f32.mrb[213].mxu0  ;;  %v12849_v36 = vld [vmem:[#allocation113_spill] sm:$0xff]  ;;  %v12856_v53 = vld [vmem:[#allocation72_spill] sm:$0xff] }
 0xb7a   : > { %v5118_v48 = vpop.f32.mrb[214].mxu0  ;;  %v6101_v29 = vadd.f32 %v12849_v36, %v12341_v0  ;;  %v12857_v39 = vld [vmem:[#allocation54_spill] sm:$0xff] }
 0xb7b   : > { %v12333_v61 = vadd.f32 %v5116_v2, %v12847_v40  ;;  %v5119_v19 = vadd.f32 %v12200_v1, %v5118_v48  ;;  %v7597_v28 = vpop.f32.mrb[215].mxu0 }
 0xb7c   : > { %v12858_v28 = vld [vmem:[#allocation73_spill] sm:$0xff] }
 0xb7d   : > { %v12337_v57 = vadd.f32 %v5119_v19, %v12848_v9 }
 0xb80   : > { %v5123_v26 = vpop.f32.mrb[216].mxu0 }
 0xb81   : > { %v5124_v5 = vadd.f32 %v12213_v34, %v5123_v26  ;;  %v7600_v46 = vpop.f32.mrb[217].mxu0  ;;  %v12853_v34 = vld [vmem:[#allocation84_spill] sm:$0xff] }
 0xb82   : > { %v5126_v30 = vpop.f32.mrb[218].mxu0  ;;  %v5981_v10 = vadd.f32 %v12341_v0, %v12853_v34  ;;  %v12859_v46 = vld [vmem:[#allocation83_spill] sm:$0xff] }
 0xb83   : > { %v5158_v35 = vadd.f32 %v5124_v5, %v12850_v47  ;;  %v5127_v1 = vadd.f32 %v12215_v20, %v5126_v30  ;;  %v7601_v54 = vpop.f32.mrb[219].mxu0  ;;  %v5984_v20 = vadd.f32 %v12341_v0, %v12855_v50  ;;  %v5989_v36 = vadd.f32 %v12859_v46, %v12341_v0  ;;  %v12860_v30 = vld [vmem:[#allocation55_spill] sm:$0xff] }
 0xb84   : > { %v12861_v54 = vld [vmem:[#allocation85_spill] sm:$0xff] }
 0xb85   : > { %v5159_v33 = vadd.f32 %v5127_v1, %v12852_v58  ;;  %v6169_v45 = vadd.f32 %v6101_v29, %v5158_v35  ;;  %v5992_v17 = vadd.f32 %v12861_v54, %v12341_v0  ;;  %v12862_v58 = vld [vmem:[#allocation52_spill] sm:$0xff] }
 0xb86   : > { %v12870_v54 = vld [vmem:[#allocation56_spill] sm:$0xff] }
 0xb87   : > { %v6170_v11 = vadd.f32 %v6104_v23, %v5159_v33 }
 0xb88   : > { %v5600_v15 = vpop.f32.mrb[220].mxu0 }
 0xb89   : > { %v6935_v18 = vpack.c.bf16 %v6170_v11, %v6169_v45  ;;  %v5601_v24 = vadd.f32 %v12854_v32, %v5600_v15  ;;  %v7620_v27 = vpop.f32.mrb[221].mxu0 }
 0xb8a   : > { %v5603_v38 = vpop.f32.mrb[222].mxu0  ;;  %v12864_v27 = vld [vmem:[#allocation53_spill] sm:$0xff] }
 0xb8b   : > { %6951 = vst [vmem:[%s12358_s7 + $0x78] sm:$0xff] %v6935_v18   ;;  %v5719_v2 = vadd.f32 %v5601_v24, %v12856_v53  ;;  %v5604_v48 = vadd.f32 %v12857_v39, %v5603_v38  ;;  %v7621_v40 = vpop.f32.mrb[223].mxu0  ;;  %v12863_v18 = vld [vmem:[#allocation88_spill] sm:$0xff]  ;;  %v12865_v53 = vld [vmem:[#allocation90_spill] sm:$0xff] }
 0xb8c   : > { %v5997_v32 = vadd.f32 %v12341_v0, %v12863_v18  ;;  %v12866_v39 = vld [vmem:[#allocation58_spill] sm:$0xff] }
 0xb8d   : > { %v6139_v19 = vadd.f32 %v5981_v10, %v5719_v2  ;;  %v5720_v9 = vadd.f32 %v5604_v48, %v12858_v28 }
 0xb8f   : > { %v6140_v26 = vadd.f32 %v5984_v20, %v5720_v9 }
 0xb90   : > { %v5608_v5 = vpop.f32.mrb[224].mxu0 }
 0xb91   : > { %v6860_v29 = vpack.c.bf16 %v6140_v26, %v6139_v19  ;;  %v5609_v47 = vadd.f32 %v12860_v30, %v5608_v5  ;;  %v7624_v35 = vpop.f32.mrb[225].mxu0  ;;  %v12867_v26 = vld [vmem:[#allocation87_spill] sm:$0xff] }
 0xb92   : > { %v5611_v1 = vpop.f32.mrb[226].mxu0  ;;  %v6005_v5 = vadd.f32 %v12867_v26, %v12341_v0  ;;  %v12869_v35 = vld [vmem:[#allocation89_spill] sm:$0xff] }
 0xb93   : > { %6861 = vst [vmem:[%s12358_s7] sm:$0xff] %v6860_v29   ;;  %v5721_v23 = vadd.f32 %v5609_v47, %v12222_v55  ;;  %v5612_v33 = vadd.f32 %v12862_v58, %v5611_v1  ;;  %v7625_v45 = vpop.f32.mrb[227].mxu0  ;;  %v6000_v55 = vadd.f32 %v12341_v0, %v12865_v53 }
 0xb95   : > { %v6141_v11 = vadd.f32 %v5989_v36, %v5721_v23  ;;  %v5722_v15 = vadd.f32 %v5612_v33, %v12226_v7  ;;  %v12868_v36 = vld [vmem:[#allocation59_spill] sm:$0xff] }
 0xb97   : > { %v6142_v34 = vadd.f32 %v5992_v17, %v5722_v15 }
 0xb98   : > { %v5616_v10 = vpop.f32.mrb[228].mxu0 }
 0xb99   : > { %v6865_v24 = vpack.c.bf16 %v6142_v34, %v6141_v11  ;;  %v5617_v38 = vadd.f32 %v12864_v27, %v5616_v10  ;;  %v7628_v50 = vpop.f32.mrb[229].mxu0  ;;  %v12871_v11 = vld [vmem:[#allocation92_spill] sm:$0xff]  ;;  %v12872_v10 = vld [vmem:[#allocation57_spill] sm:$0xff]  ;;  %v12873_v27 = vld [vmem:[#allocation95_spill] sm:$0xff] }
 0xb9a   : > { %v5619_v20 = vpop.f32.mrb[230].mxu0  ;;  %v6013_v15 = vadd.f32 %v12341_v0, %v12871_v11  ;;  %v12874_v50 = vld [vmem:[#allocation62_spill] sm:$0xff] }
 0xb9b   : > { %6937 = vst [vmem:[%s12358_s7 + $0x8] sm:$0xff] %v6865_v24   ;;  %v5723_v2 = vadd.f32 %v5617_v38, %v12233_v41  ;;  %v5620_v48 = vadd.f32 %v12866_v39, %v5619_v20  ;;  %v7629_v7 = vpop.f32.mrb[231].mxu0  ;;  %v6008_v41 = vadd.f32 %v12869_v35, %v12341_v0 }
 0xb9d   : > { %v6143_v40 = vadd.f32 %v5997_v32, %v5723_v2  ;;  %v5724_v19 = vadd.f32 %v5620_v48, %v12237_v44  ;;  %v12875_v48 = vld [vmem:[#allocation91_spill] sm:$0xff] }
 0xb9e   : > { %v6021_v7 = vadd.f32 %v12875_v48, %v12341_v0 }
 0xb9f   : > { %v6144_v28 = vadd.f32 %v6000_v55, %v5724_v19  ;;  %v12876_v19 = vld [vmem:[#allocation63_spill] sm:$0xff] }
 0xba0   : > { %v5624_v9 = vpop.f32.mrb[232].mxu0 }
 0xba1   : > { %v6870_v46 = vpack.c.bf16 %v6144_v28, %v6143_v40  ;;  %v5625_v29 = vadd.f32 %v12868_v36, %v5624_v9  ;;  %v7632_v30 = vpop.f32.mrb[233].mxu0  ;;  %v12878_v36 = vld [vmem:[#allocation60_spill] sm:$0xff] }
 0xba2   : > { %v5627_v47 = vpop.f32.mrb[234].mxu0 }
 0xba3   : > { %6938 = vst [vmem:[%s12358_s7 + $0x10] sm:$0xff] %v6870_v46   ;;  %v5725_v1 = vadd.f32 %v5625_v29, %v12244_v31  ;;  %v5628_v17 = vadd.f32 %v12870_v54, %v5627_v47  ;;  %v7633_v44 = vpop.f32.mrb[235].mxu0  ;;  %v6016_v31 = vadd.f32 %v12341_v0, %v12873_v27  ;;  %v12883_v27 = vld [vmem:[#allocation96_spill] sm:$0xff] }
 0xba4   : > { %v12880_v44 = vld [vmem:[#allocation61_spill] sm:$0xff] }
 0xba5   : > { %v6145_v23 = vadd.f32 %v6005_v5, %v5725_v1  ;;  %v5726_v58 = vadd.f32 %v5628_v17, %v12248_v12  ;;  %v12877_v5 = vld [vmem:[#allocation93_spill] sm:$0xff] }
 0xba6   : > { %v12879_v1 = vld [vmem:[#allocation97_spill] sm:$0xff] }
 0xba7   : > { %v6146_v33 = vadd.f32 %v6008_v41, %v5726_v58  ;;  %v6029_v54 = vadd.f32 %v12341_v0, %v12879_v1 }
 0xba8   : > { %v5632_v45 = vpop.f32.mrb[236].mxu0 }
 0xba9   : > { %v6875_v34 = vpack.c.bf16 %v6146_v33, %v6145_v23  ;;  %v5633_v18 = vadd.f32 %v12872_v10, %v5632_v45  ;;  %v7636_v32 = vpop.f32.mrb[237].mxu0  ;;  %v12881_v45 = vld [vmem:[#allocation99_spill] sm:$0xff] }
 0xbaa   : > { %v5635_v24 = vpop.f32.mrb[238].mxu0 }
 0xbab   : > { %6939 = vst [vmem:[%s12358_s7 + $0x18] sm:$0xff] %v6875_v34   ;;  %v5727_v38 = vadd.f32 %v5633_v18, %v12253_v59  ;;  %v5636_v20 = vadd.f32 %v12874_v50, %v5635_v24  ;;  %v7637_v12 = vpop.f32.mrb[239].mxu0  ;;  %v6024_v59 = vadd.f32 %v12877_v5, %v12341_v0  ;;  %v12884_v50 = vld [vmem:[#allocation64_spill] sm:$0xff] }
 0xbad   : > { %v6147_v53 = vadd.f32 %v6013_v15, %v5727_v38  ;;  %v5728_v55 = vadd.f32 %v5636_v20, %v12257_v21  ;;  %v12882_v15 = vld [vmem:[#allocation66_spill] sm:$0xff] }
 0xbaf   : > { %v6148_v2 = vadd.f32 %v6016_v31, %v5728_v55  ;;  %v6037_v31 = vadd.f32 %v12883_v27, %v12341_v0  ;;  %v12885_v55 = vld [vmem:[#allocation98_spill] sm:$0xff] }
 0xbb0   : > { %v5640_v39 = vpop.f32.mrb[240].mxu0 }
 0xbb1   : > { %v6880_v40 = vpack.c.bf16 %v6148_v2, %v6147_v53  ;;  %v5641_v28 = vadd.f32 %v12876_v19, %v5640_v39  ;;  %v7640_v9 = vpop.f32.mrb[241].mxu0  ;;  %v12886_v39 = vld [vmem:[#allocation65_spill] sm:$0xff] }
 0xbb2   : > { %v5643_v26 = vpop.f32.mrb[242].mxu0  ;;  %v12887_v9 = vld [vmem:[#allocation101_spill] sm:$0xff] }
 0xbb3   : > { %6940 = vst [vmem:[%s12358_s7 + $0x20] sm:$0xff] %v6880_v40   ;;  %v5729_v46 = vadd.f32 %v5641_v28, %v12261_v63  ;;  %v5644_v29 = vadd.f32 %v12878_v36, %v5643_v26  ;;  %v7641_v21 = vpop.f32.mrb[243].mxu0  ;;  %v6032_v63 = vadd.f32 %v12341_v0, %v12881_v45  ;;  %v6045_v26 = vadd.f32 %v12341_v0, %v12887_v9 }
 0xbb4   : > { %v12889_v21 = vld [vmem:[#allocation104_spill] sm:$0xff] }
 0xbb5   : > { %v6149_v30 = vadd.f32 %v6021_v7, %v5729_v46  ;;  %v5730_v47 = vadd.f32 %v5644_v29, %v12265_v14 }
 0xbb7   : > { %v6150_v35 = vadd.f32 %v6024_v59, %v5730_v47  ;;  %v12888_v59 = vld [vmem:[#allocation68_spill] sm:$0xff]  ;;  %v12890_v47 = vld [vmem:[#allocation42_spill] sm:$0xff] }
 0xbb8   : > { %v5648_v41 = vpop.f32.mrb[244].mxu0 }
 0xbb9   : > { %v6885_v17 = vpack.c.bf16 %v6150_v35, %v6149_v30  ;;  %v5649_v23 = vadd.f32 %v12880_v44, %v5648_v41  ;;  %v7644_v58 = vpop.f32.mrb[245].mxu0  ;;  %v12891_v44 = vld [vmem:[#allocation100_spill] sm:$0xff] }
 0xbba   : > { %v5651_v33 = vpop.f32.mrb[246].mxu0 }
 0xbbb   : > { %6941 = vst [vmem:[%s12358_s7 + $0x28] sm:$0xff] %v6885_v17   ;;  %v5731_v11 = vadd.f32 %v5649_v23, %v12269_v42  ;;  %v5652_v34 = vadd.f32 %v12882_v15, %v5651_v33  ;;  %v7645_v14 = vpop.f32.mrb[247].mxu0  ;;  %v6040_v42 = vadd.f32 %v12885_v55, %v12341_v0  ;;  %v6053_v23 = vadd.f32 %v12891_v44, %v12341_v0  ;;  %v12892_v33 = vld [vmem:[#allocation69_spill] sm:$0xff]  ;;  %v12893_v15 = vld [vmem:[#allocation102_spill] sm:$0xff]  ;;  %v12904_v44 = vld [vmem:[#allocation44_spill] sm:$0xff] }
 0xbbc   : > { %v12894_v14 = vld [vmem:[#allocation46_spill] sm:$0xff] }
 0xbbd   : > { %v6151_v10 = vadd.f32 %v6029_v54, %v5731_v11  ;;  %v5732_v18 = vadd.f32 %v5652_v34, %v12273_v16 }
 0xbbf   : > { %v6152_v32 = vadd.f32 %v6032_v63, %v5732_v18 }
 0xbc0   : > { %v5656_v24 = vpop.f32.mrb[248].mxu0 }
 0xbc1   : > { %v6890_v38 = vpack.c.bf16 %v6152_v32, %v6151_v10  ;;  %v5657_v20 = vadd.f32 %v12884_v50, %v5656_v24  ;;  %v7648_v12 = vpop.f32.mrb[249].mxu0 }
 0xbc2   : > { %v5659_v53 = vpop.f32.mrb[250].mxu0 }
 0xbc3   : > { %6942 = vst [vmem:[%s12358_s7 + $0x30] sm:$0xff] %v6890_v38   ;;  %v5733_v2 = vadd.f32 %v5657_v20, %v12277_v4  ;;  %v5660_v48 = vadd.f32 %v12886_v39, %v5659_v53  ;;  %v7649_v16 = vpop.f32.mrb[251].mxu0  ;;  %v6048_v4 = vadd.f32 %v12341_v0, %v12889_v21  ;;  %v12896_v20 = vld [vmem:[#allocation45_spill] sm:$0xff]  ;;  %v12898_v39 = vld [vmem:[#allocation67_spill] sm:$0xff] }
 0xbc5   : > { %v6153_v7 = vadd.f32 %v6037_v31, %v5733_v2  ;;  %v5734_v40 = vadd.f32 %v5660_v48, %v12281_v62  ;;  %v12895_v31 = vld [vmem:[#allocation106_spill] sm:$0xff] }
 0xbc6   : > { %v6061_v38 = vadd.f32 %v12341_v0, %v12895_v31 }
 0xbc7   : > { %v6154_v19 = vadd.f32 %v6040_v42, %v5734_v40  ;;  %v12897_v42 = vld [vmem:[#allocation108_spill] sm:$0xff] }
 0xbc8   : > { %v5664_v28 = vpop.f32.mrb[252].mxu0 }
 0xbc9   : > { %v6895_v5 = vpack.c.bf16 %v6154_v19, %v6153_v7  ;;  %v5665_v46 = vadd.f32 %v12888_v59, %v5664_v28  ;;  %v7652_v36 = vpop.f32.mrb[253].mxu0  ;;  %v12899_v28 = vld [vmem:[#allocation105_spill] sm:$0xff] }
 0xbca   : > { %v5667_v29 = vpop.f32.mrb[254].mxu0  ;;  %v6069_v9 = vadd.f32 %v12899_v28, %v12341_v0  ;;  %v12913_v28 = vld [vmem:[#allocation71_spill] sm:$0xff] }
 0xbcb   : > { %6943 = vst [vmem:[%s12358_s7 + $0x38] sm:$0xff] %v6895_v5   ;;  %v5735_v30 = vadd.f32 %v5665_v46, %v12285_v13  ;;  %v5668_v35 = vadd.f32 %v12890_v47, %v5667_v29  ;;  %v7653_v62 = vpop.f32.mrb[255].mxu0  ;;  %v6056_v13 = vadd.f32 %v12893_v15, %v12341_v0  ;;  %v12900_v5 = vld [vmem:[#allocation47_spill] sm:$0xff] }
 0xbcc   : > { %v12901_v29 = vld [vmem:[#allocation107_spill] sm:$0xff] }
 0xbcd   : > { %v6155_v41 = vadd.f32 %v6045_v26, %v5735_v30  ;;  %v5736_v1 = vadd.f32 %v5668_v35, %v12289_v60 }
 0xbcf   : > { %v6156_v54 = vadd.f32 %v6048_v4, %v5736_v1  ;;  %v12902_v4 = vld [vmem:[#allocation43_spill] sm:$0xff]  ;;  %v12903_v1 = vld [vmem:[#allocation110_spill] sm:$0xff] }
 0xbd0   : > { %v5672_v17 = vpop.f32.mrb[0].mxu0 }
 0xbd1   : > { %v6900_v58 = vpack.c.bf16 %v6156_v54, %v6155_v41  ;;  %v5673_v45 = vadd.f32 %v12892_v33, %v5672_v17  ;;  %v7656_v63 = vpop.f32.mrb[1].mxu0  ;;  %v6077_v54 = vadd.f32 %v12341_v0, %v12903_v1 }
 0xbd2   : > { %v5675_v11 = vpop.f32.mrb[2].mxu0 }
 0xbd3   : > { %6944 = vst [vmem:[%s12358_s7 + $0x40] sm:$0xff] %v6900_v58   ;;  %v5737_v34 = vadd.f32 %v5673_v45, %v12293_v56  ;;  %v5676_v10 = vadd.f32 %v12894_v14, %v5675_v11  ;;  %v7657_v60 = vpop.f32.mrb[3].mxu0  ;;  %v6064_v56 = vadd.f32 %v12341_v0, %v12897_v42  ;;  %v12905_v45 = vld [vmem:[#allocation112_spill] sm:$0xff]  ;;  %v12906_v11 = vld [vmem:[#allocation50_spill] sm:$0xff] }
 0xbd4   : > { %v12907_v60 = vld [vmem:[#allocation109_spill] sm:$0xff] }
 0xbd5   : > { %v6157_v18 = vadd.f32 %v6053_v23, %v5737_v34  ;;  %v5738_v32 = vadd.f32 %v5676_v10, %v12297_v43 }
 0xbd7   : > { %v6158_v24 = vadd.f32 %v6056_v13, %v5738_v32 }
 0xbd8   : > { %v5680_v27 = vpop.f32.mrb[4].mxu0 }
 0xbd9   : > { %v6905_v50 = vpack.c.bf16 %v6158_v24, %v6157_v18  ;;  %v5681_v12 = vadd.f32 %v12896_v20, %v5680_v27  ;;  %v7660_v53 = vpop.f32.mrb[5].mxu0  ;;  %v6085_v18 = vadd.f32 %v12907_v60, %v12341_v0  ;;  %v12908_v24 = vld [vmem:[#allocation51_spill] sm:$0xff] }
 0xbda   : > { %v5683_v55 = vpop.f32.mrb[6].mxu0  ;;  %v12910_v53 = vld [vmem:[#allocation111_spill] sm:$0xff] }
 0xbdb   : > { %6945 = vst [vmem:[%s12358_s7 + $0x48] sm:$0xff] %v6905_v50   ;;  %v5739_v2 = vadd.f32 %v5681_v12, %v12301_v8  ;;  %v5684_v48 = vadd.f32 %v12898_v39, %v5683_v55  ;;  %v7661_v43 = vpop.f32.mrb[7].mxu0  ;;  %v6072_v8 = vadd.f32 %v12901_v29, %v12341_v0  ;;  %v12909_v50 = vld [vmem:[#allocation48_spill] sm:$0xff]  ;;  %v12911_v39 = vld [vmem:[#allocation114_spill] sm:$0xff] }
 0xbdd   : > { %v6159_v16 = vadd.f32 %v6061_v38, %v5739_v2  ;;  %v5740_v7 = vadd.f32 %v5684_v48, %v12305_v49  ;;  %v6093_v48 = vadd.f32 %v12341_v0, %v12911_v39 }
 0xbdf   : > { %v6160_v40 = vadd.f32 %v6064_v56, %v5740_v7 }
 0xbe0   : > { %v5688_v19 = vpop.f32.mrb[8].mxu0 }
 0xbe1   : > { %v6910_v26 = vpack.c.bf16 %v6160_v40, %v6159_v16  ;;  %v5689_v59 = vadd.f32 %v12900_v5, %v5688_v19  ;;  %v7664_v46 = vpop.f32.mrb[9].mxu0  ;;  %v12912_v16 = vld [vmem:[#allocation70_spill] sm:$0xff]  ;;  %v6096_v5 = vadd.f32 %v12341_v0, %v12339_v6 }
 0xbe2   : > { %v5691_v36 = vpop.f32.mrb[10].mxu0 }
 0xbe3   : > { %6946 = vst [vmem:[%s12358_s7 + $0x50] sm:$0xff] %v6910_v26   ;;  %v5741_v21 = vadd.f32 %v5689_v59, %v12309_v52  ;;  %v5692_v30 = vadd.f32 %v12902_v4, %v5691_v36  ;;  %v7665_v49 = vpop.f32.mrb[11].mxu0  ;;  %v6080_v52 = vadd.f32 %v12341_v0, %v12905_v45 }
 0xbe5   : > { %v6161_v47 = vadd.f32 %v6069_v9, %v5741_v21  ;;  %v5742_v35 = vadd.f32 %v5692_v30, %v12313_v37 }
 0xbe7   : > { %v6162_v62 = vadd.f32 %v6072_v8, %v5742_v35 }
 0xbe8   : > { %v5696_v41 = vpop.f32.mrb[12].mxu0 }
 0xbe9   : > { %v6915_v17 = vpack.c.bf16 %v6162_v62, %v6161_v47  ;;  %v5697_v23 = vadd.f32 %v12904_v44, %v5696_v41  ;;  %v7668_v58 = vpop.f32.mrb[13].mxu0 }
 0xbea   : > { %v5699_v33 = vpop.f32.mrb[14].mxu0 }
 0xbeb   : > { %6947 = vst [vmem:[%s12358_s7 + $0x58] sm:$0xff] %v6915_v17   ;;  %v5743_v63 = vadd.f32 %v5697_v23, %v12317_v3  ;;  %v5700_v15 = vadd.f32 %v12906_v11, %v5699_v33  ;;  %v7669_v37 = vpop.f32.mrb[15].mxu0 }
 0xbed   : > { %v6163_v13 = vadd.f32 %v6077_v54, %v5743_v63  ;;  %v5744_v34 = vadd.f32 %v5700_v15, %v12321_v25  ;;  %v6088_v25 = vadd.f32 %v12910_v53, %v12341_v0 }
 0xbef   : > { %v6164_v14 = vadd.f32 %v6080_v52, %v5744_v34 }
 0xbf0   : > { %v5704_v10 = vpop.f32.mrb[16].mxu0 }
 0xbf1   : > { %v6920_v32 = vpack.c.bf16 %v6164_v14, %v6163_v13  ;;  %v5705_v27 = vadd.f32 %v12908_v24, %v5704_v10  ;;  %v7672_v31 = vpop.f32.mrb[17].mxu0 }
 0xbf2   : > { %v5707_v38 = vpop.f32.mrb[18].mxu0 }
 0xbf3   : > { %6948 = vst [vmem:[%s12358_s7 + $0x60] sm:$0xff] %v6920_v32   ;;  %v5745_v3 = vadd.f32 %v5705_v27, %v12325_v22  ;;  %v5708_v20 = vadd.f32 %v12909_v50, %v5707_v38  ;;  %v7673_v12 = vpop.f32.mrb[19].mxu0 }
 0xbf5   : > { %v6165_v55 = vadd.f32 %v6085_v18, %v5745_v3  ;;  %v5746_v42 = vadd.f32 %v5708_v20, %v12329_v51 }
 0xbf7   : > { %v6166_v56 = vadd.f32 %v6088_v25, %v5746_v42 }
 0xbf8   : > { %v5712_v2 = vpop.f32.mrb[20].mxu0 }
 0xbf9   : > { %v6925_v43 = vpack.c.bf16 %v6166_v56, %v6165_v55  ;;  %v5713_v7 = vadd.f32 %v12912_v16, %v5712_v2  ;;  %v7676_v22 = vpop.f32.mrb[21].mxu0 }
 0xbfa   : > { %v5715_v40 = vpop.f32.mrb[22].mxu0 }
 0xbfb   : > { %6949 = vst [vmem:[%s12358_s7 + $0x68] sm:$0xff] %v6925_v43   ;;  %v5747_v19 = vadd.f32 %v5713_v7, %v12333_v61  ;;  %v5716_v9 = vadd.f32 %v12913_v28, %v5715_v40  ;;  %v7677_v51 = vpop.f32.mrb[23].mxu0 }
 0xbfd   : > { %v6167_v26 = vadd.f32 %v6093_v48, %v5747_v19  ;;  %v5748_v59 = vadd.f32 %v5716_v9, %v12337_v57 }
 0xbff   : > { %v6168_v46 = vadd.f32 %v6096_v5, %v5748_v59 }
 0xc01   : > { %v6930_v36 = vpack.c.bf16 %v6168_v46, %v6167_v26 }
 0xc03   : > { %6950 = vst [vmem:[%s12358_s7 + $0x70] sm:$0xff] %v6930_v36  }
 0xc04   : > { %8970 = shalt.err (!%p8967_p9)
}
 0xc05   : > { %s8971_s18 = scalar_lea.hbm %s12495_s17, 2048  ;;  %s8975_s1 = scalar_lea.hbm %s12914_s22, 4096 }
 0xc06   : > { %p8972_p4 = scmp.ne.s32.totalorder %s12495_s17, %s8971_s18  ;;  %p8976_p0 = scmp.lt.u32.totalorder %s12495_s17, %s12914_s22 }
 0xc07   : > { %p8977_p2 = scmp.lt.u32.totalorder %s8975_s1, %s8971_s18  ;;  %p8979_p10 = scmp.lt.u32.totalorder %s8971_s18, %s12495_s17 }
 0xc08   : > { %p8973_p1 = pnand %p8972_p4, %p12915_p11 }
 0xc09   : > { %p8978_p8 = por %p8977_p2, %p8976_p0 }
 0xc0a   : > { %p8974_p13 = pneg %p8973_p1 }
 0xc0b   : > { %p8980_p12 = por %p8979_p10, %p8978_p8 }
 0xc0d   : > { %p8981_p3 = pnand %p8980_p12, %p8974_p13 }
 0xc0f   : > { %8984 = shalt.err (!%p8981_p3)
}
 0xc10   : > { %s9078_s29 = smov 4  }
 0xc11   : > { %7976 = dma.vmem_to_hbm [thread:$0]  (%p12915_p11), %s12497_s15, 2048, %s12495_s17, %s6332_s27, %s9075_s16, %s9075_s16, %s9078_s29  }
 0xc12 PF: > { %s12916_s25 = sld [smem:[#allocation37_spill]]  ;;  %p12917_p5 = scmp.ne.s32.totalorder %s12654_s0, 0 }
 0xc13   : > { %p12918_p7 = scmp.ge.s32.totalorder %s9051_s21, 2 }
 0xc15   : > { %p8026_p6 = pnand %p12918_p7, %p12917_p5 }
 0xc18   : > { %s6360_s19 = sand.u32 1, %s12916_s25  }
 0xc19   : > { %s6361_s18 = scalar_lea.sflag [#allocation5], %s6360_s19 }
 0xc1a   : > { %9034 = dma.done.wait (!%p8026_p6), %s6361_s18, 2048  }
 0xc1b   : > { %9036 = vsyncadd (!%p8026_p6), %s6361_s18, 4294965248  ;;  %s12919_s18 = sld [smem:[#allocation38_spill]]  ;;  %s12920_s19 = sld [smem:[#allocation39_spill]] }
 0xc1c   : > { %p35_p9 = scmp.ge.s32.totalorder %s9502_s28, 4   ;;  %s12921_s20 = smov %s9513_s3 }
 0xc1d   : > { %s12922_s21 = smov %s9502_s28 }
 0xc1e   :  { %37 = sbr.rel (!%p35_p9) target bundleno = 19 (0x13), region = 185 }
 0xc25   :  { %6366 = vsyncpa [#allocation4], 1 }
 0xc26   :  { %6368 = vsyncpa [#allocation4 + $0x1], 1 }
 0xc27   :  { %6369 = vsyncpa [#allocation7], 1 }
 0xc28   :  { %6370 = vsyncpa [#allocation10], 1 }
 0xc29   :  { %6371 = vsyncpa [#allocation13], 1 }
 0xc2a   :  { %6372 = vsyncpa [#allocation16], 1 }
 0xc2b   :  { %6373 = vsyncpa [#allocation19], 1 }
 0xc2c   :  { %6374 = vsyncpa [#allocation22], 1 }
 0xc2d   :  { %6375 = vsyncpa [#allocation25], 1 }
 0xc2e   :  { %6376 = vsyncpa [#allocation5], 1 }
 0xc2f   :  { %6378 = vsyncpa [#allocation5 + $0x1], 1 }

</bundles_post_ra>
